<compile_context>
chip_gen: v7x
topology: tpu7x:2x2x1
jax: 0.10.0
libtpu: 0.0.40
codegen_flags: <defaults>
</compile_context>

<pallas_src>
import math

import numpy as np

import jax
import jax.numpy as jnp
from jax.experimental import pallas as pl
from jax.experimental.pallas import tpu as pltpu

_K = 3        # every (transposed) convolution in the model is 3x3
LANE = 128    # lane padding of each per-kh block inside the concatenated M


# ---------------------------------------------------------------------------
# Constant-matrix builders (numpy, run once outside the kernel).
# conv(x) == sum_kh R_kh @ X @ M_kh  (+ bias), with X[h, w*Cin + c].
# ---------------------------------------------------------------------------
def _conv_matrices(w, H, W, stride, pad):
    """w: PyTorch Conv2d weight (Cout, Cin, 3, 3), BN already folded."""
    w = np.asarray(w, np.float32)
    Cout, Cin, _, _ = w.shape
    OH = (H + 2 * pad - _K) // stride + 1
    OW = (W + 2 * pad - _K) // stride + 1
    R = np.zeros((_K, OH, H), np.float32)
    for kh in range(_K):
        for oh in range(OH):
            ih = stride * oh - pad + kh
            if 0 <= ih < H:
                R[kh, oh, ih] = 1.0
    Ms = []
    for kh in range(_K):
        M = np.zeros((W * Cin, OW * Cout), np.float32)
        for kw in range(_K):
            C = np.zeros((W, OW), np.float32)
            for ow in range(OW):
                iw = stride * ow - pad + kw
                if 0 <= iw < W:
                    C[iw, ow] = 1.0
            M += np.kron(C, w[:, :, kh, kw].T)          # (Cin, Cout)
        Ms.append(M)
    return R, Ms, OH, OW


def _convT_matrices(w, H, W, stride, pad, opad):
    """w: PyTorch ConvTranspose2d weight (Cin, Cout, 3, 3), BN already folded."""
    w = np.asarray(w, np.float32)
    Cin, Cout, _, _ = w.shape
    OH = (H - 1) * stride - 2 * pad + _K + opad
    OW = (W - 1) * stride - 2 * pad + _K + opad
    R = np.zeros((_K, OH, H), np.float32)
    for kh in range(_K):
        for ih in range(H):
            oh = stride * ih - pad + kh
            if 0 <= oh < OH:
                R[kh, oh, ih] = 1.0
    Ms = []
    for kh in range(_K):
        M = np.zeros((W * Cin, OW * Cout), np.float32)
        for kw in range(_K):
            C = np.zeros((W, OW), np.float32)
            for iw in range(W):
                ow = stride * iw - pad + kw
                if 0 <= ow < OW:
                    C[iw, ow] = 1.0
            M += np.kron(C, w[:, :, kh, kw])            # (Cin, Cout)
        Ms.append(M)
    return R, Ms, OH, OW


def _kron_batch(R, tb):
    """Fold the batch tile into the row-selection matrices: (K,OH,H)->(K,tb*OH,tb*H)."""
    eye = np.eye(tb, dtype=np.float32)
    return np.stack([np.kron(eye, R[k]) for k in range(R.shape[0])])


def _pack_m(Ms):
    """Lane-pad each per-kh M block to 128 and concatenate -> (Win*Cin, K*128)."""
    out = []
    for M in Ms:
        assert M.shape[1] <= LANE
        out.append(np.pad(M, ((0, 0), (0, LANE - M.shape[1]))))
    return np.concatenate(out, axis=1)


def _bias_row(b, reps):
    # bias_row[ow*Cout + co] = b[co]
    return np.tile(np.asarray(b, np.float32), reps).reshape(1, -1)


def _bn_fold(gamma, beta, eps=1e-5):
    # Eval-mode BatchNorm with default running stats (mean=0, var=1).
    gamma = np.asarray(gamma, np.float32)
    beta = np.asarray(beta, np.float32)
    return gamma / np.sqrt(1.0 + eps), beta


def build_constants(p, tb, mm):
    """Fold BN, flatten/unflatten permutations, conv geometry and the batch tile
    into a flat list of matrices consumed by the fused kernel (order matters).
    Matmul operands for the heavy layers are cast to `mm` (bf16); biases and the
    bottleneck / final layers stay f32."""
    c = []

    def add_block(R, Ms, bias_row, dtype):
        c.append(jnp.asarray(_kron_batch(R, tb), dtype))     # (K, tb*OH, tb*H)
        c.append(jnp.asarray(_pack_m(Ms), dtype))            # (Win*Cin, K*128)
        c.append(jnp.asarray(bias_row, jnp.float32))         # (1, OW*Cout)

    # --- encoder CNN: 28 -> 14 -> 7 -> 3 ------------------------------------
    R, Ms, _, OW = _conv_matrices(p["enc_c1_w"], 28, 28, 2, 1)
    add_block(R, Ms, _bias_row(p["enc_c1_b"], OW), mm)

    s2, t2 = _bn_fold(p["enc_bn2_gamma"], p["enc_bn2_beta"])
    w2 = np.asarray(p["enc_c2_w"], np.float32) * s2[:, None, None, None]
    b2 = np.asarray(p["enc_c2_b"], np.float32) * s2 + t2
    R, Ms, _, OW = _conv_matrices(w2, 14, 14, 2, 1)
    add_block(R, Ms, _bias_row(b2, OW), mm)

    R, Ms, _, OW = _conv_matrices(p["enc_c3_w"], 7, 7, 2, 0)
    add_block(R, Ms, _bias_row(p["enc_c3_b"], OW), mm)

    # --- Flatten (C,H,W order) + Linear(288,128): 3 per-spatial-row matmuls ---
    W1 = np.asarray(p["enc_l1_w"], np.float32).reshape(128, 32, 3, 3)  # [o,c,h,w]
    Ms = [np.transpose(W1[:, :, h, :], (2, 1, 0)).reshape(96, 128)     # [w*32+c, o]
          for h in range(3)]
    R = np.zeros((3, 1, 3), np.float32)
    for h in range(3):
        R[h, 0, h] = 1.0
    add_block(R, Ms, np.asarray(p["enc_l1_b"], np.float32).reshape(1, -1), mm)

    # --- bottleneck Linear(128,d) / Linear(d,128): kept f32 -------------------
    c.append(jnp.asarray(np.asarray(p["enc_l2_w"], np.float32).T, jnp.float32))
    c.append(jnp.asarray(np.asarray(p["enc_l2_b"], np.float32).reshape(1, -1),
                         jnp.float32))
    c.append(jnp.asarray(np.asarray(p["dec_l1_w"], np.float32).T, jnp.float32))
    c.append(jnp.asarray(np.asarray(p["dec_l1_b"], np.float32).reshape(1, -1),
                         jnp.float32))

    # --- Linear(128,288) + ReLU + Unflatten(32,3,3) ----------------------------
    W4 = np.asarray(p["dec_l2_w"], np.float32).reshape(32, 3, 3, 128)  # [c,h,w,i]
    b4 = np.asarray(p["dec_l2_b"], np.float32).reshape(32, 3, 3)
    W4s = [np.transpose(W4[:, h, :, :], (1, 0, 2)).reshape(96, 128).T  # [i, w*32+c]
           for h in range(3)]
    b4s = [np.transpose(b4[:, h, :], (1, 0)).reshape(1, 96) for h in range(3)]
    E = np.zeros((3, 3, 1), np.float32)          # row-scatter e_h
    for h in range(3):
        E[h, h, 0] = 1.0
    c.append(jnp.asarray(_kron_batch(E, tb), mm))                      # (3, tb*3, tb)
    c.append(jnp.asarray(_pack_m(W4s), mm))                            # (128, 384)
    c.append(jnp.asarray(np.concatenate(
        [np.pad(b, ((0, 0), (0, LANE - b.shape[1]))) for b in b4s], axis=1),
        jnp.float32))                                                  # (1, 384)

    # --- decoder transposed CNN: 3 -> 7 -> 14 -> 28 ----------------------------
    s1, t1 = _bn_fold(p["dec_bn1_gamma"], p["dec_bn1_beta"])
    wt1 = np.asarray(p["dec_t1_w"], np.float32) * s1[None, :, None, None]
    bt1 = np.asarray(p["dec_t1_b"], np.float32) * s1 + t1
    R, Ms, _, OW = _convT_matrices(wt1, 3, 3, 2, 0, 0)
    add_block(R, Ms, _bias_row(bt1, OW), mm)

    sbn, tbn = _bn_fold(p["dec_bn2_gamma"], p["dec_bn2_beta"])
    wt2 = np.asarray(p["dec_t2_w"], np.float32) * sbn[None, :, None, None]
    bt2 = np.asarray(p["dec_t2_b"], np.float32) * sbn + tbn
    R, Ms, _, OW = _convT_matrices(wt2, 7, 7, 2, 1, 1)
    add_block(R, Ms, _bias_row(bt2, OW), mm)

    # Final sigmoid layer: keep f32 end to end for accuracy.
    R, Ms, _, OW = _convT_matrices(p["dec_t3_w"], 14, 14, 2, 1, 1)
    add_block(R, Ms, _bias_row(p["dec_t3_b"], OW), jnp.float32)

    return c


# ---------------------------------------------------------------------------
# The fused Pallas kernel: one grid step == full forward pass of TB images,
# stacked along the sublane axis (activation X has shape (TB*H, W*C)).
# ---------------------------------------------------------------------------
def _make_kernel(mm):
    f32 = jnp.float32

    def dot(a, b):
        return jnp.dot(a, b, preferred_element_type=f32)

    def conv_block(x, r_ref, m_ref, b_ref, nout, act, dt):
        # act( sum_kh R_kh @ (X @ [M_0|M_1|M_2])[:, kh*128 : kh*128+nout] + b )
        z = dot(x.astype(dt), m_ref[...]).astype(dt)        # (rows_in, 3*128)
        acc = dot(r_ref[0], z[:, :nout])
        for k in range(1, _K):
            acc = acc + dot(r_ref[k], z[:, k * LANE:k * LANE + nout])
        y = acc + b_ref[...]                                # f32 bias add
        if act == "relu":
            y = jnp.maximum(y, 0.0)
        elif act == "sigmoid":
            y = jax.nn.sigmoid(y)
        return y

    def kernel(x_ref,
               c1_r, c1_m, c1_b, c2_r, c2_m, c2_b, c3_r, c3_m, c3_b,
               l1_r, l1_m, l1_b, l2_w, l2_b, l3_w, l3_b,
               l4_e, l4_w, l4_b,
               t1_r, t1_m, t1_b, t2_r, t2_m, t2_b, t3_r, t3_m, t3_b,
               o_ref):
        x = x_ref[...]                                        # (TB*28, 28) f32
        # Encoder CNN: rows TB*28 -> TB*14 -> TB*7 -> TB*3
        x = conv_block(x, c1_r, c1_m, c1_b, 112, "relu", mm)  # (TB*14, 112)
        x = conv_block(x, c2_r, c2_m, c2_b, 112, "relu", mm)  # (TB*7, 112) BN folded
        x = conv_block(x, c3_r, c3_m, c3_b, 96, "relu", mm)   # (TB*3, 96)
        # Flatten + Linear(288,128)
        x = conv_block(x, l1_r, l1_m, l1_b, 128, "relu", mm)  # (TB, 128)
        # Bottleneck linears (f32)
        x = dot(x, l2_w[...]) + l2_b[...]                     # (TB, d)
        x = jnp.maximum(dot(x, l3_w[...]) + l3_b[...], 0.0)   # (TB, 128)
        # Linear(128,288) + ReLU + Unflatten(32,3,3) via row scatter
        z = jnp.maximum(dot(x.astype(mm), l4_w[...]) + l4_b[...], 0.0)  # (TB, 384)
        z = z.astype(mm)
        xd = dot(l4_e[0], z[:, :96])
        for h in range(1, 3):
            xd = xd + dot(l4_e[h], z[:, h * LANE:h * LANE + 96])        # (TB*3, 96)
        # Decoder transposed CNN: rows TB*3 -> TB*7 -> TB*14 -> TB*28
        x = conv_block(xd, t1_r, t1_m, t1_b, 112, "relu", mm)    # (TB*7, 112)  BN folded
        x = conv_block(x, t2_r, t2_m, t2_b, 112, "relu", mm)     # (TB*14, 112) BN folded
        x = conv_block(x, t3_r, t3_m, t3_b, 28, "sigmoid", f32)  # (TB*28, 28)  f32
        o_ref[...] = x

    return kernel


def _const_spec(a):
    zeros = (0,) * a.ndim
    return pl.BlockSpec(a.shape, lambda b: zeros)


def make_c2den_forward(params, batch, tb=8, mm_dtype=jnp.bfloat16):
    consts = build_constants(params, tb, mm_dtype)
    n_tiles = (batch + tb - 1) // tb
    bpad = n_tiles * tb

    kernel = _make_kernel(mm_dtype)
    in_specs = [pl.BlockSpec((tb * 28, 28), lambda b: (b, 0))]
    in_specs += [_const_spec(a) for a in consts]

    call = pl.pallas_call(
        kernel,
        out_shape=jax.ShapeDtypeStruct((bpad * 28, 28), jnp.float32),
        grid=(n_tiles,),
        in_specs=in_specs,
        out_specs=pl.BlockSpec((tb * 28, 28), lambda b: (b, 0)),
        compiler_params=pltpu.CompilerParams(
            dimension_semantics=("parallel",)),   # v7x: the 2 TCs split the tiles
    )

    @jax.jit
    def forward(x_nchw):
        x = x_nchw.astype(jnp.float32).reshape(batch, 28, 28)
        if bpad != batch:
            x = jnp.concatenate(
                [x, jnp.zeros((bpad - batch, 28, 28), jnp.float32)], axis=0)
        # Row-major (B,28,28) <-> (B*28,28) is a free reshape; the per-step
        # HBM block is then one contiguous dense slab.
        y = call(x.reshape(bpad * 28, 28), *consts)
        y = y.reshape(bpad, 28, 28)[:batch]
        return y.reshape(batch, 1, 28, 28)

    return forward


# ---------------------------------------------------------------------------
# Deterministic parameter init (PyTorch layouts; BN with PyTorch defaults).
# ---------------------------------------------------------------------------
def init_params(key, d):
    ks = iter(jax.random.split(key, 24))

    def u(shape, fan_in):
        bound = 1.0 / math.sqrt(fan_in)
        return jax.random.uniform(next(ks), shape, jnp.float32, -bound, bound)

    p = {}
    # Encoder
    p["enc_c1_w"] = u((8, 1, 3, 3), 1 * 9)
    p["enc_c1_b"] = u((8,), 1 * 9)
    p["enc_c2_w"] = u((16, 8, 3, 3), 8 * 9)
    p["enc_c2_b"] = u((16,), 8 * 9)
    p["enc_bn2_gamma"] = jnp.ones((16,), jnp.float32)
    p["enc_bn2_beta"] = jnp.zeros((16,), jnp.float32)
    p["enc_c3_w"] = u((32, 16, 3, 3), 16 * 9)
    p["enc_c3_b"] = u((32,), 16 * 9)
    p["enc_l1_w"] = u((128, 288), 288)
    p["enc_l1_b"] = u((128,), 288)
    p["enc_l2_w"] = u((d, 128), 128)
    p["enc_l2_b"] = u((d,), 128)
    # Decoder
    p["dec_l1_w"] = u((128, d), d)
    p["dec_l1_b"] = u((128,), d)
    p["dec_l2_w"] = u((288, 128), 128)
    p["dec_l2_b"] = u((288,), 128)
    p["dec_t1_w"] = u((32, 16, 3, 3), 16 * 9)   # ConvT fan_in = Cout * k*k
    p["dec_t1_b"] = u((16,), 16 * 9)
    p["dec_bn1_gamma"] = jnp.ones((16,), jnp.float32)
    p["dec_bn1_beta"] = jnp.zeros((16,), jnp.float32)
    p["dec_t2_w"] = u((16, 8, 3, 3), 8 * 9)
    p["dec_t2_b"] = u((8,), 8 * 9)
    p["dec_bn2_gamma"] = jnp.ones((8,), jnp.float32)
    p["dec_bn2_beta"] = jnp.zeros((8,), jnp.float32)
    p["dec_t3_w"] = u((8, 1, 3, 3), 1 * 9)
    p["dec_t3_b"] = u((1,), 1 * 9)
    return p


# ---------------------------------------------------------------------------
# Pure-XLA reference (PyTorch semantics) used to validate the fused kernel.
# ---------------------------------------------------------------------------
def reference_forward(p, x):
    hp = jax.lax.Precision.HIGHEST

    def conv(x, w, b, stride, pad):
        y = jax.lax.conv_general_dilated(
            x, w, (stride, stride), [(pad, pad), (pad, pad)],
            dimension_numbers=("NCHW", "OIHW", "NCHW"), precision=hp)
        return y + b.reshape(1, -1, 1, 1)

    def convT(x, w, b, stride, pad, opad):
        wf = jnp.transpose(jnp.flip(w, (2, 3)), (1, 0, 2, 3))
        y = jax.lax.conv_general_dilated(
            x, wf, (1, 1), [(_K - 1 - pad, _K - 1 - pad + opad)] * 2,
            lhs_dilation=(stride, stride),
            dimension_numbers=("NCHW", "OIHW", "NCHW"), precision=hp)
        return y + b.reshape(1, -1, 1, 1)

    def bn(x, gamma, beta, eps=1e-5):
        return (x * (gamma / jnp.sqrt(1.0 + eps)).reshape(1, -1, 1, 1)
                + beta.reshape(1, -1, 1, 1))

    B = x.shape[0]
    h = jax.nn.relu(conv(x, p["enc_c1_w"], p["enc_c1_b"], 2, 1))
    h = jax.nn.relu(bn(conv(h, p["enc_c2_w"], p["enc_c2_b"], 2, 1),
                       p["enc_bn2_gamma"], p["enc_bn2_beta"]))
    h = jax.nn.relu(conv(h, p["enc_c3_w"], p["enc_c3_b"], 2, 0))
    h = h.reshape(B, 3 * 3 * 32)
    h = jax.nn.relu(jnp.dot(h, p["enc_l1_w"].T, precision=hp) + p["enc_l1_b"])
    h = jnp.dot(h, p["enc_l2_w"].T, precision=hp) + p["enc_l2_b"]
    h = jax.nn.relu(jnp.dot(h, p["dec_l1_w"].T, precision=hp) + p["dec_l1_b"])
    h = jax.nn.relu(jnp.dot(h, p["dec_l2_w"].T, precision=hp) + p["dec_l2_b"])
    h = h.reshape(B, 32, 3, 3)
    h = jax.nn.relu(bn(convT(h, p["dec_t1_w"], p["dec_t1_b"], 2, 0, 0),
                       p["dec_bn1_gamma"], p["dec_bn1_beta"]))
    h = jax.nn.relu(bn(convT(h, p["dec_t2_w"], p["dec_t2_b"], 2, 1, 1),
                       p["dec_bn2_gamma"], p["dec_bn2_beta"]))
    h = jax.nn.sigmoid(convT(h, p["dec_t3_w"], p["dec_t3_b"], 2, 1, 1))
    return h


if __name__ == "__main__":
    # The encoder/decoder geometry (flatten to 3*3*32) fixes the input at
    # 1x28x28 (MNIST-style).  batch=16 with TB=8 -> 2 parallel grid steps
    # (both v7x TensorCores busy); d is the encoding size.
    B, d, TB = 16, 8, 8
    x = jax.random.normal(jax.random.PRNGKey(0), (B, 1, 28, 28), jnp.float32)
    params = init_params(jax.random.PRNGKey(42), d)

    mm = jnp.bfloat16   # bf16 matmul operands, f32 accumulation / elementwise
    forward = make_c2den_forward(params, B, tb=TB, mm_dtype=mm)
    y = forward(x)
    jax.block_until_ready(y)

    assert y.shape == (B, 1, 28, 28), y.shape
    assert y.dtype == jnp.float32

    # Validate the fused Pallas kernel against the plain-XLA f32 reference.
    y_ref = reference_forward(params, x)
    err = float(jnp.max(jnp.abs(y - y_ref)))
    tol = 2e-2 if mm == jnp.bfloat16 else 5e-3
    assert err < tol, f"kernel/reference mismatch: max|diff|={err}"
    assert bool(jnp.all((y >= 0.0) & (y <= 1.0)))   # sigmoid range
    print("KERNEL_OK")
</pallas_src>

<mosaic_0001>
module attributes {stable_mosaic.version = 11 : i64} {
  func.func @kernel(%arg0: i32, %arg1: memref<224x28xf32, #tpu.memory_space<vmem>>, %arg2: memref<3x112x224xbf16, #tpu.memory_space<vmem>>, %arg3: memref<28x384xbf16, #tpu.memory_space<vmem>>, %arg4: memref<1x112xf32, #tpu.memory_space<vmem>>, %arg5: memref<3x56x112xbf16, #tpu.memory_space<vmem>>, %arg6: memref<112x384xbf16, #tpu.memory_space<vmem>>, %arg7: memref<1x112xf32, #tpu.memory_space<vmem>>, %arg8: memref<3x24x56xbf16, #tpu.memory_space<vmem>>, %arg9: memref<112x384xbf16, #tpu.memory_space<vmem>>, %arg10: memref<1x96xf32, #tpu.memory_space<vmem>>, %arg11: memref<3x8x24xbf16, #tpu.memory_space<vmem>>, %arg12: memref<96x384xbf16, #tpu.memory_space<vmem>>, %arg13: memref<1x128xf32, #tpu.memory_space<vmem>>, %arg14: memref<128x8xf32, #tpu.memory_space<vmem>>, %arg15: memref<1x8xf32, #tpu.memory_space<vmem>>, %arg16: memref<8x128xf32, #tpu.memory_space<vmem>>, %arg17: memref<1x128xf32, #tpu.memory_space<vmem>>, %arg18: memref<3x24x8xbf16, #tpu.memory_space<vmem>>, %arg19: memref<128x384xbf16, #tpu.memory_space<vmem>>, %arg20: memref<1x384xf32, #tpu.memory_space<vmem>>, %arg21: memref<3x56x24xbf16, #tpu.memory_space<vmem>>, %arg22: memref<96x384xbf16, #tpu.memory_space<vmem>>, %arg23: memref<1x112xf32, #tpu.memory_space<vmem>>, %arg24: memref<3x112x56xbf16, #tpu.memory_space<vmem>>, %arg25: memref<112x384xbf16, #tpu.memory_space<vmem>>, %arg26: memref<1x112xf32, #tpu.memory_space<vmem>>, %arg27: memref<3x224x112xf32, #tpu.memory_space<vmem>>, %arg28: memref<112x384xf32, #tpu.memory_space<vmem>>, %arg29: memref<1x28xf32, #tpu.memory_space<vmem>>, %arg30: memref<224x28xf32, #tpu.memory_space<vmem>>) attributes {dimension_semantics = [#tpu.dimension_semantics<parallel>], iteration_bounds = array<i64: 2>, scalar_prefetch = 0 : i64, scratch_operands = 0 : i64, tpu.core_type = #tpu.core_type<tc>, window_params = [{transform_indices = @transform_0, window_bounds = array<i64: 224, 28>}, {pipeline_mode = #tpu.pipeline_mode<synchronous>, transform_indices = @transform_1, window_bounds = array<i64: 3, 112, 224>}, {pipeline_mode = #tpu.pipeline_mode<synchronous>, transform_indices = @transform_2, window_bounds = array<i64: 28, 384>}, {pipeline_mode = #tpu.pipeline_mode<synchronous>, transform_indices = @transform_3, window_bounds = array<i64: 1, 112>}, {pipeline_mode = #tpu.pipeline_mode<synchronous>, transform_indices = @transform_4, window_bounds = array<i64: 3, 56, 112>}, {pipeline_mode = #tpu.pipeline_mode<synchronous>, transform_indices = @transform_5, window_bounds = array<i64: 112, 384>}, {pipeline_mode = #tpu.pipeline_mode<synchronous>, transform_indices = @transform_6, window_bounds = array<i64: 1, 112>}, {pipeline_mode = #tpu.pipeline_mode<synchronous>, transform_indices = @transform_7, window_bounds = array<i64: 3, 24, 56>}, {pipeline_mode = #tpu.pipeline_mode<synchronous>, transform_indices = @transform_8, window_bounds = array<i64: 112, 384>}, {pipeline_mode = #tpu.pipeline_mode<synchronous>, transform_indices = @transform_9, window_bounds = array<i64: 1, 96>}, {pipeline_mode = #tpu.pipeline_mode<synchronous>, transform_indices = @transform_10, window_bounds = array<i64: 3, 8, 24>}, {pipeline_mode = #tpu.pipeline_mode<synchronous>, transform_indices = @transform_11, window_bounds = array<i64: 96, 384>}, {pipeline_mode = #tpu.pipeline_mode<synchronous>, transform_indices = @transform_12, window_bounds = array<i64: 1, 128>}, {pipeline_mode = #tpu.pipeline_mode<synchronous>, transform_indices = @transform_13, window_bounds = array<i64: 128, 8>}, {pipeline_mode = #tpu.pipeline_mode<synchronous>, transform_indices = @transform_14, window_bounds = array<i64: 1, 8>}, {pipeline_mode = #tpu.pipeline_mode<synchronous>, transform_indices = @transform_15, window_bounds = array<i64: 8, 128>}, {pipeline_mode = #tpu.pipeline_mode<synchronous>, transform_indices = @transform_16, window_bounds = array<i64: 1, 128>}, {pipeline_mode = #tpu.pipeline_mode<synchronous>, transform_indices = @transform_17, window_bounds = array<i64: 3, 24, 8>}, {pipeline_mode = #tpu.pipeline_mode<synchronous>, transform_indices = @transform_18, window_bounds = array<i64: 128, 384>}, {pipeline_mode = #tpu.pipeline_mode<synchronous>, transform_indices = @transform_19, window_bounds = array<i64: 1, 384>}, {pipeline_mode = #tpu.pipeline_mode<synchronous>, transform_indices = @transform_20, window_bounds = array<i64: 3, 56, 24>}, {pipeline_mode = #tpu.pipeline_mode<synchronous>, transform_indices = @transform_21, window_bounds = array<i64: 96, 384>}, {pipeline_mode = #tpu.pipeline_mode<synchronous>, transform_indices = @transform_22, window_bounds = array<i64: 1, 112>}, {pipeline_mode = #tpu.pipeline_mode<synchronous>, transform_indices = @transform_23, window_bounds = array<i64: 3, 112, 56>}, {pipeline_mode = #tpu.pipeline_mode<synchronous>, transform_indices = @transform_24, window_bounds = array<i64: 112, 384>}, {pipeline_mode = #tpu.pipeline_mode<synchronous>, transform_indices = @transform_25, window_bounds = array<i64: 1, 112>}, {pipeline_mode = #tpu.pipeline_mode<synchronous>, transform_indices = @transform_26, window_bounds = array<i64: 3, 224, 112>}, {pipeline_mode = #tpu.pipeline_mode<synchronous>, transform_indices = @transform_27, window_bounds = array<i64: 112, 384>}, {pipeline_mode = #tpu.pipeline_mode<synchronous>, transform_indices = @transform_28, window_bounds = array<i64: 1, 28>}, {transform_indices = @transform_29, window_bounds = array<i64: 224, 28>}]} {
    %c0 = arith.constant 0 : index
    %c0_0 = arith.constant 0 : index
    %0 = vector.load %arg1[%c0, %c0_0] : memref<224x28xf32, #tpu.memory_space<vmem>>, vector<224x28xf32>
    %1 = arith.truncf %0 : vector<224x28xf32> to vector<224x28xbf16>
    %c0_1 = arith.constant 0 : index
    %c0_2 = arith.constant 0 : index
    %2 = vector.load %arg3[%c0_1, %c0_2] : memref<28x384xbf16, #tpu.memory_space<vmem>>, vector<28x384xbf16>
    %cst = arith.constant dense<0.000000e+00> : vector<224x384xf32>
    %3 = tpu.matmul %1, %2, %cst {dimension_numbers = #tpu.dot_dimension_numbers<[1], [0], [0], [1], [0, 0, 1, 1], [], []>} : vector<224x28xbf16>, vector<28x384xbf16>, vector<224x384xf32> -> vector<224x384xf32>
    %4 = arith.truncf %3 : vector<224x384xf32> to vector<224x384xbf16>
    %c0_3 = arith.constant 0 : index
    %c0_4 = arith.constant 0 : index
    %c0_5 = arith.constant 0 : index
    %5 = vector.load %arg2[%c0_3, %c0_4, %c0_5] : memref<3x112x224xbf16, #tpu.memory_space<vmem>>, vector<1x112x224xbf16>
    %6 = vector.shape_cast %5 : vector<1x112x224xbf16> to vector<112x224xbf16>
    %7 = vector.extract_strided_slice %4 {offsets = [0, 0], sizes = [224, 112], strides = [1, 1]} : vector<224x384xbf16> to vector<224x112xbf16>
    %cst_6 = arith.constant dense<0.000000e+00> : vector<112x112xf32>
    %8 = tpu.matmul %6, %7, %cst_6 {dimension_numbers = #tpu.dot_dimension_numbers<[1], [0], [0], [1], [0, 0, 1, 1], [], []>} : vector<112x224xbf16>, vector<224x112xbf16>, vector<112x112xf32> -> vector<112x112xf32>
    %c1 = arith.constant 1 : index
    %c0_7 = arith.constant 0 : index
    %c0_8 = arith.constant 0 : index
    %9 = vector.load %arg2[%c1, %c0_7, %c0_8] : memref<3x112x224xbf16, #tpu.memory_space<vmem>>, vector<1x112x224xbf16>
    %10 = vector.shape_cast %9 : vector<1x112x224xbf16> to vector<112x224xbf16>
    %11 = vector.extract_strided_slice %4 {offsets = [0, 128], sizes = [224, 112], strides = [1, 1]} : vector<224x384xbf16> to vector<224x112xbf16>
    %cst_9 = arith.constant dense<0.000000e+00> : vector<112x112xf32>
    %12 = tpu.matmul %10, %11, %cst_9 {dimension_numbers = #tpu.dot_dimension_numbers<[1], [0], [0], [1], [0, 0, 1, 1], [], []>} : vector<112x224xbf16>, vector<224x112xbf16>, vector<112x112xf32> -> vector<112x112xf32>
    %13 = arith.addf %8, %12 : vector<112x112xf32>
    %c2 = arith.constant 2 : index
    %c0_10 = arith.constant 0 : index
    %c0_11 = arith.constant 0 : index
    %14 = vector.load %arg2[%c2, %c0_10, %c0_11] : memref<3x112x224xbf16, #tpu.memory_space<vmem>>, vector<1x112x224xbf16>
    %15 = vector.shape_cast %14 : vector<1x112x224xbf16> to vector<112x224xbf16>
    %16 = vector.extract_strided_slice %4 {offsets = [0, 256], sizes = [224, 112], strides = [1, 1]} : vector<224x384xbf16> to vector<224x112xbf16>
    %cst_12 = arith.constant dense<0.000000e+00> : vector<112x112xf32>
    %17 = tpu.matmul %15, %16, %cst_12 {dimension_numbers = #tpu.dot_dimension_numbers<[1], [0], [0], [1], [0, 0, 1, 1], [], []>} : vector<112x224xbf16>, vector<224x112xbf16>, vector<112x112xf32> -> vector<112x112xf32>
    %18 = arith.addf %13, %17 : vector<112x112xf32>
    %c0_13 = arith.constant 0 : index
    %c0_14 = arith.constant 0 : index
    %19 = vector.load %arg4[%c0_13, %c0_14] : memref<1x112xf32, #tpu.memory_space<vmem>>, vector<1x112xf32>
    %20 = vector.broadcast %19 : vector<1x112xf32> to vector<112x112xf32>
    %21 = arith.addf %18, %20 : vector<112x112xf32>
    %cst_15 = arith.constant 0.000000e+00 : f32
    %22 = vector.broadcast %cst_15 : f32 to vector<112x112xf32>
    %23 = arith.maximumf %21, %22 : vector<112x112xf32>
    %24 = arith.truncf %23 : vector<112x112xf32> to vector<112x112xbf16>
    %c0_16 = arith.constant 0 : index
    %c0_17 = arith.constant 0 : index
    %25 = vector.load %arg6[%c0_16, %c0_17] : memref<112x384xbf16, #tpu.memory_space<vmem>>, vector<112x384xbf16>
    %cst_18 = arith.constant dense<0.000000e+00> : vector<112x384xf32>
    %26 = tpu.matmul %24, %25, %cst_18 {dimension_numbers = #tpu.dot_dimension_numbers<[1], [0], [0], [1], [0, 0, 1, 1], [], []>} : vector<112x112xbf16>, vector<112x384xbf16>, vector<112x384xf32> -> vector<112x384xf32>
    %27 = arith.truncf %26 : vector<112x384xf32> to vector<112x384xbf16>
    %c0_19 = arith.constant 0 : index
    %c0_20 = arith.constant 0 : index
    %c0_21 = arith.constant 0 : index
    %28 = vector.load %arg5[%c0_19, %c0_20, %c0_21] : memref<3x56x112xbf16, #tpu.memory_space<vmem>>, vector<1x56x112xbf16>
    %29 = vector.shape_cast %28 : vector<1x56x112xbf16> to vector<56x112xbf16>
    %30 = vector.extract_strided_slice %27 {offsets = [0, 0], sizes = [112, 112], strides = [1, 1]} : vector<112x384xbf16> to vector<112x112xbf16>
    %cst_22 = arith.constant dense<0.000000e+00> : vector<56x112xf32>
    %31 = tpu.matmul %29, %30, %cst_22 {dimension_numbers = #tpu.dot_dimension_numbers<[1], [0], [0], [1], [0, 0, 1, 1], [], []>} : vector<56x112xbf16>, vector<112x112xbf16>, vector<56x112xf32> -> vector<56x112xf32>
    %c1_23 = arith.constant 1 : index
    %c0_24 = arith.constant 0 : index
    %c0_25 = arith.constant 0 : index
    %32 = vector.load %arg5[%c1_23, %c0_24, %c0_25] : memref<3x56x112xbf16, #tpu.memory_space<vmem>>, vector<1x56x112xbf16>
    %33 = vector.shape_cast %32 : vector<1x56x112xbf16> to vector<56x112xbf16>
    %34 = vector.extract_strided_slice %27 {offsets = [0, 128], sizes = [112, 112], strides = [1, 1]} : vector<112x384xbf16> to vector<112x112xbf16>
    %cst_26 = arith.constant dense<0.000000e+00> : vector<56x112xf32>
    %35 = tpu.matmul %33, %34, %cst_26 {dimension_numbers = #tpu.dot_dimension_numbers<[1], [0], [0], [1], [0, 0, 1, 1], [], []>} : vector<56x112xbf16>, vector<112x112xbf16>, vector<56x112xf32> -> vector<56x112xf32>
    %36 = arith.addf %31, %35 : vector<56x112xf32>
    %c2_27 = arith.constant 2 : index
    %c0_28 = arith.constant 0 : index
    %c0_29 = arith.constant 0 : index
    %37 = vector.load %arg5[%c2_27, %c0_28, %c0_29] : memref<3x56x112xbf16, #tpu.memory_space<vmem>>, vector<1x56x112xbf16>
    %38 = vector.shape_cast %37 : vector<1x56x112xbf16> to vector<56x112xbf16>
    %39 = vector.extract_strided_slice %27 {offsets = [0, 256], sizes = [112, 112], strides = [1, 1]} : vector<112x384xbf16> to vector<112x112xbf16>
    %cst_30 = arith.constant dense<0.000000e+00> : vector<56x112xf32>
    %40 = tpu.matmul %38, %39, %cst_30 {dimension_numbers = #tpu.dot_dimension_numbers<[1], [0], [0], [1], [0, 0, 1, 1], [], []>} : vector<56x112xbf16>, vector<112x112xbf16>, vector<56x112xf32> -> vector<56x112xf32>
    %41 = arith.addf %36, %40 : vector<56x112xf32>
    %c0_31 = arith.constant 0 : index
    %c0_32 = arith.constant 0 : index
    %42 = vector.load %arg7[%c0_31, %c0_32] : memref<1x112xf32, #tpu.memory_space<vmem>>, vector<1x112xf32>
    %43 = vector.broadcast %42 : vector<1x112xf32> to vector<56x112xf32>
    %44 = arith.addf %41, %43 : vector<56x112xf32>
    %cst_33 = arith.constant 0.000000e+00 : f32
    %45 = vector.broadcast %cst_33 : f32 to vector<56x112xf32>
    %46 = arith.maximumf %44, %45 : vector<56x112xf32>
    %47 = arith.truncf %46 : vector<56x112xf32> to vector<56x112xbf16>
    %c0_34 = arith.constant 0 : index
    %c0_35 = arith.constant 0 : index
    %48 = vector.load %arg9[%c0_34, %c0_35] : memref<112x384xbf16, #tpu.memory_space<vmem>>, vector<112x384xbf16>
    %cst_36 = arith.constant dense<0.000000e+00> : vector<56x384xf32>
    %49 = tpu.matmul %47, %48, %cst_36 {dimension_numbers = #tpu.dot_dimension_numbers<[1], [0], [0], [1], [0, 0, 1, 1], [], []>} : vector<56x112xbf16>, vector<112x384xbf16>, vector<56x384xf32> -> vector<56x384xf32>
    %50 = arith.truncf %49 : vector<56x384xf32> to vector<56x384xbf16>
    %c0_37 = arith.constant 0 : index
    %c0_38 = arith.constant 0 : index
    %c0_39 = arith.constant 0 : index
    %51 = vector.load %arg8[%c0_37, %c0_38, %c0_39] : memref<3x24x56xbf16, #tpu.memory_space<vmem>>, vector<1x24x56xbf16>
    %52 = vector.shape_cast %51 : vector<1x24x56xbf16> to vector<24x56xbf16>
    %53 = vector.extract_strided_slice %50 {offsets = [0, 0], sizes = [56, 96], strides = [1, 1]} : vector<56x384xbf16> to vector<56x96xbf16>
    %cst_40 = arith.constant dense<0.000000e+00> : vector<24x96xf32>
    %54 = tpu.matmul %52, %53, %cst_40 {dimension_numbers = #tpu.dot_dimension_numbers<[1], [0], [0], [1], [0, 0, 1, 1], [], []>} : vector<24x56xbf16>, vector<56x96xbf16>, vector<24x96xf32> -> vector<24x96xf32>
    %c1_41 = arith.constant 1 : index
    %c0_42 = arith.constant 0 : index
    %c0_43 = arith.constant 0 : index
    %55 = vector.load %arg8[%c1_41, %c0_42, %c0_43] : memref<3x24x56xbf16, #tpu.memory_space<vmem>>, vector<1x24x56xbf16>
    %56 = vector.shape_cast %55 : vector<1x24x56xbf16> to vector<24x56xbf16>
    %57 = vector.extract_strided_slice %50 {offsets = [0, 128], sizes = [56, 96], strides = [1, 1]} : vector<56x384xbf16> to vector<56x96xbf16>
    %cst_44 = arith.constant dense<0.000000e+00> : vector<24x96xf32>
    %58 = tpu.matmul %56, %57, %cst_44 {dimension_numbers = #tpu.dot_dimension_numbers<[1], [0], [0], [1], [0, 0, 1, 1], [], []>} : vector<24x56xbf16>, vector<56x96xbf16>, vector<24x96xf32> -> vector<24x96xf32>
    %59 = arith.addf %54, %58 : vector<24x96xf32>
    %c2_45 = arith.constant 2 : index
    %c0_46 = arith.constant 0 : index
    %c0_47 = arith.constant 0 : index
    %60 = vector.load %arg8[%c2_45, %c0_46, %c0_47] : memref<3x24x56xbf16, #tpu.memory_space<vmem>>, vector<1x24x56xbf16>
    %61 = vector.shape_cast %60 : vector<1x24x56xbf16> to vector<24x56xbf16>
    %62 = vector.extract_strided_slice %50 {offsets = [0, 256], sizes = [56, 96], strides = [1, 1]} : vector<56x384xbf16> to vector<56x96xbf16>
    %cst_48 = arith.constant dense<0.000000e+00> : vector<24x96xf32>
    %63 = tpu.matmul %61, %62, %cst_48 {dimension_numbers = #tpu.dot_dimension_numbers<[1], [0], [0], [1], [0, 0, 1, 1], [], []>} : vector<24x56xbf16>, vector<56x96xbf16>, vector<24x96xf32> -> vector<24x96xf32>
    %64 = arith.addf %59, %63 : vector<24x96xf32>
    %c0_49 = arith.constant 0 : index
    %c0_50 = arith.constant 0 : index
    %65 = vector.load %arg10[%c0_49, %c0_50] : memref<1x96xf32, #tpu.memory_space<vmem>>, vector<1x96xf32>
    %66 = vector.broadcast %65 : vector<1x96xf32> to vector<24x96xf32>
    %67 = arith.addf %64, %66 : vector<24x96xf32>
    %cst_51 = arith.constant 0.000000e+00 : f32
    %68 = vector.broadcast %cst_51 : f32 to vector<24x96xf32>
    %69 = arith.maximumf %67, %68 : vector<24x96xf32>
    %70 = arith.truncf %69 : vector<24x96xf32> to vector<24x96xbf16>
    %c0_52 = arith.constant 0 : index
    %c0_53 = arith.constant 0 : index
    %71 = vector.load %arg12[%c0_52, %c0_53] : memref<96x384xbf16, #tpu.memory_space<vmem>>, vector<96x384xbf16>
    %cst_54 = arith.constant dense<0.000000e+00> : vector<24x384xf32>
    %72 = tpu.matmul %70, %71, %cst_54 {dimension_numbers = #tpu.dot_dimension_numbers<[1], [0], [0], [1], [0, 0, 1, 1], [], []>} : vector<24x96xbf16>, vector<96x384xbf16>, vector<24x384xf32> -> vector<24x384xf32>
    %73 = arith.truncf %72 : vector<24x384xf32> to vector<24x384xbf16>
    %c0_55 = arith.constant 0 : index
    %c0_56 = arith.constant 0 : index
    %c0_57 = arith.constant 0 : index
    %74 = vector.load %arg11[%c0_55, %c0_56, %c0_57] : memref<3x8x24xbf16, #tpu.memory_space<vmem>>, vector<1x8x24xbf16>
    %75 = vector.shape_cast %74 : vector<1x8x24xbf16> to vector<8x24xbf16>
    %76 = vector.extract_strided_slice %73 {offsets = [0, 0], sizes = [24, 128], strides = [1, 1]} : vector<24x384xbf16> to vector<24x128xbf16>
    %cst_58 = arith.constant dense<0.000000e+00> : vector<8x128xf32>
    %77 = tpu.matmul %75, %76, %cst_58 {dimension_numbers = #tpu.dot_dimension_numbers<[1], [0], [0], [1], [0, 0, 1, 1], [], []>} : vector<8x24xbf16>, vector<24x128xbf16>, vector<8x128xf32> -> vector<8x128xf32>
    %c1_59 = arith.constant 1 : index
    %c0_60 = arith.constant 0 : index
    %c0_61 = arith.constant 0 : index
    %78 = vector.load %arg11[%c1_59, %c0_60, %c0_61] : memref<3x8x24xbf16, #tpu.memory_space<vmem>>, vector<1x8x24xbf16>
    %79 = vector.shape_cast %78 : vector<1x8x24xbf16> to vector<8x24xbf16>
    %80 = vector.extract_strided_slice %73 {offsets = [0, 128], sizes = [24, 128], strides = [1, 1]} : vector<24x384xbf16> to vector<24x128xbf16>
    %cst_62 = arith.constant dense<0.000000e+00> : vector<8x128xf32>
    %81 = tpu.matmul %79, %80, %cst_62 {dimension_numbers = #tpu.dot_dimension_numbers<[1], [0], [0], [1], [0, 0, 1, 1], [], []>} : vector<8x24xbf16>, vector<24x128xbf16>, vector<8x128xf32> -> vector<8x128xf32>
    %82 = arith.addf %77, %81 : vector<8x128xf32>
    %c2_63 = arith.constant 2 : index
    %c0_64 = arith.constant 0 : index
    %c0_65 = arith.constant 0 : index
    %83 = vector.load %arg11[%c2_63, %c0_64, %c0_65] : memref<3x8x24xbf16, #tpu.memory_space<vmem>>, vector<1x8x24xbf16>
    %84 = vector.shape_cast %83 : vector<1x8x24xbf16> to vector<8x24xbf16>
    %85 = vector.extract_strided_slice %73 {offsets = [0, 256], sizes = [24, 128], strides = [1, 1]} : vector<24x384xbf16> to vector<24x128xbf16>
    %cst_66 = arith.constant dense<0.000000e+00> : vector<8x128xf32>
    %86 = tpu.matmul %84, %85, %cst_66 {dimension_numbers = #tpu.dot_dimension_numbers<[1], [0], [0], [1], [0, 0, 1, 1], [], []>} : vector<8x24xbf16>, vector<24x128xbf16>, vector<8x128xf32> -> vector<8x128xf32>
    %87 = arith.addf %82, %86 : vector<8x128xf32>
    %c0_67 = arith.constant 0 : index
    %c0_68 = arith.constant 0 : index
    %88 = vector.load %arg13[%c0_67, %c0_68] : memref<1x128xf32, #tpu.memory_space<vmem>>, vector<1x128xf32>
    %89 = vector.broadcast %88 : vector<1x128xf32> to vector<8x128xf32>
    %90 = arith.addf %87, %89 : vector<8x128xf32>
    %cst_69 = arith.constant 0.000000e+00 : f32
    %91 = vector.broadcast %cst_69 : f32 to vector<8x128xf32>
    %92 = arith.maximumf %90, %91 : vector<8x128xf32>
    %c0_70 = arith.constant 0 : index
    %c0_71 = arith.constant 0 : index
    %93 = vector.load %arg14[%c0_70, %c0_71] : memref<128x8xf32, #tpu.memory_space<vmem>>, vector<128x8xf32>
    %cst_72 = arith.constant dense<0.000000e+00> : vector<8x8xf32>
    %94 = tpu.matmul %92, %93, %cst_72 {dimension_numbers = #tpu.dot_dimension_numbers<[1], [0], [0], [1], [0, 0, 1, 1], [], []>} : vector<8x128xf32>, vector<128x8xf32>, vector<8x8xf32> -> vector<8x8xf32>
    %c0_73 = arith.constant 0 : index
    %c0_74 = arith.constant 0 : index
    %95 = vector.load %arg15[%c0_73, %c0_74] : memref<1x8xf32, #tpu.memory_space<vmem>>, vector<1x8xf32>
    %96 = vector.broadcast %95 : vector<1x8xf32> to vector<8x8xf32>
    %97 = arith.addf %94, %96 : vector<8x8xf32>
    %c0_75 = arith.constant 0 : index
    %c0_76 = arith.constant 0 : index
    %98 = vector.load %arg16[%c0_75, %c0_76] : memref<8x128xf32, #tpu.memory_space<vmem>>, vector<8x128xf32>
    %cst_77 = arith.constant dense<0.000000e+00> : vector<8x128xf32>
    %99 = tpu.matmul %97, %98, %cst_77 {dimension_numbers = #tpu.dot_dimension_numbers<[1], [0], [0], [1], [0, 0, 1, 1], [], []>} : vector<8x8xf32>, vector<8x128xf32>, vector<8x128xf32> -> vector<8x128xf32>
    %c0_78 = arith.constant 0 : index
    %c0_79 = arith.constant 0 : index
    %100 = vector.load %arg17[%c0_78, %c0_79] : memref<1x128xf32, #tpu.memory_space<vmem>>, vector<1x128xf32>
    %101 = vector.broadcast %100 : vector<1x128xf32> to vector<8x128xf32>
    %102 = arith.addf %99, %101 : vector<8x128xf32>
    %cst_80 = arith.constant 0.000000e+00 : f32
    %103 = vector.broadcast %cst_80 : f32 to vector<8x128xf32>
    %104 = arith.maximumf %102, %103 : vector<8x128xf32>
    %105 = arith.truncf %104 : vector<8x128xf32> to vector<8x128xbf16>
    %c0_81 = arith.constant 0 : index
    %c0_82 = arith.constant 0 : index
    %106 = vector.load %arg19[%c0_81, %c0_82] : memref<128x384xbf16, #tpu.memory_space<vmem>>, vector<128x384xbf16>
    %cst_83 = arith.constant dense<0.000000e+00> : vector<8x384xf32>
    %107 = tpu.matmul %105, %106, %cst_83 {dimension_numbers = #tpu.dot_dimension_numbers<[1], [0], [0], [1], [0, 0, 1, 1], [], []>} : vector<8x128xbf16>, vector<128x384xbf16>, vector<8x384xf32> -> vector<8x384xf32>
    %c0_84 = arith.constant 0 : index
    %c0_85 = arith.constant 0 : index
    %108 = vector.load %arg20[%c0_84, %c0_85] : memref<1x384xf32, #tpu.memory_space<vmem>>, vector<1x384xf32>
    %109 = vector.broadcast %108 : vector<1x384xf32> to vector<8x384xf32>
    %110 = arith.addf %107, %109 : vector<8x384xf32>
    %cst_86 = arith.constant 0.000000e+00 : f32
    %111 = vector.broadcast %cst_86 : f32 to vector<8x384xf32>
    %112 = arith.maximumf %110, %111 : vector<8x384xf32>
    %113 = arith.truncf %112 : vector<8x384xf32> to vector<8x384xbf16>
    %c0_87 = arith.constant 0 : index
    %c0_88 = arith.constant 0 : index
    %c0_89 = arith.constant 0 : index
    %114 = vector.load %arg18[%c0_87, %c0_88, %c0_89] : memref<3x24x8xbf16, #tpu.memory_space<vmem>>, vector<1x24x8xbf16>
    %115 = vector.shape_cast %114 : vector<1x24x8xbf16> to vector<24x8xbf16>
    %116 = vector.extract_strided_slice %113 {offsets = [0, 0], sizes = [8, 96], strides = [1, 1]} : vector<8x384xbf16> to vector<8x96xbf16>
    %cst_90 = arith.constant dense<0.000000e+00> : vector<24x96xf32>
    %117 = tpu.matmul %115, %116, %cst_90 {dimension_numbers = #tpu.dot_dimension_numbers<[1], [0], [0], [1], [0, 0, 1, 1], [], []>} : vector<24x8xbf16>, vector<8x96xbf16>, vector<24x96xf32> -> vector<24x96xf32>
    %c1_91 = arith.constant 1 : index
    %c0_92 = arith.constant 0 : index
    %c0_93 = arith.constant 0 : index
    %118 = vector.load %arg18[%c1_91, %c0_92, %c0_93] : memref<3x24x8xbf16, #tpu.memory_space<vmem>>, vector<1x24x8xbf16>
    %119 = vector.shape_cast %118 : vector<1x24x8xbf16> to vector<24x8xbf16>
    %120 = vector.extract_strided_slice %113 {offsets = [0, 128], sizes = [8, 96], strides = [1, 1]} : vector<8x384xbf16> to vector<8x96xbf16>
    %cst_94 = arith.constant dense<0.000000e+00> : vector<24x96xf32>
    %121 = tpu.matmul %119, %120, %cst_94 {dimension_numbers = #tpu.dot_dimension_numbers<[1], [0], [0], [1], [0, 0, 1, 1], [], []>} : vector<24x8xbf16>, vector<8x96xbf16>, vector<24x96xf32> -> vector<24x96xf32>
    %122 = arith.addf %117, %121 : vector<24x96xf32>
    %c2_95 = arith.constant 2 : index
    %c0_96 = arith.constant 0 : index
    %c0_97 = arith.constant 0 : index
    %123 = vector.load %arg18[%c2_95, %c0_96, %c0_97] : memref<3x24x8xbf16, #tpu.memory_space<vmem>>, vector<1x24x8xbf16>
    %124 = vector.shape_cast %123 : vector<1x24x8xbf16> to vector<24x8xbf16>
    %125 = vector.extract_strided_slice %113 {offsets = [0, 256], sizes = [8, 96], strides = [1, 1]} : vector<8x384xbf16> to vector<8x96xbf16>
    %cst_98 = arith.constant dense<0.000000e+00> : vector<24x96xf32>
    %126 = tpu.matmul %124, %125, %cst_98 {dimension_numbers = #tpu.dot_dimension_numbers<[1], [0], [0], [1], [0, 0, 1, 1], [], []>} : vector<24x8xbf16>, vector<8x96xbf16>, vector<24x96xf32> -> vector<24x96xf32>
    %127 = arith.addf %122, %126 : vector<24x96xf32>
    %128 = arith.truncf %127 : vector<24x96xf32> to vector<24x96xbf16>
    %c0_99 = arith.constant 0 : index
    %c0_100 = arith.constant 0 : index
    %129 = vector.load %arg22[%c0_99, %c0_100] : memref<96x384xbf16, #tpu.memory_space<vmem>>, vector<96x384xbf16>
    %cst_101 = arith.constant dense<0.000000e+00> : vector<24x384xf32>
    %130 = tpu.matmul %128, %129, %cst_101 {dimension_numbers = #tpu.dot_dimension_numbers<[1], [0], [0], [1], [0, 0, 1, 1], [], []>} : vector<24x96xbf16>, vector<96x384xbf16>, vector<24x384xf32> -> vector<24x384xf32>
    %131 = arith.truncf %130 : vector<24x384xf32> to vector<24x384xbf16>
    %c0_102 = arith.constant 0 : index
    %c0_103 = arith.constant 0 : index
    %c0_104 = arith.constant 0 : index
    %132 = vector.load %arg21[%c0_102, %c0_103, %c0_104] : memref<3x56x24xbf16, #tpu.memory_space<vmem>>, vector<1x56x24xbf16>
    %133 = vector.shape_cast %132 : vector<1x56x24xbf16> to vector<56x24xbf16>
    %134 = vector.extract_strided_slice %131 {offsets = [0, 0], sizes = [24, 112], strides = [1, 1]} : vector<24x384xbf16> to vector<24x112xbf16>
    %cst_105 = arith.constant dense<0.000000e+00> : vector<56x112xf32>
    %135 = tpu.matmul %133, %134, %cst_105 {dimension_numbers = #tpu.dot_dimension_numbers<[1], [0], [0], [1], [0, 0, 1, 1], [], []>} : vector<56x24xbf16>, vector<24x112xbf16>, vector<56x112xf32> -> vector<56x112xf32>
    %c1_106 = arith.constant 1 : index
    %c0_107 = arith.constant 0 : index
    %c0_108 = arith.constant 0 : index
    %136 = vector.load %arg21[%c1_106, %c0_107, %c0_108] : memref<3x56x24xbf16, #tpu.memory_space<vmem>>, vector<1x56x24xbf16>
    %137 = vector.shape_cast %136 : vector<1x56x24xbf16> to vector<56x24xbf16>
    %138 = vector.extract_strided_slice %131 {offsets = [0, 128], sizes = [24, 112], strides = [1, 1]} : vector<24x384xbf16> to vector<24x112xbf16>
    %cst_109 = arith.constant dense<0.000000e+00> : vector<56x112xf32>
    %139 = tpu.matmul %137, %138, %cst_109 {dimension_numbers = #tpu.dot_dimension_numbers<[1], [0], [0], [1], [0, 0, 1, 1], [], []>} : vector<56x24xbf16>, vector<24x112xbf16>, vector<56x112xf32> -> vector<56x112xf32>
    %140 = arith.addf %135, %139 : vector<56x112xf32>
    %c2_110 = arith.constant 2 : index
    %c0_111 = arith.constant 0 : index
    %c0_112 = arith.constant 0 : index
    %141 = vector.load %arg21[%c2_110, %c0_111, %c0_112] : memref<3x56x24xbf16, #tpu.memory_space<vmem>>, vector<1x56x24xbf16>
    %142 = vector.shape_cast %141 : vector<1x56x24xbf16> to vector<56x24xbf16>
    %143 = vector.extract_strided_slice %131 {offsets = [0, 256], sizes = [24, 112], strides = [1, 1]} : vector<24x384xbf16> to vector<24x112xbf16>
    %cst_113 = arith.constant dense<0.000000e+00> : vector<56x112xf32>
    %144 = tpu.matmul %142, %143, %cst_113 {dimension_numbers = #tpu.dot_dimension_numbers<[1], [0], [0], [1], [0, 0, 1, 1], [], []>} : vector<56x24xbf16>, vector<24x112xbf16>, vector<56x112xf32> -> vector<56x112xf32>
    %145 = arith.addf %140, %144 : vector<56x112xf32>
    %c0_114 = arith.constant 0 : index
    %c0_115 = arith.constant 0 : index
    %146 = vector.load %arg23[%c0_114, %c0_115] : memref<1x112xf32, #tpu.memory_space<vmem>>, vector<1x112xf32>
    %147 = vector.broadcast %146 : vector<1x112xf32> to vector<56x112xf32>
    %148 = arith.addf %145, %147 : vector<56x112xf32>
    %cst_116 = arith.constant 0.000000e+00 : f32
    %149 = vector.broadcast %cst_116 : f32 to vector<56x112xf32>
    %150 = arith.maximumf %148, %149 : vector<56x112xf32>
    %151 = arith.truncf %150 : vector<56x112xf32> to vector<56x112xbf16>
    %c0_117 = arith.constant 0 : index
    %c0_118 = arith.constant 0 : index
    %152 = vector.load %arg25[%c0_117, %c0_118] : memref<112x384xbf16, #tpu.memory_space<vmem>>, vector<112x384xbf16>
    %cst_119 = arith.constant dense<0.000000e+00> : vector<56x384xf32>
    %153 = tpu.matmul %151, %152, %cst_119 {dimension_numbers = #tpu.dot_dimension_numbers<[1], [0], [0], [1], [0, 0, 1, 1], [], []>} : vector<56x112xbf16>, vector<112x384xbf16>, vector<56x384xf32> -> vector<56x384xf32>
    %154 = arith.truncf %153 : vector<56x384xf32> to vector<56x384xbf16>
    %c0_120 = arith.constant 0 : index
    %c0_121 = arith.constant 0 : index
    %c0_122 = arith.constant 0 : index
    %155 = vector.load %arg24[%c0_120, %c0_121, %c0_122] : memref<3x112x56xbf16, #tpu.memory_space<vmem>>, vector<1x112x56xbf16>
    %156 = vector.shape_cast %155 : vector<1x112x56xbf16> to vector<112x56xbf16>
    %157 = vector.extract_strided_slice %154 {offsets = [0, 0], sizes = [56, 112], strides = [1, 1]} : vector<56x384xbf16> to vector<56x112xbf16>
    %cst_123 = arith.constant dense<0.000000e+00> : vector<112x112xf32>
    %158 = tpu.matmul %156, %157, %cst_123 {dimension_numbers = #tpu.dot_dimension_numbers<[1], [0], [0], [1], [0, 0, 1, 1], [], []>} : vector<112x56xbf16>, vector<56x112xbf16>, vector<112x112xf32> -> vector<112x112xf32>
    %c1_124 = arith.constant 1 : index
    %c0_125 = arith.constant 0 : index
    %c0_126 = arith.constant 0 : index
    %159 = vector.load %arg24[%c1_124, %c0_125, %c0_126] : memref<3x112x56xbf16, #tpu.memory_space<vmem>>, vector<1x112x56xbf16>
    %160 = vector.shape_cast %159 : vector<1x112x56xbf16> to vector<112x56xbf16>
    %161 = vector.extract_strided_slice %154 {offsets = [0, 128], sizes = [56, 112], strides = [1, 1]} : vector<56x384xbf16> to vector<56x112xbf16>
    %cst_127 = arith.constant dense<0.000000e+00> : vector<112x112xf32>
    %162 = tpu.matmul %160, %161, %cst_127 {dimension_numbers = #tpu.dot_dimension_numbers<[1], [0], [0], [1], [0, 0, 1, 1], [], []>} : vector<112x56xbf16>, vector<56x112xbf16>, vector<112x112xf32> -> vector<112x112xf32>
    %163 = arith.addf %158, %162 : vector<112x112xf32>
    %c2_128 = arith.constant 2 : index
    %c0_129 = arith.constant 0 : index
    %c0_130 = arith.constant 0 : index
    %164 = vector.load %arg24[%c2_128, %c0_129, %c0_130] : memref<3x112x56xbf16, #tpu.memory_space<vmem>>, vector<1x112x56xbf16>
    %165 = vector.shape_cast %164 : vector<1x112x56xbf16> to vector<112x56xbf16>
    %166 = vector.extract_strided_slice %154 {offsets = [0, 256], sizes = [56, 112], strides = [1, 1]} : vector<56x384xbf16> to vector<56x112xbf16>
    %cst_131 = arith.constant dense<0.000000e+00> : vector<112x112xf32>
    %167 = tpu.matmul %165, %166, %cst_131 {dimension_numbers = #tpu.dot_dimension_numbers<[1], [0], [0], [1], [0, 0, 1, 1], [], []>} : vector<112x56xbf16>, vector<56x112xbf16>, vector<112x112xf32> -> vector<112x112xf32>
    %168 = arith.addf %163, %167 : vector<112x112xf32>
    %c0_132 = arith.constant 0 : index
    %c0_133 = arith.constant 0 : index
    %169 = vector.load %arg26[%c0_132, %c0_133] : memref<1x112xf32, #tpu.memory_space<vmem>>, vector<1x112xf32>
    %170 = vector.broadcast %169 : vector<1x112xf32> to vector<112x112xf32>
    %171 = arith.addf %168, %170 : vector<112x112xf32>
    %cst_134 = arith.constant 0.000000e+00 : f32
    %172 = vector.broadcast %cst_134 : f32 to vector<112x112xf32>
    %173 = arith.maximumf %171, %172 : vector<112x112xf32>
    %c0_135 = arith.constant 0 : index
    %c0_136 = arith.constant 0 : index
    %174 = vector.load %arg28[%c0_135, %c0_136] : memref<112x384xf32, #tpu.memory_space<vmem>>, vector<112x384xf32>
    %cst_137 = arith.constant dense<0.000000e+00> : vector<112x384xf32>
    %175 = tpu.matmul %173, %174, %cst_137 {dimension_numbers = #tpu.dot_dimension_numbers<[1], [0], [0], [1], [0, 0, 1, 1], [], []>} : vector<112x112xf32>, vector<112x384xf32>, vector<112x384xf32> -> vector<112x384xf32>
    %c0_138 = arith.constant 0 : index
    %c0_139 = arith.constant 0 : index
    %c0_140 = arith.constant 0 : index
    %176 = vector.load %arg27[%c0_138, %c0_139, %c0_140] : memref<3x224x112xf32, #tpu.memory_space<vmem>>, vector<1x224x112xf32>
    %177 = vector.shape_cast %176 : vector<1x224x112xf32> to vector<224x112xf32>
    %178 = vector.extract_strided_slice %175 {offsets = [0, 0], sizes = [112, 28], strides = [1, 1]} : vector<112x384xf32> to vector<112x28xf32>
    %cst_141 = arith.constant dense<0.000000e+00> : vector<224x28xf32>
    %179 = tpu.matmul %177, %178, %cst_141 {dimension_numbers = #tpu.dot_dimension_numbers<[1], [0], [0], [1], [0, 0, 1, 1], [], []>} : vector<224x112xf32>, vector<112x28xf32>, vector<224x28xf32> -> vector<224x28xf32>
    %c1_142 = arith.constant 1 : index
    %c0_143 = arith.constant 0 : index
    %c0_144 = arith.constant 0 : index
    %180 = vector.load %arg27[%c1_142, %c0_143, %c0_144] : memref<3x224x112xf32, #tpu.memory_space<vmem>>, vector<1x224x112xf32>
    %181 = vector.shape_cast %180 : vector<1x224x112xf32> to vector<224x112xf32>
    %182 = vector.extract_strided_slice %175 {offsets = [0, 128], sizes = [112, 28], strides = [1, 1]} : vector<112x384xf32> to vector<112x28xf32>
    %cst_145 = arith.constant dense<0.000000e+00> : vector<224x28xf32>
    %183 = tpu.matmul %181, %182, %cst_145 {dimension_numbers = #tpu.dot_dimension_numbers<[1], [0], [0], [1], [0, 0, 1, 1], [], []>} : vector<224x112xf32>, vector<112x28xf32>, vector<224x28xf32> -> vector<224x28xf32>
    %184 = arith.addf %179, %183 : vector<224x28xf32>
    %c2_146 = arith.constant 2 : index
    %c0_147 = arith.constant 0 : index
    %c0_148 = arith.constant 0 : index
    %185 = vector.load %arg27[%c2_146, %c0_147, %c0_148] : memref<3x224x112xf32, #tpu.memory_space<vmem>>, vector<1x224x112xf32>
    %186 = vector.shape_cast %185 : vector<1x224x112xf32> to vector<224x112xf32>
    %187 = vector.extract_strided_slice %175 {offsets = [0, 256], sizes = [112, 28], strides = [1, 1]} : vector<112x384xf32> to vector<112x28xf32>
    %cst_149 = arith.constant dense<0.000000e+00> : vector<224x28xf32>
    %188 = tpu.matmul %186, %187, %cst_149 {dimension_numbers = #tpu.dot_dimension_numbers<[1], [0], [0], [1], [0, 0, 1, 1], [], []>} : vector<224x112xf32>, vector<112x28xf32>, vector<224x28xf32> -> vector<224x28xf32>
    %189 = arith.addf %184, %188 : vector<224x28xf32>
    %c0_150 = arith.constant 0 : index
    %c0_151 = arith.constant 0 : index
    %190 = vector.load %arg29[%c0_150, %c0_151] : memref<1x28xf32, #tpu.memory_space<vmem>>, vector<1x28xf32>
    %191 = vector.broadcast %190 : vector<1x28xf32> to vector<224x28xf32>
    %192 = arith.addf %189, %191 : vector<224x28xf32>
    %193 = arith.negf %192 : vector<224x28xf32>
    %194 = math.exp %193 : vector<224x28xf32>
    %cst_152 = arith.constant 1.000000e+00 : f32
    %195 = vector.broadcast %cst_152 : f32 to vector<224x28xf32>
    %196 = arith.addf %195, %194 : vector<224x28xf32>
    %197 = arith.divf %195, %196 : vector<224x28xf32>
    %c0_153 = arith.constant 0 : index
    %c0_154 = arith.constant 0 : index
    %198 = vector.load %arg30[%c0_153, %c0_154] : memref<224x28xf32, #tpu.memory_space<vmem>>, vector<224x28xf32>
    tpu.vector_store %arg30[%c0_153, %c0_154], %197 {strides = array<i32>} : memref<224x28xf32, #tpu.memory_space<vmem>>, vector<224x28xf32>,
    return
  }
  func.func @transform_0(%arg0: i32) -> (i32, i32) {
    %c0_i32 = arith.constant 0 : i32
    %c0_i32_0 = arith.constant 0 : i32
    return %arg0, %c0_i32 : i32, i32
  }
  func.func @transform_1(%arg0: i32) -> (i32, i32, i32) {
    %c0_i32 = arith.constant 0 : i32
    %c0_i32_0 = arith.constant 0 : i32
    %c0_i32_1 = arith.constant 0 : i32
    %c0_i32_2 = arith.constant 0 : i32
    return %c0_i32, %c0_i32_0, %c0_i32_1 : i32, i32, i32
  }
  func.func @transform_2(%arg0: i32) -> (i32, i32) {
    %c0_i32 = arith.constant 0 : i32
    %c0_i32_0 = arith.constant 0 : i32
    %c0_i32_1 = arith.constant 0 : i32
    return %c0_i32, %c0_i32_0 : i32, i32
  }
  func.func @transform_3(%arg0: i32) -> (i32, i32) {
    %c0_i32 = arith.constant 0 : i32
    %c0_i32_0 = arith.constant 0 : i32
    %c0_i32_1 = arith.constant 0 : i32
    return %c0_i32, %c0_i32_0 : i32, i32
  }
  func.func @transform_4(%arg0: i32) -> (i32, i32, i32) {
    %c0_i32 = arith.constant 0 : i32
    %c0_i32_0 = arith.constant 0 : i32
    %c0_i32_1 = arith.constant 0 : i32
    %c0_i32_2 = arith.constant 0 : i32
    return %c0_i32, %c0_i32_0, %c0_i32_1 : i32, i32, i32
  }
  func.func @transform_5(%arg0: i32) -> (i32, i32) {
    %c0_i32 = arith.constant 0 : i32
    %c0_i32_0 = arith.constant 0 : i32
    %c0_i32_1 = arith.constant 0 : i32
    return %c0_i32, %c0_i32_0 : i32, i32
  }
  func.func @transform_6(%arg0: i32) -> (i32, i32) {
    %c0_i32 = arith.constant 0 : i32
    %c0_i32_0 = arith.constant 0 : i32
    %c0_i32_1 = arith.constant 0 : i32
    return %c0_i32, %c0_i32_0 : i32, i32
  }
  func.func @transform_7(%arg0: i32) -> (i32, i32, i32) {
    %c0_i32 = arith.constant 0 : i32
    %c0_i32_0 = arith.constant 0 : i32
    %c0_i32_1 = arith.constant 0 : i32
    %c0_i32_2 = arith.constant 0 : i32
    return %c0_i32, %c0_i32_0, %c0_i32_1 : i32, i32, i32
  }
  func.func @transform_8(%arg0: i32) -> (i32, i32) {
    %c0_i32 = arith.constant 0 : i32
    %c0_i32_0 = arith.constant 0 : i32
    %c0_i32_1 = arith.constant 0 : i32
    return %c0_i32, %c0_i32_0 : i32, i32
  }
  func.func @transform_9(%arg0: i32) -> (i32, i32) {
    %c0_i32 = arith.constant 0 : i32
    %c0_i32_0 = arith.constant 0 : i32
    %c0_i32_1 = arith.constant 0 : i32
    return %c0_i32, %c0_i32_0 : i32, i32
  }
  func.func @transform_10(%arg0: i32) -> (i32, i32, i32) {
    %c0_i32 = arith.constant 0 : i32
    %c0_i32_0 = arith.constant 0 : i32
    %c0_i32_1 = arith.constant 0 : i32
    %c0_i32_2 = arith.constant 0 : i32
    return %c0_i32, %c0_i32_0, %c0_i32_1 : i32, i32, i32
  }
  func.func @transform_11(%arg0: i32) -> (i32, i32) {
    %c0_i32 = arith.constant 0 : i32
    %c0_i32_0 = arith.constant 0 : i32
    %c0_i32_1 = arith.constant 0 : i32
    return %c0_i32, %c0_i32_0 : i32, i32
  }
  func.func @transform_12(%arg0: i32) -> (i32, i32) {
    %c0_i32 = arith.constant 0 : i32
    %c0_i32_0 = arith.constant 0 : i32
    %c0_i32_1 = arith.constant 0 : i32
    return %c0_i32, %c0_i32_0 : i32, i32
  }
  func.func @transform_13(%arg0: i32) -> (i32, i32) {
    %c0_i32 = arith.constant 0 : i32
    %c0_i32_0 = arith.constant 0 : i32
    %c0_i32_1 = arith.constant 0 : i32
    return %c0_i32, %c0_i32_0 : i32, i32
  }
  func.func @transform_14(%arg0: i32) -> (i32, i32) {
    %c0_i32 = arith.constant 0 : i32
    %c0_i32_0 = arith.constant 0 : i32
    %c0_i32_1 = arith.constant 0 : i32
    return %c0_i32, %c0_i32_0 : i32, i32
  }
  func.func @transform_15(%arg0: i32) -> (i32, i32) {
    %c0_i32 = arith.constant 0 : i32
    %c0_i32_0 = arith.constant 0 : i32
    %c0_i32_1 = arith.constant 0 : i32
    return %c0_i32, %c0_i32_0 : i32, i32
  }
  func.func @transform_16(%arg0: i32) -> (i32, i32) {
    %c0_i32 = arith.constant 0 : i32
    %c0_i32_0 = arith.constant 0 : i32
    %c0_i32_1 = arith.constant 0 : i32
    return %c0_i32, %c0_i32_0 : i32, i32
  }
  func.func @transform_17(%arg0: i32) -> (i32, i32, i32) {
    %c0_i32 = arith.constant 0 : i32
    %c0_i32_0 = arith.constant 0 : i32
    %c0_i32_1 = arith.constant 0 : i32
    %c0_i32_2 = arith.constant 0 : i32
    return %c0_i32, %c0_i32_0, %c0_i32_1 : i32, i32, i32
  }
  func.func @transform_18(%arg0: i32) -> (i32, i32) {
    %c0_i32 = arith.constant 0 : i32
    %c0_i32_0 = arith.constant 0 : i32
    %c0_i32_1 = arith.constant 0 : i32
    return %c0_i32, %c0_i32_0 : i32, i32
  }
  func.func @transform_19(%arg0: i32) -> (i32, i32) {
    %c0_i32 = arith.constant 0 : i32
    %c0_i32_0 = arith.constant 0 : i32
    %c0_i32_1 = arith.constant 0 : i32
    return %c0_i32, %c0_i32_0 : i32, i32
  }
  func.func @transform_20(%arg0: i32) -> (i32, i32, i32) {
    %c0_i32 = arith.constant 0 : i32
    %c0_i32_0 = arith.constant 0 : i32
    %c0_i32_1 = arith.constant 0 : i32
    %c0_i32_2 = arith.constant 0 : i32
    return %c0_i32, %c0_i32_0, %c0_i32_1 : i32, i32, i32
  }
  func.func @transform_21(%arg0: i32) -> (i32, i32) {
    %c0_i32 = arith.constant 0 : i32
    %c0_i32_0 = arith.constant 0 : i32
    %c0_i32_1 = arith.constant 0 : i32
    return %c0_i32, %c0_i32_0 : i32, i32
  }
  func.func @transform_22(%arg0: i32) -> (i32, i32) {
    %c0_i32 = arith.constant 0 : i32
    %c0_i32_0 = arith.constant 0 : i32
    %c0_i32_1 = arith.constant 0 : i32
    return %c0_i32, %c0_i32_0 : i32, i32
  }
  func.func @transform_23(%arg0: i32) -> (i32, i32, i32) {
    %c0_i32 = arith.constant 0 : i32
    %c0_i32_0 = arith.constant 0 : i32
    %c0_i32_1 = arith.constant 0 : i32
    %c0_i32_2 = arith.constant 0 : i32
    return %c0_i32, %c0_i32_0, %c0_i32_1 : i32, i32, i32
  }
  func.func @transform_24(%arg0: i32) -> (i32, i32) {
    %c0_i32 = arith.constant 0 : i32
    %c0_i32_0 = arith.constant 0 : i32
    %c0_i32_1 = arith.constant 0 : i32
    return %c0_i32, %c0_i32_0 : i32, i32
  }
  func.func @transform_25(%arg0: i32) -> (i32, i32) {
    %c0_i32 = arith.constant 0 : i32
    %c0_i32_0 = arith.constant 0 : i32
    %c0_i32_1 = arith.constant 0 : i32
    return %c0_i32, %c0_i32_0 : i32, i32
  }
  func.func @transform_26(%arg0: i32) -> (i32, i32, i32) {
    %c0_i32 = arith.constant 0 : i32
    %c0_i32_0 = arith.constant 0 : i32
    %c0_i32_1 = arith.constant 0 : i32
    %c0_i32_2 = arith.constant 0 : i32
    return %c0_i32, %c0_i32_0, %c0_i32_1 : i32, i32, i32
  }
  func.func @transform_27(%arg0: i32) -> (i32, i32) {
    %c0_i32 = arith.constant 0 : i32
    %c0_i32_0 = arith.constant 0 : i32
    %c0_i32_1 = arith.constant 0 : i32
    return %c0_i32, %c0_i32_0 : i32, i32
  }
  func.func @transform_28(%arg0: i32) -> (i32, i32) {
    %c0_i32 = arith.constant 0 : i32
    %c0_i32_0 = arith.constant 0 : i32
    %c0_i32_1 = arith.constant 0 : i32
    return %c0_i32, %c0_i32_0 : i32, i32
  }
  func.func @transform_29(%arg0: i32) -> (i32, i32) {
    %c0_i32 = arith.constant 0 : i32
    %c0_i32_0 = arith.constant 0 : i32
    return %arg0, %c0_i32 : i32, i32
  }
}

</mosaic_0001>

<bundles_post_ra>
// kernel: forward.1
= control target key start
LH: loop header
LB: loop body
LE: loop exit
PB: predicated region body
PF: predicated region fallthrough
CT: control target
= control target key end

     0   :  { %s10964_s6 = smov 1   ;;  %s10965_s10 = smov 2   ;;  %s12789_s0 = inlined_call_operand.smem [shape: u32[30], index: -1, kind: input, shape index: {}] }
   0x1   :  { %s11029_s5 = sld [smem:[%s12789_s0]]   ;;  %s10966_s14 = smov 3  }
   0x2   :  { %s11034_s9 = sld [smem:[%s12789_s0 + %s10964_s6]]   ;;  %s10967_s18 = smov 4  }
   0x3   :  { %s11039_s13 = sld [smem:[%s12789_s0 + %s10965_s10]]   ;;  %s10968_s22 = smov 5  }
   0x4   :  { %s11044_s17 = sld [smem:[%s12789_s0 + %s10966_s14]]   ;;  %s10969_s26 = smov 6  }
   0x5   :  { %s11049_s21 = sld [smem:[%s12789_s0 + %s10967_s18]]   ;;  %s10970_s30 = smov 7  }
   0x6   :  { %s11054_s25 = sld [smem:[%s12789_s0 + %s10968_s22]]   ;;  %s10971_s4 = smov 8  }
   0x7   :  { %12821 = sst [smem:[#allocation36_spill]] %s11029_s5  ;;  %s10972_s10 = smov 9  }
   0x8   :  { %12822 = sst [smem:[#allocation37_spill]] %s11034_s9  ;;  %s10973_s15 = smov 10  }
   0x9   :  { %s11059_s29 = sld [smem:[%s12789_s0 + %s10969_s26]]   ;;  %s10974_s20 = smov 11  }
   0xa   :  { %12823 = sst [smem:[#allocation38_spill]] %s11044_s17  ;;  %s10975_s26 = smov 12  }
   0xb   :  { %s11064_s3 = sld [smem:[%s12789_s0 + %s10970_s30]]   ;;  %s10976_s1 = smov 13  }
   0xc   :  { %12824 = sst [smem:[#allocation39_spill]] %s11054_s25  ;;  %s10977_s7 = smov 14  }
   0xd   :  { %s11069_s8 = sld [smem:[%s12789_s0 + %s10971_s4]]   ;;  %s10979_s22 = smov 16  }
   0xe   :  { %s11074_s14 = sld [smem:[%s12789_s0 + %s10972_s10]]   ;;  %s10980_s28 = smov 17  }
   0xf   :  { %12825 = sst [smem:[#allocation40_spill]] %s11059_s29 }
  0x10   :  { %s11079_s19 = sld [smem:[%s12789_s0 + %s10973_s15]]   ;;  %s10978_s15 = smov 15  }
  0x11   :  { %12826 = sst [smem:[#allocation41_spill]] %s11064_s3 }
  0x12   :  { %s11084_s24 = sld [smem:[%s12789_s0 + %s10974_s20]]  }
  0x13   :  { %12827 = sst [smem:[#allocation42_spill]] %s11069_s8 }
  0x14   :  { %12828 = sst [smem:[#allocation43_spill]] %s11074_s14 }
  0x15   :  { %s11089_s30 = sld [smem:[%s12789_s0 + %s10975_s26]]  }
  0x16   :  { %12829 = sst [smem:[#allocation44_spill]] %s11079_s19 }
  0x17   :  { %s11094_s6 = sld [smem:[%s12789_s0 + %s10976_s1]]  }
  0x18   :  { %12830 = sst [smem:[#allocation45_spill]] %s11084_s24 }
  0x19   :  { %s11099_s12 = sld [smem:[%s12789_s0 + %s10977_s7]]   ;;  %s10981_s7 = smov 18  }
  0x1a   :  { %s11104_s20 = sld [smem:[%s12789_s0 + %s10978_s15]]   ;;  %s10982_s15 = smov 19  }
  0x1b   :  { %s11109_s27 = sld [smem:[%s12789_s0 + %s10979_s22]]   ;;  %s10983_s22 = smov 20  }
  0x1c   :  { %s11114_s4 = sld [smem:[%s12789_s0 + %s10980_s28]]   ;;  %s10984_s28 = smov 21  }
  0x1d   :  { %12831 = sst [smem:[#allocation46_spill]] %s11094_s6 }
  0x1e   :  { %s11119_s19 = sld [smem:[%s12789_s0 + %s10981_s7]]   ;;  %s10985_s7 = smov 22  }
  0x1f   :  { %s11124_s24 = sld [smem:[%s12789_s0 + %s10982_s15]]   ;;  %s10986_s15 = smov 23  }
  0x20   :  { %s11129_s8 = sld [smem:[%s12789_s0 + %s10983_s22]]   ;;  %s10987_s22 = smov 24  }
  0x21   :  { %s11144_s25 = sld [smem:[%s12789_s0 + %s10986_s15]]   ;;  %s10990_s15 = smov 27  }
  0x22   :  { %12832 = sst [smem:[#allocation47_spill]] %s11114_s4 }
  0x23   :  { %s11134_s4 = sld [smem:[%s12789_s0 + %s10984_s28]]   ;;  %s10988_s28 = smov 25  }
  0x24   :  { %12833 = sst [smem:[#allocation48_spill]] %s11119_s19 }
  0x25   :  { %s11139_s19 = sld [smem:[%s12789_s0 + %s10985_s7]]   ;;  %s10989_s7 = smov 26  }
  0x26   :  { %12834 = sst [smem:[#allocation49_spill]] %s11129_s8 }
  0x27   :  { %12836 = sst [smem:[#allocation51_spill]] %s11144_s25 }
  0x28   :  { %s11149_s9 = sld [smem:[%s12789_s0 + %s10987_s22]]   ;;  %s10991_s22 = smov 28  }
  0x29   :  { %12835 = sst [smem:[#allocation50_spill]] %s11134_s4 }
  0x2a   :  { %s11154_s4 = sld [smem:[%s12789_s0 + %s10988_s28]]   ;;  %s10992_s28 = smov 29  }
  0x2b   :  { %s11159_s5 = sld [smem:[%s12789_s0 + %s10989_s7]]  }
  0x2c   :  { %s11164_s25 = sld [smem:[%s12789_s0 + %s10990_s15]]  }
  0x2e   :  { %12837 = sst [smem:[#allocation52_spill]] %s11149_s9 }
  0x2f   :  { %s11169_s9 = sld [smem:[%s12789_s0 + %s10991_s22]]  }
  0x30   :  { %12838 = sst [smem:[#allocation53_spill]] %s11154_s4 }
  0x31   :  { %12839 = sst [smem:[#allocation54_spill]] %s11159_s5 }
  0x32   :  { %s11174_s4 = sld [smem:[%s12789_s0 + %s10992_s28]]  }
  0x35   :  { %12840 = sst [smem:[#allocation55_spill]] %s11169_s9 }
  0x36   :  { %64 = vsyncpa [#allocation3], 0 }
  0x37   :  { %65 = vsyncpa [#allocation6], 0 }
  0x38   :  { %66 = vsyncpa [#allocation9], 0 }
  0x39   :  { %67 = vsyncpa [#allocation12], 0 }
  0x3a   :  { %68 = vsyncpa [#allocation15], 0 }
  0x3b   :  { %69 = vsyncpa [#allocation18], 0 }
  0x3c   :  { %70 = vsyncpa [#allocation21], 0 }
  0x3d   :  { %71 = vsyncpa [#allocation24], 0 }
  0x3e   :  { %72 = vsyncpa [#allocation4], 0 }
  0x3f   :  { %74 = vsyncpa [#allocation4 + $0x1], 0  ;;  %s11176_s7 = smov 0   ;;  %s11178_s10 = smov 0  }
  0x40   :  { %s11180_s11 = smov 0   ;;  %s11182_s15 = smov 0  }
  0x41 LB: > { %s12841_s8 = sld [smem:[#allocation49_spill]]  ;;  %s12842_s6 = sld [smem:[#allocation46_spill]]  ;;  %s10958_s11 = sphi %s11180_s11, %s12899_s11   ;;  %s10954_s10 = sphi %s11178_s10, %s12901_s10   ;;  %s10950_s7 = sphi %s11176_s7, %s12900_s7   ;;  %s10962_s15 = sphi %s11182_s15, %s12897_s15  }
  0x42   : > { %s12843_s5 = sld [smem:[#allocation54_spill]]  ;;  %s12844_s3 = sld [smem:[#allocation41_spill]] }
  0x43   : > { %s12845_s29 = sld [smem:[#allocation40_spill]]  ;;  %s12846_s17 = sld [smem:[#allocation38_spill]] }
  0x44   : > { %s12847_s14 = sld [smem:[#allocation43_spill]]  ;;  %12849 = sst [smem:[#allocation57_spill]] %s10958_s11 }
  0x45   : > { %12848 = sst [smem:[#allocation56_spill]] %s10950_s7  ;;  %s11197_s0 = sadd.s32 4294967295, %s10962_s15  }
  0x46   : > { %s7732_s16 = sadd.s32 4294967294, %s10962_s15   ;;  %s11201_s18 = sadd.s32 1, %s10962_s15  }
  0x47   : > { %12850 = sst [smem:[#allocation58_spill]] %s11201_s18  ;;  %s701_s22 = sadd.s32 1, %s10958_s11 }
  0x48   : > { %s698_s23 = ssub.s32 %s10962_s15, %s11201_s18  ;;  %p711_p0 = scmp.ne.s32.totalorder %s10958_s11, %s10954_s10 }
  0x49   : > { %p699_p1 = scmp.eq.s32.totalorder %s698_s23, 0  ;;  %p712_p2 = scmp.eq.s32.totalorder %s11197_s0, 1 }
  0x4a   : > { %p717_p3 = scmp.ne.s32.totalorder %s10954_s10, %s10950_s7  ;;  %p718_p4 = scmp.eq.s32.totalorder %s7732_s16, 1 }
  0x4b   : > { %s11212_s26 = scalar_select %p699_p1, %s10958_s11, %s701_s22  }
  0x4c   : > { %p11214_p5 = por %p712_p2, %p711_p0  ;;  %p11218_p6 = por %p718_p4, %p717_p3 }
  0x4d   : > { %12851 = sst [smem:[#allocation59_spill]] %s11212_s26  ;;  %p7733_p7 = scmp.ge.s32.totalorder %s10962_s15, 1 }
  0x4e   : > { %s12852_s28 = scalar_select %p11214_p5, 1, 0 }
  0x4f   : > { %s12853_s1 = scalar_select %p11218_p6, 1, 0 }
  0x50   : > { %p725_p8 = scmp.lt.s32.totalorder %s10962_s15, 3  ;;  %p12806_p9 = scmp.eq.s32.totalorder %s11197_s0, 0 }
  0x51   : > { %12854 = sst [smem:[#allocation60_spill]] %s12853_s1  ;;  %s10993_s16 = smov [#allocation5]  }
  0x52   : > { %p11225_p10 = pnand %p7733_p7, %p725_p8  ;;  %s754_s22 = sshll.u32 %s10993_s16, 4  ;;  %s755_s22 = int_to_ptr.vmem [resolvable:$true] %s754_s22 }
  0x53   : > { %s10994_s23 = smov [#allocation8]   ;;  %s10995_s18 = smov [#allocation11]  }
  0x54   : > { %s12855_s2 = scalar_select %p11225_p10, 1, 0 }
  0x55   : > { %p9875_p11 = pneg %p11225_p10  ;;  %s781_s26 = sshll.u32 %s10994_s23, 4  ;;  %s11237_s26 = int_to_ptr.vmem [resolvable:$true] %s781_s26 }
  0x56   : > { %s808_s1 = sshll.u32 %s10995_s18, 4  ;;  %s10448_s7 = scalar_lea.hbm %s12846_s17, 16  ;;  %s11239_s1 = int_to_ptr.vmem [resolvable:$true] %s808_s1 }
  0x57   : > { %p11233_p12 = pnand %p12806_p9, %p9875_p11  ;;  %p10449_p13 = scmp.ne.s32.totalorder %s12846_s17, %s10448_s7 }
  0x58   : > { %p10455_p3 = scmp.lt.u32.totalorder %s10448_s7, %s12846_s17 }
  0x59   : > { %p11245_p0 = pneg %p11233_p12 }
  0x5b   : > { %p10451_p1 = pnand %p11245_p0, %p10449_p13 }
  0x5d   : > { %p10452_p2 = pneg %p10451_p1 }
  0x5f   : > { %p10457_p4 = pnand %p10455_p3, %p10452_p2 }
  0x61   : > { %10460 = shalt.err (!%p10457_p4)
}
  0x62   : > { %s10461_s23 = scalar_lea.vmem %s755_s22, 16  ;;  %s10468_s18 = scalar_lea.vmem %s755_s22, 32 }
  0x63   : > { %p10462_p7 = scmp.ne.s32.totalorder %s755_s22, %s10461_s23  ;;  %p10469_p9 = scmp.lt.s32.totalorder %s755_s22, %s755_s22 }
  0x64   : > { %p10470_p6 = scmp.lt.s32.totalorder %s10468_s18, %s10461_s23 }
  0x65   : > { %p10464_p8 = pnand %p10462_p7, %p11245_p0 }
  0x66   : > { %p10471_p5 = por %p10470_p6, %p10469_p9 }
  0x67   : > { %p10465_p11 = pneg %p10464_p8 }
  0x69   : > { %p10472_p10 = pnand %p10471_p5, %p10465_p11 }
  0x6b   : > { %10475 = shalt.err (!%p10472_p10)
}
  0x6c   : > { %9881 = dma.hbm_to_vmem [thread:$0]  (!%p11233_p12), %s12846_s17, 16, %s755_s22, [#allocation6]  }
  0x6d   : > { %s10476_s7 = scalar_lea.hbm %s12845_s29, 16 }
  0x6e   : > { %p10477_p13 = scmp.ne.s32.totalorder %s12845_s29, %s10476_s7  ;;  %p10483_p3 = scmp.lt.u32.totalorder %s10476_s7, %s12845_s29 }
  0x70   : > { %p10479_p1 = pnand %p10477_p13, %p11245_p0 }
  0x72   : > { %p10480_p2 = pneg %p10479_p1 }
  0x74   : > { %p10485_p4 = pnand %p10483_p3, %p10480_p2 }
  0x76   : > { %10488 = shalt.err (!%p10485_p4)
}
  0x77   : > { %s10489_s23 = scalar_lea.vmem %s11237_s26, 16  ;;  %s10496_s18 = scalar_lea.vmem %s11237_s26, 32 }
  0x78   : > { %p10490_p5 = scmp.ne.s32.totalorder %s11237_s26, %s10489_s23  ;;  %p10497_p10 = scmp.lt.s32.totalorder %s11237_s26, %s11237_s26 }
  0x79   : > { %p10498_p7 = scmp.lt.s32.totalorder %s10496_s18, %s10489_s23 }
  0x7a   : > { %p10492_p6 = pnand %p10490_p5, %p11245_p0 }
  0x7b   : > { %p10499_p8 = por %p10498_p7, %p10497_p10 }
  0x7c   : > { %p10493_p9 = pneg %p10492_p6 }
  0x7e   : > { %p10500_p11 = pnand %p10499_p8, %p10493_p9 }
  0x80   : > { %10503 = shalt.err (!%p10500_p11)
}
  0x81   : > { %9887 = dma.hbm_to_vmem [thread:$0]  (!%p11233_p12), %s12845_s29, 16, %s11237_s26, [#allocation9]  }
  0x82   : > { %s10504_s22 = scalar_lea.hbm %s12847_s14, 16 }
  0x83   : > { %p10505_p13 = scmp.ne.s32.totalorder %s12847_s14, %s10504_s22  ;;  %p10511_p3 = scmp.lt.u32.totalorder %s10504_s22, %s12847_s14 }
  0x85   : > { %p10507_p1 = pnand %p10505_p13, %p11245_p0 }
  0x87   : > { %p10508_p2 = pneg %p10507_p1 }
  0x89   : > { %p10513_p4 = pnand %p10511_p3, %p10508_p2 }
  0x8b   : > { %10516 = shalt.err (!%p10513_p4)
}
  0x8c   : > { %s10517_s7 = scalar_lea.vmem %s11239_s1, 16  ;;  %s10524_s23 = scalar_lea.vmem %s11239_s1, 32 }
  0x8d   : > { %p10518_p5 = scmp.ne.s32.totalorder %s11239_s1, %s10517_s7  ;;  %p10525_p10 = scmp.lt.s32.totalorder %s11239_s1, %s11239_s1 }
  0x8e   : > { %p10526_p7 = scmp.lt.s32.totalorder %s10524_s23, %s10517_s7 }
  0x8f   : > { %p10520_p6 = pnand %p10518_p5, %p11245_p0 }
  0x90   : > { %p10527_p8 = por %p10526_p7, %p10525_p10 }
  0x91   : > { %p10521_p9 = pneg %p10520_p6 }
  0x93   : > { %p10528_p11 = pnand %p10527_p8, %p10521_p9 }
  0x95   : > { %10531 = shalt.err (!%p10528_p11)
}
  0x96   : > { %9893 = dma.hbm_to_vmem [thread:$0]  (!%p11233_p12), %s12847_s14, 16, %s11239_s1, [#allocation12]  }
  0x97   : > { %s10996_s26 = smov [#allocation14]   ;;  %s10532_s22 = scalar_lea.hbm %s12842_s6, 2048 }
  0x98   : > { %s835_s18 = sshll.u32 %s10996_s26, 4  ;;  %p10533_p13 = scmp.ne.s32.totalorder %s12842_s6, %s10532_s22  ;;  %s836_s18 = int_to_ptr.vmem [resolvable:$true] %s835_s18 }
  0x99   : > { %p10539_p3 = scmp.lt.u32.totalorder %s10532_s22, %s12842_s6 }
  0x9a   : > { %p10535_p1 = pnand %p10533_p13, %p11245_p0 }
  0x9c   : > { %p10536_p2 = pneg %p10535_p1 }
  0x9e   : > { %p10541_p4 = pnand %p10539_p3, %p10536_p2 }
  0xa0   : > { %10544 = shalt.err (!%p10541_p4)
}
  0xa1   : > { %s10545_s7 = scalar_lea.vmem %s836_s18, 2048  ;;  %p10553_p10 = scmp.lt.s32.totalorder %s836_s18, %s836_s18 }
  0xa2   : > { %p10546_p5 = scmp.ne.s32.totalorder %s836_s18, %s10545_s7  ;;  %p10554_p7 = scmp.lt.s32.totalorder %s10545_s7, %s10545_s7 }
  0xa4   : > { %p10548_p6 = pnand %p10546_p5, %p11245_p0  ;;  %p10555_p8 = por %p10554_p7, %p10553_p10 }
  0xa6   : > { %p10549_p9 = pneg %p10548_p6 }
  0xa8   : > { %p10556_p11 = pnand %p10555_p8, %p10549_p9 }
  0xaa   : > { %10559 = shalt.err (!%p10556_p11)
}
  0xab   : > { %s10997_s1 = smov 128   ;;  %s10998_s23 = smov 8  }
  0xac   : > { %9899 = dma.hbm_to_vmem [thread:$0]  (!%p11233_p12), %s12842_s6, 2048, %s836_s18, [#allocation15], %s10997_s1, %s10997_s1, %s10998_s23  }
  0xad   : > { %s10999_s26 = smov [#allocation17]   ;;  %s11000_s14 = smov [#allocation20]  }
  0xae   : > { %s860_s22 = sshll.u32 %s10999_s26, 4  ;;  %s888_s17 = sshll.u32 %s11000_s14, 4  ;;  %s861_s22 = int_to_ptr.vmem [resolvable:$true] %s860_s22  ;;  %s11299_s17 = int_to_ptr.vmem [resolvable:$true] %s888_s17 }
  0xaf   : > { %s10560_s7 = scalar_lea.hbm %s11104_s20, 128 }
  0xb0   : > { %p10561_p13 = scmp.ne.s32.totalorder %s11104_s20, %s10560_s7  ;;  %p10567_p3 = scmp.lt.u32.totalorder %s10560_s7, %s11104_s20 }
  0xb2   : > { %p10563_p1 = pnand %p10561_p13, %p11245_p0 }
  0xb4   : > { %p10564_p2 = pneg %p10563_p1 }
  0xb6   : > { %p10569_p4 = pnand %p10567_p3, %p10564_p2 }
  0xb8   : > { %10572 = shalt.err (!%p10569_p4)
}
  0xb9   : > { %s10573_s29 = scalar_lea.vmem %s861_s22, 128  ;;  %p10581_p10 = scmp.lt.s32.totalorder %s861_s22, %s861_s22 }
  0xba   : > { %p10574_p5 = scmp.ne.s32.totalorder %s861_s22, %s10573_s29  ;;  %p10582_p7 = scmp.lt.s32.totalorder %s10573_s29, %s10573_s29 }
  0xbc   : > { %p10576_p6 = pnand %p10574_p5, %p11245_p0  ;;  %p10583_p8 = por %p10582_p7, %p10581_p10 }
  0xbe   : > { %p10577_p9 = pneg %p10576_p6 }
  0xc0   : > { %p10584_p11 = pnand %p10583_p8, %p10577_p9 }
  0xc2   : > { %10587 = shalt.err (!%p10584_p11)
}
  0xc3   : > { %9905 = dma.hbm_to_vmem [thread:$0]  (!%p11233_p12), %s11104_s20, 128, %s861_s22, [#allocation18]  }
  0xc4   : > { %s10588_s14 = scalar_lea.hbm %s11124_s24, 48 }
  0xc5   : > { %p10589_p13 = scmp.ne.s32.totalorder %s11124_s24, %s10588_s14  ;;  %p10595_p3 = scmp.lt.u32.totalorder %s10588_s14, %s11124_s24 }
  0xc7   : > { %p10591_p1 = pnand %p10589_p13, %p11245_p0 }
  0xc9   : > { %p10592_p2 = pneg %p10591_p1 }
  0xcb   : > { %p10597_p4 = pnand %p10595_p3, %p10592_p2 }
  0xcd   : > { %10600 = shalt.err (!%p10597_p4)
}
  0xce   : > { %s10601_s29 = scalar_lea.vmem %s11299_s17, 48  ;;  %s10608_s18 = scalar_lea.vmem %s11299_s17, 64 }
  0xcf   : > { %p10602_p5 = scmp.ne.s32.totalorder %s11299_s17, %s10601_s29  ;;  %p10609_p10 = scmp.lt.s32.totalorder %s11299_s17, %s11299_s17 }
  0xd0   : > { %p10610_p7 = scmp.lt.s32.totalorder %s10608_s18, %s10601_s29 }
  0xd1   : > { %p10604_p6 = pnand %p10602_p5, %p11245_p0 }
  0xd2   : > { %p10611_p8 = por %p10610_p7, %p10609_p10 }
  0xd3   : > { %p10605_p9 = pneg %p10604_p6 }
  0xd5   : > { %p10612_p11 = pnand %p10611_p8, %p10605_p9 }
  0xd7   : > { %10615 = shalt.err (!%p10612_p11)
}
  0xd8   : > { %9911 = dma.hbm_to_vmem [thread:$0]  (!%p11233_p12), %s11124_s24, 48, %s11299_s17, [#allocation21]  }
  0xd9   : > { %s11001_s1 = smov [#allocation23]   ;;  %s11002_s26 = smov [#allocation2]  }
  0xda   : > { %s915_s23 = sshll.u32 %s11001_s1, 4  ;;  %s740_s22 = sshll.u32 %s11002_s26, 4  ;;  %s916_s23 = int_to_ptr.vmem [resolvable:$true] %s915_s23  ;;  %s11327_s22 = int_to_ptr.vmem [resolvable:$true] %s740_s22 }
  0xdb   : > { %s10616_s7 = scalar_lea.hbm %s11139_s19, 16 }
  0xdc   : > { %p10617_p13 = scmp.ne.s32.totalorder %s11139_s19, %s10616_s7  ;;  %p10623_p3 = scmp.lt.u32.totalorder %s10616_s7, %s11139_s19 }
  0xde   : > { %p10619_p1 = pnand %p10617_p13, %p11245_p0 }
  0xe0   : > { %p10620_p2 = pneg %p10619_p1 }
  0xe2   : > { %p10625_p4 = pnand %p10623_p3, %p10620_p2 }
  0xe4   : > { %10628 = shalt.err (!%p10625_p4)
}
  0xe5   : > { %s10629_s14 = scalar_lea.vmem %s916_s23, 16  ;;  %s10636_s17 = scalar_lea.vmem %s916_s23, 32 }
  0xe6   : > { %p10630_p5 = scmp.ne.s32.totalorder %s916_s23, %s10629_s14  ;;  %p10637_p10 = scmp.lt.s32.totalorder %s916_s23, %s916_s23 }
  0xe7   : > { %p10638_p7 = scmp.lt.s32.totalorder %s10636_s17, %s10629_s14 }
  0xe8   : > { %p10632_p6 = pnand %p10630_p5, %p11245_p0 }
  0xe9   : > { %p10639_p8 = por %p10638_p7, %p10637_p10 }
  0xea   : > { %p10633_p9 = pneg %p10632_p6 }
  0xec   : > { %p10640_p11 = pnand %p10639_p8, %p10633_p9 }
  0xee   : > { %10643 = shalt.err (!%p10640_p11)
}
  0xef   : > { %9917 = dma.hbm_to_vmem [thread:$0]  (!%p11233_p12), %s11139_s19, 16, %s916_s23, [#allocation24]  }
  0xf0   : > { %s10644_s29 = scalar_lea.hbm %s11039_s13, 768 }
  0xf1   : > { %p10645_p13 = scmp.ne.s32.totalorder %s11039_s13, %s10644_s29  ;;  %p10651_p3 = scmp.lt.u32.totalorder %s10644_s29, %s11039_s13 }
  0xf3   : > { %p10647_p1 = pnand %p10645_p13, %p11245_p0 }
  0xf5   : > { %p10648_p2 = pneg %p10647_p1 }
  0xf7   : > { %p10653_p4 = pnand %p10651_p3, %p10648_p2 }
  0xf9   : > { %10656 = shalt.err (!%p10653_p4)
}
  0xfa   : > { %s10657_s18 = scalar_lea.vmem %s11327_s22, 768  ;;  %p10665_p10 = scmp.lt.s32.totalorder %s11327_s22, %s11327_s22 }
  0xfb   : > { %p10658_p5 = scmp.ne.s32.totalorder %s11327_s22, %s10657_s18  ;;  %p10666_p7 = scmp.lt.s32.totalorder %s10657_s18, %s10657_s18 }
  0xfd   : > { %p10660_p6 = pnand %p10658_p5, %p11245_p0  ;;  %p10667_p8 = por %p10666_p7, %p10665_p10 }
  0xff   : > { %p10661_p9 = pneg %p10660_p6 }
 0x101   : > { %p10668_p11 = pnand %p10667_p8, %p10661_p9 }
 0x103   : > { %10671 = shalt.err (!%p10668_p11)
}
 0x104   : > { %s11003_s1 = smov 192   ;;  %s11004_s23 = smov 12  }
 0x105   : > { %9878 = dma.hbm_to_vmem [thread:$0]  (!%p11233_p12), %s11039_s13, 768, %s11327_s22, [#allocation3], %s11003_s1, %s11003_s1, %s11004_s23  }
 0x106   : > { %s11005_s26 = smov [#allocation7]   ;;  %s10672_s14 = scalar_lea.hbm %s11049_s21, 1344 }
 0x107   : > { %s764_s7 = sshll.u32 %s11005_s26, 4  ;;  %p10673_p13 = scmp.ne.s32.totalorder %s11049_s21, %s10672_s14  ;;  %s765_s7 = int_to_ptr.vmem [resolvable:$true] %s764_s7 }
 0x108   : > { %p10679_p3 = scmp.lt.u32.totalorder %s10672_s14, %s11049_s21 }
 0x109   : > { %p10675_p1 = pnand %p10673_p13, %p11245_p0 }
 0x10b   : > { %p10676_p2 = pneg %p10675_p1 }
 0x10d   : > { %p10681_p4 = pnand %p10679_p3, %p10676_p2 }
 0x10f   : > { %10684 = shalt.err (!%p10681_p4)
}
 0x110   : > { %s10685_s17 = scalar_lea.vmem %s765_s7, 1344  ;;  %p10693_p10 = scmp.lt.s32.totalorder %s765_s7, %s765_s7 }
 0x111   : > { %p10686_p5 = scmp.ne.s32.totalorder %s765_s7, %s10685_s17  ;;  %p10694_p7 = scmp.lt.s32.totalorder %s10685_s17, %s10685_s17 }
 0x113   : > { %p10688_p6 = pnand %p10686_p5, %p11245_p0  ;;  %p10695_p8 = por %p10694_p7, %p10693_p10 }
 0x115   : > { %p10689_p9 = pneg %p10688_p6 }
 0x117   : > { %p10696_p11 = pnand %p10695_p8, %p10689_p9 }
 0x119   : > { %10699 = shalt.err (!%p10696_p11)
}
 0x11a   : > { %s12812_s22 = smov 64   ;;  %s11007_s29 = smov 4  }
 0x11b   : > { %9884 = dma.hbm_to_vmem [thread:$0]  (!%p11233_p12), %s11049_s21, 1344, %s765_s7, [#allocation6], %s12812_s22, %s12812_s22, %s11007_s29  }
 0x11c   : > { %s11008_s18 = smov [#allocation10]   ;;  %s11009_s23 = smov [#allocation13]  }
 0x11d   : > { %s791_s1 = sshll.u32 %s11008_s18, 4  ;;  %s825_s26 = sshll.u32 %s11009_s23, 4  ;;  %s792_s1 = int_to_ptr.vmem [resolvable:$true] %s791_s1  ;;  %s826_s26 = int_to_ptr.vmem [resolvable:$true] %s825_s26 }
 0x11e   : > { %s10700_s14 = scalar_lea.hbm %s12844_s3, 576 }
 0x11f   : > { %p10701_p13 = scmp.ne.s32.totalorder %s12844_s3, %s10700_s14  ;;  %p10707_p3 = scmp.lt.u32.totalorder %s10700_s14, %s12844_s3 }
 0x121   : > { %p10703_p1 = pnand %p10701_p13, %p11245_p0 }
 0x123   : > { %p10704_p2 = pneg %p10703_p1 }
 0x125   : > { %p10709_p4 = pnand %p10707_p3, %p10704_p2 }
 0x127   : > { %10712 = shalt.err (!%p10709_p4)
}
 0x128   : > { %s10713_s17 = scalar_lea.vmem %s792_s1, 576  ;;  %p10721_p10 = scmp.lt.s32.totalorder %s792_s1, %s792_s1 }
 0x129   : > { %p10714_p5 = scmp.ne.s32.totalorder %s792_s1, %s10713_s17  ;;  %p10722_p7 = scmp.lt.s32.totalorder %s10713_s17, %s10713_s17 }
 0x12b   : > { %p10716_p6 = pnand %p10714_p5, %p11245_p0  ;;  %p10723_p8 = por %p10722_p7, %p10721_p10 }
 0x12d   : > { %p10717_p9 = pneg %p10716_p6 }
 0x12f   : > { %p10724_p11 = pnand %p10723_p8, %p10717_p9 }
 0x131   : > { %10727 = shalt.err (!%p10724_p11)
}
 0x132   : > { %9890 = dma.hbm_to_vmem [thread:$0]  (!%p11233_p12), %s12844_s3, 576, %s792_s1, [#allocation9], %s12812_s22, %s12812_s22, %s11007_s29  }
 0x133   : > { %s10728_s7 = scalar_lea.hbm %s11089_s30, 16 }
 0x134   : > { %p10729_p13 = scmp.ne.s32.totalorder %s11089_s30, %s10728_s7  ;;  %p10735_p3 = scmp.lt.u32.totalorder %s10728_s7, %s11089_s30 }
 0x136   : > { %p10731_p1 = pnand %p10729_p13, %p11245_p0 }
 0x138   : > { %p10732_p2 = pneg %p10731_p1 }
 0x13a   : > { %p10737_p4 = pnand %p10735_p3, %p10732_p2 }
 0x13c   : > { %10740 = shalt.err (!%p10737_p4)
}
 0x13d   : > { %s10741_s18 = scalar_lea.vmem %s826_s26, 16  ;;  %s10748_s23 = scalar_lea.vmem %s826_s26, 32 }
 0x13e   : > { %p10742_p5 = scmp.ne.s32.totalorder %s826_s26, %s10741_s18  ;;  %p10749_p10 = scmp.lt.s32.totalorder %s826_s26, %s826_s26 }
 0x13f   : > { %p10750_p7 = scmp.lt.s32.totalorder %s10748_s23, %s10741_s18 }
 0x140   : > { %p10744_p6 = pnand %p10742_p5, %p11245_p0 }
 0x141   : > { %p10751_p8 = por %p10750_p7, %p10749_p10 }
 0x142   : > { %p10745_p9 = pneg %p10744_p6 }
 0x144   : > { %p10752_p11 = pnand %p10751_p8, %p10745_p9 }
 0x146   : > { %10755 = shalt.err (!%p10752_p11)
}
 0x147   : > { %9896 = dma.hbm_to_vmem [thread:$0]  (!%p11233_p12), %s11089_s30, 16, %s826_s26, [#allocation12]  }
 0x148   : > { %s11010_s1 = smov [#allocation16]   ;;  %s11011_s17 = smov [#allocation19]  }
 0x149   : > { %s849_s14 = sshll.u32 %s11010_s1, 4  ;;  %s871_s7 = sshll.u32 %s11011_s17, 4  ;;  %s850_s14 = int_to_ptr.vmem [resolvable:$true] %s849_s14  ;;  %s872_s7 = int_to_ptr.vmem [resolvable:$true] %s871_s7 }
 0x14a   : > { %s10756_s22 = scalar_lea.hbm %s11099_s12, 16 }
 0x14b   : > { %p10757_p13 = scmp.ne.s32.totalorder %s11099_s12, %s10756_s22  ;;  %p10763_p3 = scmp.lt.u32.totalorder %s10756_s22, %s11099_s12 }
 0x14d   : > { %p10759_p1 = pnand %p10757_p13, %p11245_p0 }
 0x14f   : > { %p10760_p2 = pneg %p10759_p1 }
 0x151   : > { %p10765_p4 = pnand %p10763_p3, %p10760_p2 }
 0x153   : > { %10768 = shalt.err (!%p10765_p4)
}
 0x154   : > { %s10769_s18 = scalar_lea.vmem %s850_s14, 16  ;;  %s10776_s26 = scalar_lea.vmem %s850_s14, 32 }
 0x155   : > { %p10770_p5 = scmp.ne.s32.totalorder %s850_s14, %s10769_s18  ;;  %p10777_p10 = scmp.lt.s32.totalorder %s850_s14, %s850_s14 }
 0x156   : > { %p10778_p7 = scmp.lt.s32.totalorder %s10776_s26, %s10769_s18 }
 0x157   : > { %p10772_p6 = pnand %p10770_p5, %p11245_p0 }
 0x158   : > { %p10779_p8 = por %p10778_p7, %p10777_p10 }
 0x159   : > { %p10773_p9 = pneg %p10772_p6 }
 0x15b   : > { %p10780_p11 = pnand %p10779_p8, %p10773_p9 }
 0x15d   : > { %10783 = shalt.err (!%p10780_p11)
}
 0x15e   : > { %9902 = dma.hbm_to_vmem [thread:$0]  (!%p11233_p12), %s11099_s12, 16, %s850_s14, [#allocation15]  }
 0x15f   : > { %s10784_s22 = scalar_lea.hbm %s11109_s27, 16 }
 0x160   : > { %p10785_p13 = scmp.ne.s32.totalorder %s11109_s27, %s10784_s22  ;;  %p10791_p3 = scmp.lt.u32.totalorder %s10784_s22, %s11109_s27 }
 0x162   : > { %p10787_p1 = pnand %p10785_p13, %p11245_p0 }
 0x164   : > { %p10788_p2 = pneg %p10787_p1 }
 0x166   : > { %p10793_p4 = pnand %p10791_p3, %p10788_p2 }
 0x168   : > { %10796 = shalt.err (!%p10793_p4)
}
 0x169   : > { %s10797_s23 = scalar_lea.vmem %s872_s7, 16  ;;  %s10804_s1 = scalar_lea.vmem %s872_s7, 32 }
 0x16a   : > { %p10798_p5 = scmp.ne.s32.totalorder %s872_s7, %s10797_s23  ;;  %p10805_p10 = scmp.lt.s32.totalorder %s872_s7, %s872_s7 }
 0x16b   : > { %p10806_p7 = scmp.lt.s32.totalorder %s10804_s1, %s10797_s23 }
 0x16c   : > { %p10800_p6 = pnand %p10798_p5, %p11245_p0 }
 0x16d   : > { %p10807_p8 = por %p10806_p7, %p10805_p10 }
 0x16e   : > { %p10801_p9 = pneg %p10800_p6 }
 0x170   : > { %p10808_p11 = pnand %p10807_p8, %p10801_p9 }
 0x172   : > { %10811 = shalt.err (!%p10808_p11)
}
 0x173   : > { %9908 = dma.hbm_to_vmem [thread:$0]  (!%p11233_p12), %s11109_s27, 16, %s872_s7, [#allocation18]  }
 0x174   : > { %s11012_s14 = smov [#allocation22]   ;;  %s11013_s18 = smov [#allocation25]  }
 0x175   : > { %s898_s17 = sshll.u32 %s11012_s14, 4  ;;  %s932_s26 = sshll.u32 %s11013_s18, 4  ;;  %s899_s17 = int_to_ptr.vmem [resolvable:$true] %s898_s17  ;;  %s933_s26 = int_to_ptr.vmem [resolvable:$true] %s932_s26 }
 0x176   : > { %s10812_s22 = scalar_lea.hbm %s12841_s8, 1344 }
 0x177   : > { %p10813_p13 = scmp.ne.s32.totalorder %s12841_s8, %s10812_s22  ;;  %p10819_p3 = scmp.lt.u32.totalorder %s10812_s22, %s12841_s8 }
 0x179   : > { %p10815_p1 = pnand %p10813_p13, %p11245_p0 }
 0x17b   : > { %p10816_p2 = pneg %p10815_p1 }
 0x17d   : > { %p10821_p4 = pnand %p10819_p3, %p10816_p2 }
 0x17f   : > { %10824 = shalt.err (!%p10821_p4)
}
 0x180   : > { %s10825_s23 = scalar_lea.vmem %s899_s17, 1344  ;;  %p10833_p10 = scmp.lt.s32.totalorder %s899_s17, %s899_s17 }
 0x181   : > { %p10826_p5 = scmp.ne.s32.totalorder %s899_s17, %s10825_s23  ;;  %p10834_p7 = scmp.lt.s32.totalorder %s10825_s23, %s10825_s23 }
 0x183   : > { %p10828_p6 = pnand %p10826_p5, %p11245_p0  ;;  %p10835_p8 = por %p10834_p7, %p10833_p10 }
 0x185   : > { %p10829_p9 = pneg %p10828_p6 }
 0x187   : > { %p10836_p11 = pnand %p10835_p8, %p10829_p9 }
 0x189   : > { %10839 = shalt.err (!%p10836_p11)
}
 0x18a   : > { %s12858_s7 = smov 64   ;;  %s12859_s1 = sld [smem:[#allocation53_spill]] }
 0x18b   : > { %9914 = dma.hbm_to_vmem [thread:$0]  (!%p11233_p12), %s12841_s8, 1344, %s899_s17, [#allocation21], %s12858_s7, %s12858_s7, %s11007_s29  }
 0x190   : > { %s10840_s14 = scalar_lea.hbm %s12859_s1, 16 }
 0x191   : > { %p10841_p13 = scmp.ne.s32.totalorder %s12859_s1, %s10840_s14  ;;  %p10847_p3 = scmp.lt.u32.totalorder %s10840_s14, %s12859_s1 }
 0x193   : > { %p10843_p1 = pnand %p10841_p13, %p11245_p0 }
 0x195   : > { %p10844_p2 = pneg %p10843_p1 }
 0x197   : > { %p10849_p4 = pnand %p10847_p3, %p10844_p2 }
 0x199   : > { %10852 = shalt.err (!%p10849_p4)
}
 0x19a   : > { %s10853_s18 = scalar_lea.vmem %s933_s26, 16  ;;  %s10860_s22 = scalar_lea.vmem %s933_s26, 32 }
 0x19b   : > { %p10854_p5 = scmp.ne.s32.totalorder %s933_s26, %s10853_s18  ;;  %p10861_p10 = scmp.lt.s32.totalorder %s933_s26, %s933_s26 }
 0x19c   : > { %p10862_p7 = scmp.lt.s32.totalorder %s10860_s22, %s10853_s18 }
 0x19d   : > { %p10856_p6 = pnand %p10854_p5, %p11245_p0 }
 0x19e   : > { %p10863_p8 = por %p10862_p7, %p10861_p10 }
 0x19f   : > { %p10857_p9 = pneg %p10856_p6 }
 0x1a1   : > { %p10864_p11 = pnand %p10863_p8, %p10857_p9 }
 0x1a3   : > { %10867 = shalt.err (!%p10864_p11)
}
 0x1a4   : > { %9920 = dma.hbm_to_vmem [thread:$0]  (!%p11233_p12), %s12859_s1, 16, %s933_s26, [#allocation24]  }
 0x1a5   : > { %p12860_p13 = scmp.ne.s32.totalorder %s12855_s2, 0 }
 0x1a6   : > { %p12861_p1 = scmp.eq.s32.totalorder (!%p12860_p13), %s11197_s0, 0 }
 0x1a7   : > { %963 = sbr.rel (%p12860_p13) target bundleno = 5119 (0x13ff), region = 136 }
 0x1ae   : > { %10913 = dma.done.wait (%p12861_p1), [#allocation3], 768   ;;  %p12862_p2 = pmov %p12861_p1 }
 0x1af   : > { %p12863_p0 = pmov %p12861_p1 }
 0x1b0   : > { %10915 = vsyncadd (%p12862_p2), [#allocation3], 4294966528 }
 0x1b1   : > { %10917 = dma.done.wait (%p12863_p0), [#allocation6], 1360   ;;  %p12864_p3 = pmov %p12863_p0 }
 0x1b2   : > { %p12865_p4 = pmov %p12863_p0 }
 0x1b3   : > { %10919 = vsyncadd (%p12864_p3), [#allocation6], 4294965936 }
 0x1b4   : > { %10921 = dma.done.wait (%p12865_p4), [#allocation9], 592   ;;  %p12866_p12 = pmov %p12863_p0 }
 0x1b5   : > { %p12867_p5 = pmov %p12863_p0 }
 0x1b6   : > { %10923 = vsyncadd (%p12866_p12), [#allocation9], 4294966704 }
 0x1b7   : > { %10925 = dma.done.wait (%p12867_p5), [#allocation12], 32   ;;  %p12868_p6 = pmov %p12863_p0 }
 0x1b8   : > { %p12869_p9 = pmov %p12863_p0 }
 0x1b9   : > { %10927 = vsyncadd (%p12868_p6), [#allocation12], 4294967264 }
 0x1ba   : > { %10929 = dma.done.wait (%p12869_p9), [#allocation15], 2064   ;;  %p12870_p10 = pmov %p12863_p0 }
 0x1bb   : > { %p12871_p7 = pmov %p12863_p0 }
 0x1bc   : > { %10931 = vsyncadd (%p12870_p10), [#allocation15], 4294965232 }
 0x1bd   : > { %10933 = dma.done.wait (%p12871_p7), [#allocation18], 144   ;;  %p12872_p8 = pmov %p12863_p0 }
 0x1be   : > { %p12873_p11 = pmov %p12863_p0 }
 0x1bf   : > { %10935 = vsyncadd (%p12872_p8), [#allocation18], 4294967152 }
 0x1c0   : > { %10937 = dma.done.wait (%p12873_p11), [#allocation21], 1392   ;;  %p12874_p13 = pmov %p12863_p0 }
 0x1c1   : > { %p12875_p1 = pmov %p12863_p0 }
 0x1c2   : > { %10939 = vsyncadd (%p12874_p13), [#allocation21], 4294965904 }
 0x1c3   : > { %10941 = dma.done.wait (%p12875_p1), [#allocation24], 32   ;;  %p12876_p2 = pmov %p12863_p0 }
 0x1c4   : > { %s12877_s11 = sld [smem:[#allocation36_spill]]  ;;  %s1095_s2 = smul.u32 28, %s11197_s0  ;;  %v11014_v0 = vmov 0   ;;  %v10044_v1 = vld [vmem:[#allocation2 + $0x4] ss:$12 sps:$4 sm:$0xff]   ;;  %vm1225_vm0 = vcmask 1045504  }
 0x1c5   : > { %10943 = vsyncadd (%p12876_p2), [#allocation24], 4294967264  ;;  %1267 = vmatprep.mubr.bf16.mxu0 %v11014_v0  ;;  %v10046_v2 = vld [vmem:[#allocation2] ss:$12 sps:$4 sm:$0xff]   ;;  %1235 = vmatprep.subr.bf16.mxu0 %v10044_v1  ;;  %vm1182_vm1 = vcmask 228352   ;;  %s12878_s17 = sld [smem:[#allocation37_spill]] }
 0x1c6   : > { %p1096_p0 = scmp.lt.s32.totalorder %s1095_s2, 55  ;;  %v10047_v3 = vld [vmem:[#allocation2 + $0x1c] ss:$12 sps:$4 sm:$0x3f]   ;;  %1236 = vmatpush1.bf16.msra.mxu0 %v10046_v2  ;;  %vm1687_vm2 = vcmask 785408   ;;  %s12879_s26 = sld [smem:[#allocation39_spill]] }
 0x1c7   : > { %v10049_v4 = vld [vmem:[#allocation2 + $0x18] ss:$12 sps:$4 sm:$0x3f]   ;;  %7773 = vmatprep.subr.msk.bf16.mxu0 %vm1225_vm0, %v10047_v3  ;;  %v10050_v11 = vld [vmem:[#allocation2 + $0x8] ss:$12 sps:$4 sm:$0xff]   ;;  %vm11016_vm3 = vmmov 0  }
 0x1c8   : > { %s12903_s2 = smov (!%p1096_p0, %s1095_s2), 55  ;;  %v1227_v7 = vsel %vm1225_vm0, %v10049_v4, 0  ;;  %8787 = vmatprep.subr.bf16.mxu1 %v10050_v11  ;;  %v10051_v12 = vld [vmem:[#allocation2 + $0x20] ss:$12 sps:$4 sm:$0x3f]   ;;  %vm2355_vm4 = vcmask 916480  }
 0x1c9   : > { %s7766_s16 = sshll.u32 %s12903_s2, 3  ;;  %8788 = vmatpush3.bf16.msra.mxu1 %v10050_v11  ;;  %v1233_v16 = vsel %vm1225_vm0, %v10051_v12, 0  ;;  %s12880_s23 = sld [smem:[#allocation42_spill]]  ;;  %vm3241_vm5 = vcmask 457728   ;;  %vm3248_vm6 = vcmask 1043456   ;;  %vm3686_vm7 = vcmask 195584  }
 0x1ca   : > { %s11470_s29 = scalar_lea.vmem %s12877_s11, %s7766_s16  ;;  %1238 = vmatpush1.bf16.msra.mxu0 %v1227_v7  ;;  %9802 = vmatprep.subr.msk.bf16.mxu1 %vm1225_vm0, %v10051_v12  ;;  %s12881_s7 = sld [smem:[#allocation45_spill]]  ;;  %vm3938_vm8 = vcmask 64512  }
 0x1cb   : > { %v1103_v5 = vld [vmem:[%s11470_s29] sm:$0xff]  ;;  %v1104_v6 = vld [vmem:[%s11470_s29 + $0x8] sm:$0xff]  ;;  %1709 = vmatprep.subr.bf16.mxu0 %v11014_v0  ;;  %v1105_v9 = vld [vmem:[%s11470_s29 + $0x10] sm:$0xff]  ;;  %s12883_s18 = sld [smem:[#allocation44_spill]]  ;;  %s12884_s22 = sld [smem:[#allocation48_spill]] }
 0x1cc   : > { %v1131_v8 = vpack.c.bf16 %v1104_v6, %v1103_v5  ;;  %v1106_v10 = vld [vmem:[%s11470_s29 + $0x18] sm:$0xff]  ;;  %v1107_v14 = vld [vmem:[%s11470_s29 + $0x20] sm:$0xff]  ;;  %v1108_v15 = vld [vmem:[%s11470_s29 + $0x28] sm:$0xff]  ;;  %s12885_s11 = sld [smem:[#allocation47_spill]]  ;;  %s12887_s16 = sld [smem:[#allocation50_spill]] }
 0x1cd   : > { %v1132_v13 = vpack.c.bf16 %v1106_v10, %v1105_v9  ;;  %8790 = vmatpush3.bf16.msra.mxu1 %v1233_v16  ;;  %v1133_v17 = vpack.c.bf16 %v1108_v15, %v1107_v14  ;;  %v1109_v18 = vld [vmem:[%s11470_s29 + $0x30] sm:$0xff]  ;;  %v1110_v19 = vld [vmem:[%s11470_s29 + $0x38] sm:$0xff]  ;;  %v1111_v20 = vld [vmem:[%s11470_s29 + $0x40] sm:$0xff]  ;;  %s12891_s9 = sld [smem:[#allocation55_spill]]  ;;  %p12893_p4 = scmp.ne.s32.totalorder %s12852_s28, 0 }
 0x1ce   : > { %8791 = vmatprep.mubr.msk.bf16.mxu1 %vm1182_vm1, %v1131_v8  ;;  %7774 = vmatmul.mubr.msk.bf16.vlgmr.msra.gmra.mrb[0].mxu0 %vm1182_vm1, %v1131_v8  ;;  %v1112_v21 = vld [vmem:[%s11470_s29 + $0x48] sm:$0xff]  ;;  %v1134_v22 = vpack.c.bf16 %v1110_v19, %v1109_v18  ;;  %v1113_v24 = vld [vmem:[%s11470_s29 + $0x50] sm:$0xff]  ;;  %v1114_v25 = vld [vmem:[%s11470_s29 + $0x58] sm:$0xff]  ;;  %s11018_s6 = smov [#allocation26]  }
 0x1cf   : > { %1277 = vmatprep.mubr.bf16.mxu0 %v11014_v0  ;;  %2070 = vmatprep.subr.bf16.mxu1 %v11014_v0  ;;  %v1135_v23 = vpack.c.bf16 %v1112_v21, %v1111_v20  ;;  %v1115_v26 = vld [vmem:[%s11470_s29 + $0x60] sm:$0xff]  ;;  %v1116_v27 = vld [vmem:[%s11470_s29 + $0x68] sm:$0xff]  ;;  %v1136_v28 = vpack.c.bf16 %v1114_v25, %v1113_v24  ;;  %v1117_v30 = vld [vmem:[%s11470_s29 + $0x70] sm:$0xff]  ;;  %s10872_s8 = sshll.u32 %s11018_s6, 4  ;;  %s10873_s8 = int_to_ptr.vmem [resolvable:$false] %s10872_s8 }
 0x1d0   : > { %8792 = vmatmul.mubr.msk.bf16.vlgmr.msra.gmra.mrb[0].mxu1 %vm1182_vm1, %v1132_v13  ;;  %v1137_v29 = vpack.c.bf16 %v1116_v27, %v1115_v26  ;;  %v1118_v31 = vld [vmem:[%s11470_s29 + $0x78] sm:$0xff]  ;;  %v1119_v32 = vld [vmem:[%s11470_s29 + $0x80] sm:$0xff]  ;;  %v1120_v33 = vld [vmem:[%s11470_s29 + $0x88] sm:$0xff]  ;;  %s12882_s14 = smov %s12881_s7 }
 0x1d1   : > { %8795 = vmatprep.mubr.msk.bf16.mxu1 %vm1182_vm1, %v1133_v17  ;;  %v1138_v34 = vpack.c.bf16 %v1118_v31, %v1117_v30  ;;  %v1139_v35 = vpack.c.bf16 %v1120_v33, %v1119_v32  ;;  %v1121_v36 = vld [vmem:[%s11470_s29 + $0x90] sm:$0xff]  ;;  %v1122_v37 = vld [vmem:[%s11470_s29 + $0x98] sm:$0xff]  ;;  %v1123_v38 = vld [vmem:[%s11470_s29 + $0xa0] sm:$0xff] }
 0x1d2   : > { %v1124_v39 = vld [vmem:[%s11470_s29 + $0xa8] sm:$0xff]  ;;  %v1140_v40 = vpack.c.bf16 %v1122_v37, %v1121_v36  ;;  %v1125_v42 = vld [vmem:[%s11470_s29 + $0xb0] sm:$0xff]  ;;  %v1126_v43 = vld [vmem:[%s11470_s29 + $0xb8] sm:$0xff]  ;;  %s12886_s2 = smov %s12885_s11 }
 0x1d3   : > { %v1141_v41 = vpack.c.bf16 %v1124_v39, %v1123_v38  ;;  %v1127_v44 = vld [vmem:[%s11470_s29 + $0xc0] sm:$0xff]  ;;  %v1128_v45 = vld [vmem:[%s11470_s29 + $0xc8] sm:$0xff]  ;;  %v1142_v46 = vpack.c.bf16 %v1126_v43, %v1125_v42  ;;  %v1129_v48 = vld [vmem:[%s11470_s29 + $0xd0] sm:$0xff] }
 0x1d4   : > { %v1143_v47 = vpack.c.bf16 %v1128_v45, %v1127_v44  ;;  %v1130_v49 = vld [vmem:[%s11470_s29 + $0xd8] sm:$0xff]  ;;  %s12888_s29 = sld [smem:[#allocation52_spill]] }
 0x1d5   : > { %v1144_v50 = vpack.c.bf16 %v1130_v49, %v1129_v48  ;;  %v10054_v51 = vld [vmem:[%s12878_s17 + $0x74] ss:$8 sps:$4 sm:$0xff]  }
 0x1d6   : > { %7775 = vmatmul.mubr.msk.bf16.gmra.mrb[4].mxu0 %vm1182_vm1, %v1132_v13 }
 0x1d7   : > { %1287 = vmatprep.mubr.bf16.mxu0 %v11014_v0 }
 0x1d8   : > { %8796 = vmatmul.mubr.msk.bf16.gmra.mrb[4].mxu1 %vm1182_vm1, %v1134_v22 }
 0x1d9   : > { %8799 = vmatprep.mubr.msk.bf16.mxu1 %vm1182_vm1, %v1135_v23 }
 0x1de   : > { %7776 = vmatmul.mubr.msk.bf16.gmra.mrb[8].mxu0 %vm1182_vm1, %v1133_v17 }
 0x1df   : > { %1297 = vmatprep.mubr.bf16.mxu0 %v11014_v0 }
 0x1e0   : > { %8800 = vmatmul.mubr.msk.bf16.gmra.mrb[8].mxu1 %vm1182_vm1, %v1136_v28 }
 0x1e1   : > { %8803 = vmatprep.mubr.msk.bf16.mxu1 %vm1182_vm1, %v1137_v29 }
 0x1e6   : > { %7777 = vmatmul.mubr.msk.bf16.gmra.mrb[12].mxu0 %vm1182_vm1, %v1134_v22 }
 0x1e7   : > { %1307 = vmatprep.mubr.bf16.mxu0 %v11014_v0 }
 0x1e8   : > { %8804 = vmatmul.mubr.msk.bf16.gmra.mrb[12].mxu1 %vm1182_vm1, %v1138_v34 }
 0x1e9   : > { %8807 = vmatprep.mubr.msk.bf16.mxu1 %vm1182_vm1, %v1139_v35 }
 0x1ee   : > { %7778 = vmatmul.mubr.msk.bf16.gmra.mrb[16].mxu0 %vm1182_vm1, %v1135_v23 }
 0x1ef   : > { %1317 = vmatprep.mubr.bf16.mxu0 %v11014_v0 }
 0x1f0   : > { %8808 = vmatmul.mubr.msk.bf16.gmra.mrb[16].mxu1 %vm1182_vm1, %v1140_v40 }
 0x1f1   : > { %8811 = vmatprep.mubr.msk.bf16.mxu1 %vm1182_vm1, %v1141_v41 }
 0x1f6   : > { %7779 = vmatmul.mubr.msk.bf16.gmra.mrb[20].mxu0 %vm1182_vm1, %v1136_v28 }
 0x1f7   : > { %1327 = vmatprep.mubr.bf16.mxu0 %v11014_v0 }
 0x1f8   : > { %8812 = vmatmul.mubr.msk.bf16.gmra.mrb[20].mxu1 %vm1182_vm1, %v1142_v46 }
 0x1f9   : > { %8815 = vmatprep.mubr.msk.bf16.mxu1 %vm1182_vm1, %v1143_v47 }
 0x1fe   : > { %7780 = vmatmul.mubr.msk.bf16.gmra.mrb[24].mxu0 %vm1182_vm1, %v1137_v29 }
 0x1ff   : > { %1337 = vmatprep.mubr.bf16.mxu0 %v11014_v0 }
 0x200   : > { %8816 = vmatmul.mubr.msk.bf16.gmra.mrb[24].mxu1 %vm1182_vm1, %v1144_v50 }
 0x206   : > { %7781 = vmatmul.mubr.msk.bf16.gmra.mrb[28].mxu0 %vm1182_vm1, %v1138_v34 }
 0x207   : > { %1347 = vmatprep.mubr.bf16.mxu0 %v11014_v0 }
 0x20e   : > { %7782 = vmatmul.mubr.msk.bf16.gmra.mrb[32].mxu0 %vm1182_vm1, %v1139_v35 }
 0x20f   : > { %1357 = vmatprep.mubr.bf16.mxu0 %v11014_v0 }
 0x216   : > { %7783 = vmatmul.mubr.msk.bf16.gmra.mrb[36].mxu0 %vm1182_vm1, %v1140_v40  ;;  %v10075_v40 = vld [vmem:[%s12878_s17 + $0xe4] ss:$8 sps:$4 sm:$0xff]  }
 0x217   : > { %1367 = vmatprep.mubr.bf16.mxu0 %v11014_v0  ;;  %7886 = vmatprep.mubr.msk.bf16.mxu1 %vm1687_vm2, %v10075_v40 }
 0x21e   : > { %7784 = vmatmul.mubr.msk.bf16.gmra.mrb[40].mxu0 %vm1182_vm1, %v1141_v41 }
 0x21f   : > { %1377 = vmatprep.mubr.bf16.mxu0 %v11014_v0 }
 0x226   : > { %7785 = vmatmul.mubr.msk.bf16.gmra.mrb[44].mxu0 %vm1182_vm1, %v1142_v46 }
 0x227   : > { %1387 = vmatprep.mubr.bf16.mxu0 %v11014_v0 }
 0x22e   : > { %7786 = vmatmul.mubr.msk.bf16.gmra.mrb[48].mxu0 %vm1182_vm1, %v1143_v47 }
 0x22f   : > { %1397 = vmatprep.mubr.bf16.mxu0 %v11014_v0 }
 0x236   : > { %7787 = vmatmul.mubr.msk.bf16.gmra.mrb[52].mxu0 %vm1182_vm1, %v1144_v50 }
 0x237   : > { %7830 = vmatprep.mubr.msk.bf16.mxu0 %vm1687_vm2, %v10054_v51 }
 0x2a1   : > { %v11549_v52 = vpop.f32.mrb[0].mxu0 }
 0x2a2   : > { %v1271_v53 = vpop.f32.mrb[1].mxu0 }
 0x2a3   : > { %v11551_v54 = vpop.f32.mrb[2].mxu0  ;;  %v8793_v63 = vpop.f32.mrb[0].mxu1 }
 0x2a4   : > { %v1553_v55 = vpack.c.bf16 %v11551_v54, %v11549_v52  ;;  %v1275_v56 = vpop.f32.mrb[3].mxu0  ;;  %v1442_v2 = vpop.f32.mrb[1].mxu1  ;;  %v10060_v52 = vld [vmem:[%s12878_s17 + $0x90] ss:$8 sps:$4 sm:$0xff]   ;;  %v10061_v54 = vld [vmem:[%s12878_s17 + $0xa4] ss:$8 sps:$4 sm:$0xff]  }
 0x2a5   : > { %v1554_v57 = vpack.c.bf16 %v1275_v56, %v1271_v53  ;;  %v8794_v3 = vpop.f32.mrb[2].mxu1 }
 0x2a6   : > { %v1558_v4 = vpack.c.bf16 %v8794_v3, %v8793_v63  ;;  %v1445_v5 = vpop.f32.mrb[3].mxu1 }
 0x2a7   : > { %1710 = vmatpush1.bf16.msra.mxu0 %v1554_v57  ;;  %v1555_v6 = vpack.c.bf16 %v1445_v5, %v1442_v2 }
 0x2a8   : > { %1711 = vmatprep.subr.bf16.mxu0 %v11014_v0 }
 0x2a9   : > { %v11556_v58 = vpop.f32.mrb[4].mxu0  ;;  %2071 = vmatpush1.bf16.msra.mxu1 %v1555_v6 }
 0x2aa   : > { %v1281_v59 = vpop.f32.mrb[5].mxu0  ;;  %2072 = vmatprep.subr.bf16.mxu1 %v11014_v0 }
 0x2ab   : > { %v11558_v60 = vpop.f32.mrb[6].mxu0  ;;  %v8797_v12 = vpop.f32.mrb[4].mxu1 }
 0x2ac   : > { %v1556_v61 = vpack.c.bf16 %v11558_v60, %v11556_v58  ;;  %v1285_v62 = vpop.f32.mrb[7].mxu0  ;;  %v1458_v14 = vpop.f32.mrb[5].mxu1  ;;  %v10064_v58 = vld [vmem:[%s12878_s17 + $0xb4] ss:$8 sps:$4 sm:$0xff]   ;;  %v10066_v60 = vld [vmem:[%s12878_s17 + $0xb0] ss:$8 sps:$4 sm:$0xff]  }
 0x2ad   : > { %v1557_v1 = vpack.c.bf16 %v1285_v62, %v1281_v59  ;;  %v8798_v15 = vpop.f32.mrb[6].mxu1  ;;  %2073 = vmatpush1.bf16.msra.mxu1 %v1558_v4 }
 0x2ae   : > { %v1564_v16 = vpack.c.bf16 %v8798_v15, %v8797_v12  ;;  %v1461_v17 = vpop.f32.mrb[7].mxu1  ;;  %2074 = vmatprep.subr.bf16.mxu1 %v11014_v0 }
 0x2af   : > { %1712 = vmatpush1.bf16.msra.mxu0 %v1557_v1  ;;  %v1561_v18 = vpack.c.bf16 %v1461_v17, %v1458_v14 }
 0x2b0   : > { %1713 = vmatprep.subr.bf16.mxu0 %v11014_v0 }
 0x2b1   : > { %v11563_v7 = vpop.f32.mrb[8].mxu0  ;;  %2075 = vmatpush1.bf16.msra.mxu1 %v1561_v18 }
 0x2b2   : > { %v1291_v8 = vpop.f32.mrb[9].mxu0  ;;  %2076 = vmatprep.subr.bf16.mxu1 %v11014_v0 }
 0x2b3   : > { %v11565_v9 = vpop.f32.mrb[10].mxu0  ;;  %v8801_v24 = vpop.f32.mrb[8].mxu1 }
 0x2b4   : > { %v1559_v10 = vpack.c.bf16 %v11565_v9, %v11563_v7  ;;  %v1295_v11 = vpop.f32.mrb[11].mxu0  ;;  %v1474_v26 = vpop.f32.mrb[9].mxu1  ;;  %v10069_v7 = vld [vmem:[%s12878_s17 + $0xc0] ss:$8 sps:$4 sm:$0xff]   ;;  %v10070_v9 = vld [vmem:[%s12878_s17 + $0xd4] ss:$8 sps:$4 sm:$0xff]  }
 0x2b5   : > { %v1560_v13 = vpack.c.bf16 %v1295_v11, %v1291_v8  ;;  %v8802_v27 = vpop.f32.mrb[10].mxu1  ;;  %2077 = vmatpush1.bf16.msra.mxu1 %v1564_v16 }
 0x2b6   : > { %v1570_v28 = vpack.c.bf16 %v8802_v27, %v8801_v24  ;;  %v1477_v29 = vpop.f32.mrb[11].mxu1  ;;  %2078 = vmatprep.subr.bf16.mxu1 %v11014_v0 }
 0x2b7   : > { %1714 = vmatpush1.bf16.msra.mxu0 %v1560_v13  ;;  %v1567_v30 = vpack.c.bf16 %v1477_v29, %v1474_v26 }
 0x2b8   : > { %1715 = vmatprep.subr.bf16.mxu0 %v11014_v0 }
 0x2b9   : > { %v11572_v19 = vpop.f32.mrb[12].mxu0  ;;  %2079 = vmatpush1.bf16.msra.mxu1 %v1567_v30 }
 0x2ba   : > { %v1301_v20 = vpop.f32.mrb[13].mxu0  ;;  %2080 = vmatprep.subr.bf16.mxu1 %v11014_v0 }
 0x2bb   : > { %v11574_v21 = vpop.f32.mrb[14].mxu0  ;;  %v8805_v36 = vpop.f32.mrb[12].mxu1 }
 0x2bc   : > { %v1562_v22 = vpack.c.bf16 %v11574_v21, %v11572_v19  ;;  %v1305_v23 = vpop.f32.mrb[15].mxu0  ;;  %v1490_v38 = vpop.f32.mrb[13].mxu1  ;;  %v10078_v19 = vld [vmem:[%s12878_s17 + $0x4] ss:$8 sps:$4 sm:$0xff]   ;;  %v10076_v21 = vld [vmem:[%s12878_s17] ss:$8 sps:$4 sm:$0xff]  }
 0x2bd   : > { %v1563_v25 = vpack.c.bf16 %v1305_v23, %v1301_v20  ;;  %v8806_v39 = vpop.f32.mrb[14].mxu1  ;;  %2081 = vmatpush1.bf16.msra.mxu1 %v1570_v28 }
 0x2be   : > { %v1576_v41 = vpack.c.bf16 %v8806_v39, %v8805_v36  ;;  %v1493_v42 = vpop.f32.mrb[15].mxu1  ;;  %2082 = vmatprep.subr.bf16.mxu1 %v11014_v0  ;;  %v10079_v39 = vld [vmem:[%s12878_s17 + $0xf4] ss:$8 sps:$4 sm:$0xff]  }
 0x2bf   : > { %1716 = vmatpush1.bf16.msra.mxu0 %v1563_v25  ;;  %v1573_v43 = vpack.c.bf16 %v1493_v42, %v1490_v38  ;;  %v10073_v38 = vld [vmem:[%s12878_s17 + $0xe0] ss:$8 sps:$4 sm:$0xff]  }
 0x2c0   : > { %1717 = vmatprep.subr.bf16.mxu0 %v11014_v0 }
 0x2c1   : > { %v11581_v31 = vpop.f32.mrb[16].mxu0  ;;  %2083 = vmatpush1.bf16.msra.mxu1 %v1573_v43 }
 0x2c2   : > { %v1311_v32 = vpop.f32.mrb[17].mxu0  ;;  %2084 = vmatprep.subr.bf16.mxu1 %v11014_v0 }
 0x2c3   : > { %v11583_v33 = vpop.f32.mrb[18].mxu0  ;;  %v8809_v49 = vpop.f32.mrb[16].mxu1 }
 0x2c4   : > { %v1565_v34 = vpack.c.bf16 %v11583_v33, %v11581_v31  ;;  %v1315_v35 = vpop.f32.mrb[19].mxu0  ;;  %v1506_v51 = vpop.f32.mrb[17].mxu1  ;;  %v10084_v31 = vld [vmem:[%s12878_s17 + $0x10] ss:$8 sps:$4 sm:$0xff]   ;;  %v10087_v33 = vld [vmem:[%s12878_s17 + $0x24] ss:$8 sps:$4 sm:$0xff]  }
 0x2c5   : > { %v1566_v37 = vpack.c.bf16 %v1315_v35, %v1311_v32  ;;  %v8810_v53 = vpop.f32.mrb[18].mxu1  ;;  %2085 = vmatpush1.bf16.msra.mxu1 %v1576_v41 }
 0x2c6   : > { %v1582_v56 = vpack.c.bf16 %v8810_v53, %v8809_v49  ;;  %v1509_v57 = vpop.f32.mrb[19].mxu1  ;;  %2086 = vmatprep.subr.bf16.mxu1 %v11014_v0  ;;  %v10083_v49 = vld [vmem:[%s12878_s17 + $0xf0] ss:$8 sps:$4 sm:$0xff]  }
 0x2c7   : > { %1718 = vmatpush1.bf16.msra.mxu0 %v1566_v37  ;;  %v1579_v59 = vpack.c.bf16 %v1509_v57, %v1506_v51 }
 0x2c8   : > { %1719 = vmatprep.subr.bf16.mxu0 %v11014_v0 }
 0x2c9   : > { %v11592_v44 = vpop.f32.mrb[20].mxu0  ;;  %2087 = vmatpush1.bf16.msra.mxu1 %v1579_v59 }
 0x2ca   : > { %v1321_v45 = vpop.f32.mrb[21].mxu0  ;;  %2088 = vmatprep.subr.bf16.mxu1 %v11014_v0 }
 0x2cb   : > { %v11594_v46 = vpop.f32.mrb[22].mxu0  ;;  %v8813_v4 = vpop.f32.mrb[20].mxu1 }
 0x2cc   : > { %v1568_v47 = vpack.c.bf16 %v11594_v46, %v11592_v44  ;;  %v1325_v48 = vpop.f32.mrb[23].mxu0  ;;  %v1522_v6 = vpop.f32.mrb[21].mxu1  ;;  %v10093_v44 = vld [vmem:[%s12878_s17 + $0x34] ss:$8 sps:$4 sm:$0xff]   ;;  %v10096_v46 = vld [vmem:[%s12878_s17 + $0x30] ss:$8 sps:$4 sm:$0xff]  }
 0x2cd   : > { %v1569_v50 = vpack.c.bf16 %v1325_v48, %v1321_v45  ;;  %v8814_v8 = vpop.f32.mrb[22].mxu1  ;;  %2089 = vmatpush1.bf16.msra.mxu1 %v1582_v56 }
 0x2ce   : > { %v1588_v11 = vpack.c.bf16 %v8814_v8, %v8813_v4  ;;  %v1525_v12 = vpop.f32.mrb[23].mxu1  ;;  %2090 = vmatprep.subr.bf16.mxu1 %v11014_v0  ;;  %v10091_v4 = vld [vmem:[%s12878_s17 + $0x114] ss:$8 sps:$4 sm:$0xff]  }
 0x2cf   : > { %1720 = vmatpush1.bf16.msra.mxu0 %v1569_v50  ;;  %v1585_v13 = vpack.c.bf16 %v1525_v12, %v1522_v6  ;;  %v10085_v50 = vld [vmem:[%s12878_s17 + $0x104] ss:$8 sps:$4 sm:$0xff]  }
 0x2d0   : > { %1721 = vmatprep.subr.bf16.mxu0 %v11014_v0 }
 0x2d1   : > { %v11601_v62 = vpop.f32.mrb[24].mxu0  ;;  %2091 = vmatpush1.bf16.msra.mxu1 %v1585_v13 }
 0x2d2   : > { %v1331_v63 = vpop.f32.mrb[25].mxu0  ;;  %2092 = vmatprep.subr.bf16.mxu1 %v11014_v0 }
 0x2d3   : > { %v11603_v1 = vpop.f32.mrb[26].mxu0  ;;  %v8817_v20 = vpop.f32.mrb[24].mxu1 }
 0x2d4   : > { %v1571_v2 = vpack.c.bf16 %v11603_v1, %v11601_v62  ;;  %v1335_v3 = vpop.f32.mrb[27].mxu0  ;;  %v1538_v24 = vpop.f32.mrb[25].mxu1  ;;  %v10102_v62 = vld [vmem:[%s12878_s17 + $0x40] ss:$8 sps:$4 sm:$0xff]   ;;  %v10105_v1 = vld [vmem:[%s12878_s17 + $0x54] ss:$8 sps:$4 sm:$0xff]  }
 0x2d5   : > { %v1572_v5 = vpack.c.bf16 %v1335_v3, %v1331_v63  ;;  %v8818_v25 = vpop.f32.mrb[26].mxu1  ;;  %2093 = vmatpush1.bf16.msra.mxu1 %v1588_v11  ;;  %v10089_v3 = vld [vmem:[%s12878_s17 + $0x100] ss:$8 sps:$4 sm:$0xff]  }
 0x2d6   : > { %v1594_v26 = vpack.c.bf16 %v8818_v25, %v8817_v20  ;;  %v1541_v27 = vpop.f32.mrb[27].mxu1  ;;  %2094 = vmatprep.subr.bf16.mxu1 %v11014_v0 }
 0x2d7   : > { %1722 = vmatpush1.bf16.msra.mxu0 %v1572_v5  ;;  %v1591_v28 = vpack.c.bf16 %v1541_v27, %v1538_v24 }
 0x2d8   : > { %1723 = vmatprep.subr.bf16.mxu0 %v11014_v0 }
 0x2d9   : > { %v11610_v14 = vpop.f32.mrb[28].mxu0  ;;  %2095 = vmatpush1.bf16.msra.mxu1 %v1591_v28  ;;  %v10101_v28 = vld [vmem:[%s12878_s17 + $0x120] ss:$8 sps:$4 sm:$0xff]  }
 0x2da   : > { %v1341_v15 = vpop.f32.mrb[29].mxu0  ;;  %2096 = vmatprep.subr.bf16.mxu1 %v11014_v0 }
 0x2db   : > { %v11612_v16 = vpop.f32.mrb[30].mxu0 }
 0x2dc   : > { %v1574_v17 = vpack.c.bf16 %v11612_v16, %v11610_v14  ;;  %v1345_v18 = vpop.f32.mrb[31].mxu0  ;;  %v10111_v14 = vld [vmem:[%s12878_s17 + $0x64] ss:$8 sps:$4 sm:$0xff]   ;;  %v10114_v16 = vld [vmem:[%s12878_s17 + $0x60] ss:$8 sps:$4 sm:$0xff]  }
 0x2dd   : > { %v1575_v23 = vpack.c.bf16 %v1345_v18, %v1341_v15  ;;  %2097 = vmatpush1.bf16.msra.mxu1 %v1594_v26  ;;  %v10095_v15 = vld [vmem:[%s12878_s17 + $0x110] ss:$8 sps:$4 sm:$0xff]   ;;  %v10097_v18 = vld [vmem:[%s12878_s17 + $0x124] ss:$8 sps:$4 sm:$0xff]  }
 0x2df   : > { %1724 = vmatpush1.bf16.msra.mxu0 %v1575_v23 }
 0x2e0   : > { %1725 = vmatprep.subr.bf16.mxu0 %v11014_v0  ;;  %2103 = vmatmul.mubr.bf16.vlgmr.msra.gmra.mrb[28].mxu1 %v10073_v38 }
 0x2e1   : > { %v11619_v29 = vpop.f32.mrb[32].mxu0  ;;  %7887 = vmatprep.mubr.msk.bf16.mxu1 %vm1687_vm2, %v10079_v39 }
 0x2e2   : > { %v1351_v30 = vpop.f32.mrb[33].mxu0 }
 0x2e3   : > { %v11621_v32 = vpop.f32.mrb[34].mxu0 }
 0x2e4   : > { %v1577_v35 = vpack.c.bf16 %v11621_v32, %v11619_v29  ;;  %v1355_v36 = vpop.f32.mrb[35].mxu0  ;;  %v10117_v29 = vld [vmem:[%s12879_s26 + $0x4] ss:$12 sps:$4 sm:$0xff]  }
 0x2e5   : > { %v1578_v37 = vpack.c.bf16 %v1355_v36, %v1351_v30  ;;  %v10103_v30 = vld [vmem:[%s12878_s17 + $0x134] ss:$8 sps:$4 sm:$0xff]   ;;  %v10118_v32 = vld [vmem:[%s12879_s26 + $0x18] ss:$12 sps:$4 sm:$0xff]  }
 0x2e7   : > { %1726 = vmatpush1.bf16.msra.mxu0 %v1578_v37 }
 0x2e8   : > { %1727 = vmatprep.subr.bf16.mxu0 %v11014_v0  ;;  %2111 = vmatmul.mubr.bf16.gmra.mrb[32].mxu1 %v10083_v49  ;;  %v10052_v49 = vld [vmem:[%s12878_s17 + $0x70] ss:$8 sps:$4 sm:$0xff]  }
 0x2e9   : > { %v11629_v40 = vpop.f32.mrb[36].mxu0  ;;  %7888 = vmatprep.mubr.msk.bf16.mxu1 %vm1687_vm2, %v10085_v50  ;;  %v10109_v50 = vld [vmem:[%s12878_s17 + $0x144] ss:$8 sps:$4 sm:$0xff]  }
 0x2ea   : > { %v1361_v41 = vpop.f32.mrb[37].mxu0 }
 0x2eb   : > { %v11632_v42 = vpop.f32.mrb[38].mxu0 }
 0x2ec   : > { %v1580_v43 = vpack.c.bf16 %v11632_v42, %v11629_v40  ;;  %v1365_v45 = vpop.f32.mrb[39].mxu0  ;;  %v10121_v40 = vld [vmem:[%s12879_s26 + $0x30] ss:$12 sps:$4 sm:$0xff]   ;;  %v10123_v42 = vld [vmem:[%s12879_s26 + $0x34] ss:$12 sps:$4 sm:$0xff]  }
 0x2ed   : > { %v1581_v48 = vpack.c.bf16 %v1365_v45, %v1361_v41 }
 0x2ef   : > { %1728 = vmatpush1.bf16.msra.mxu0 %v1581_v48  ;;  %v10107_v48 = vld [vmem:[%s12878_s17 + $0x130] ss:$8 sps:$4 sm:$0xff]  }
 0x2f0   : > { %1729 = vmatprep.subr.bf16.mxu0 %v11014_v0  ;;  %2119 = vmatmul.mubr.bf16.gmra.mrb[36].mxu1 %v10089_v3  ;;  %v10058_v3 = vld [vmem:[%s12878_s17 + $0x94] ss:$8 sps:$4 sm:$0xff]  }
 0x2f1   : > { %v11639_v51 = vpop.f32.mrb[40].mxu0  ;;  %7889 = vmatprep.mubr.msk.bf16.mxu1 %vm1687_vm2, %v10091_v4  ;;  %v10128_v4 = vld [vmem:[%s12879_s26 + $0x20] ss:$12 sps:$4 sm:$0xff]  }
 0x2f2   : > { %v1371_v53 = vpop.f32.mrb[41].mxu0 }
 0x2f3   : > { %v11642_v56 = vpop.f32.mrb[42].mxu0 }
 0x2f4   : > { %v1583_v57 = vpack.c.bf16 %v11642_v56, %v11639_v51  ;;  %v1375_v59 = vpop.f32.mrb[43].mxu0  ;;  %v11015_v51 = vmov 0.0   ;;  %v10124_v56 = vld [vmem:[%s12879_s26 + $0x48] ss:$12 sps:$4 sm:$0xff]  }
 0x2f5   : > { %v1584_v63 = vpack.c.bf16 %v1375_v59, %v1371_v53  ;;  %v10055_v53 = vld [vmem:[%s12878_s17 + $0x84] ss:$8 sps:$4 sm:$0xff]   ;;  %v10113_v59 = vld [vmem:[%s12878_s17 + $0x140] ss:$8 sps:$4 sm:$0xff]   ;;  %8819 = vmatprep.subr.bf16.mxu1 %v11015_v51 }
 0x2f7   : > { %1730 = vmatpush1.bf16.msra.mxu0 %v1584_v63  ;;  %v10057_v63 = vld [vmem:[%s12878_s17 + $0x80] ss:$8 sps:$4 sm:$0xff]  }
 0x2f8   : > { %1731 = vmatprep.subr.bf16.mxu0 %v11014_v0  ;;  %2127 = vmatmul.mubr.bf16.gmra.mrb[40].mxu1 %v10095_v15  ;;  %v10134_v15 = vld [vmem:[%s12879_s26 + $0x78] ss:$12 sps:$4 sm:$0xff]  }
 0x2f9   : > { %v11649_v5 = vpop.f32.mrb[44].mxu0  ;;  %7890 = vmatprep.mubr.msk.bf16.mxu1 %vm1687_vm2, %v10097_v18  ;;  %v10138_v18 = vld [vmem:[%s12879_s26 + $0x80] ss:$12 sps:$4 sm:$0xff]  }
 0x2fa   : > { %v1381_v6 = vpop.f32.mrb[45].mxu0 }
 0x2fb   : > { %v11652_v8 = vpop.f32.mrb[46].mxu0 }
 0x2fc   : > { %v1586_v11 = vpack.c.bf16 %v11652_v8, %v11649_v5  ;;  %v1385_v12 = vpop.f32.mrb[47].mxu0  ;;  %v10132_v5 = vld [vmem:[%s12879_s26 + $0x38] ss:$12 sps:$4 sm:$0xff]  }
 0x2fd   : > { %v1587_v13 = vpack.c.bf16 %v1385_v12, %v1381_v6  ;;  %v10129_v6 = vld [vmem:[%s12879_s26 + $0x60] ss:$12 sps:$4 sm:$0xff]   ;;  %v10131_v8 = vld [vmem:[%s12879_s26 + $0x64] ss:$12 sps:$4 sm:$0xff]   ;;  %v10137_v12 = vld [vmem:[%s12879_s26 + $0x68] ss:$12 sps:$4 sm:$0xff]  }
 0x2ff   : > { %1732 = vmatpush1.bf16.msra.mxu0 %v1587_v13  ;;  %v10136_v13 = vld [vmem:[%s12879_s26 + $0x7c] ss:$12 sps:$4 sm:$0xff]  }
 0x300   : > { %1733 = vmatprep.subr.bf16.mxu0 %v11014_v0  ;;  %2135 = vmatmul.mubr.bf16.gmra.mrb[44].mxu1 %v10101_v28 }
 0x301   : > { %v11659_v20 = vpop.f32.mrb[48].mxu0  ;;  %7891 = vmatprep.mubr.msk.bf16.mxu1 %vm1687_vm2, %v10103_v30 }
 0x302   : > { %v1391_v23 = vpop.f32.mrb[49].mxu0 }
 0x303   : > { %v11662_v24 = vpop.f32.mrb[50].mxu0 }
 0x304   : > { %v1589_v25 = vpack.c.bf16 %v11662_v24, %v11659_v20  ;;  %v1395_v26 = vpop.f32.mrb[51].mxu0  ;;  %v10141_v20 = vld [vmem:[%s12879_s26 + $0x94] ss:$12 sps:$4 sm:$0xff]   ;;  %v10142_v24 = vld [vmem:[%s12879_s26 + $0x98] ss:$12 sps:$4 sm:$0xff]  }
 0x305   : > { %v1590_v27 = vpack.c.bf16 %v1395_v26, %v1391_v23  ;;  %v10139_v23 = vld [vmem:[%s12879_s26 + $0x90] ss:$12 sps:$4 sm:$0xff]  }
 0x307   : > { %1734 = vmatpush1.bf16.msra.mxu0 %v1590_v27 }
 0x308   : > { %1735 = vmatprep.subr.bf16.mxu0 %v11014_v0  ;;  %2143 = vmatmul.mubr.bf16.gmra.mrb[48].mxu1 %v10107_v48 }
 0x309   : > { %v11669_v36 = vpop.f32.mrb[52].mxu0  ;;  %7892 = vmatprep.mubr.msk.bf16.mxu1 %vm1687_vm2, %v10109_v50 }
 0x30a   : > { %v1401_v37 = vpop.f32.mrb[53].mxu0 }
 0x30b   : > { %v11672_v38 = vpop.f32.mrb[54].mxu0 }
 0x30c   : > { %v1592_v39 = vpack.c.bf16 %v11672_v38, %v11669_v36  ;;  %v1405_v41 = vpop.f32.mrb[55].mxu0 }
 0x30d   : > { %v1593_v45 = vpack.c.bf16 %v1405_v41, %v1401_v37 }
 0x30f   : > { %1736 = vmatpush1.bf16.msra.mxu0 %v1593_v45 }
 0x310   : > { %1882 = vmatprep.subr.bf16.mxu0 %v11014_v0  ;;  %2151 = vmatmul.mubr.bf16.gmra.mrb[52].mxu1 %v10113_v59 }
 0x311   : > { %8833 = vmatprep.mubr.msk.bf16.mxu1 %vm11016_vm3, %v11015_v51 }
 0x312   : > { %1742 = vmatmul.mubr.bf16.vlgmr.msra.gmra.mrb[56].mxu0 %v10052_v49 }
 0x313   : > { %1883 = vmatpush1.bf16.msra.mxu0 %v1553_v55  ;;  %7831 = vmatprep.mubr.msk.bf16.mxu0 %vm1687_vm2, %v10055_v53  ;;  %v10063_v55 = vld [vmem:[%s12878_s17 + $0xa0] ss:$8 sps:$4 sm:$0xff]  }
 0x314   : > { %1884 = vmatprep.subr.bf16.mxu0 %v11014_v0 }
 0x317   : > { %1885 = vmatpush1.bf16.msra.mxu0 %v1556_v61  ;;  %v10067_v61 = vld [vmem:[%s12878_s17 + $0xc4] ss:$8 sps:$4 sm:$0xff]  }
 0x318   : > { %1886 = vmatprep.subr.bf16.mxu0 %v11014_v0 }
 0x31a   : > { %1750 = vmatmul.mubr.bf16.gmra.mrb[60].mxu0 %v10057_v63 }
 0x31b   : > { %1887 = vmatpush1.bf16.msra.mxu0 %v1559_v10  ;;  %7832 = vmatprep.mubr.msk.bf16.mxu0 %vm1687_vm2, %v10058_v3  ;;  %v10072_v10 = vld [vmem:[%s12878_s17 + $0xd0] ss:$8 sps:$4 sm:$0xff]  }
 0x31c   : > { %1888 = vmatprep.subr.bf16.mxu0 %v11014_v0 }
 0x31f   : > { %1889 = vmatpush1.bf16.msra.mxu0 %v1562_v22  ;;  %v10081_v22 = vld [vmem:[%s12878_s17 + $0x14] ss:$8 sps:$4 sm:$0xff]  }
 0x320   : > { %1890 = vmatprep.subr.bf16.mxu0 %v11014_v0 }
 0x322   : > { %1758 = vmatmul.mubr.bf16.gmra.mrb[64].mxu0 %v10060_v52 }
 0x323   : > { %1891 = vmatpush1.bf16.msra.mxu0 %v1565_v34  ;;  %7833 = vmatprep.mubr.msk.bf16.mxu0 %vm1687_vm2, %v10061_v54  ;;  %v10090_v34 = vld [vmem:[%s12878_s17 + $0x20] ss:$8 sps:$4 sm:$0xff]  }
 0x324   : > { %1892 = vmatprep.subr.bf16.mxu0 %v11014_v0 }
 0x327   : > { %1893 = vmatpush1.bf16.msra.mxu0 %v1568_v47  ;;  %v10099_v47 = vld [vmem:[%s12878_s17 + $0x44] ss:$8 sps:$4 sm:$0xff]  }
 0x328   : > { %1894 = vmatprep.subr.bf16.mxu0 %v11014_v0 }
 0x32a   : > { %1766 = vmatmul.mubr.bf16.gmra.mrb[68].mxu0 %v10063_v55 }
 0x32b   : > { %1895 = vmatpush1.bf16.msra.mxu0 %v1571_v2  ;;  %7834 = vmatprep.mubr.msk.bf16.mxu0 %vm1687_vm2, %v10064_v58  ;;  %v10108_v2 = vld [vmem:[%s12878_s17 + $0x50] ss:$8 sps:$4 sm:$0xff]  }
 0x32c   : > { %1896 = vmatprep.subr.bf16.mxu0 %v11014_v0 }
 0x32f   : > { %1897 = vmatpush1.bf16.msra.mxu0 %v1574_v17  ;;  %v10115_v17 = vld [vmem:[%s12879_s26] ss:$12 sps:$4 sm:$0xff]  }
 0x330   : > { %1898 = vmatprep.subr.bf16.mxu0 %v11014_v0 }
 0x332   : > { %1774 = vmatmul.mubr.bf16.gmra.mrb[72].mxu0 %v10066_v60 }
 0x333   : > { %1899 = vmatpush1.bf16.msra.mxu0 %v1577_v35  ;;  %7835 = vmatprep.mubr.msk.bf16.mxu0 %vm1687_vm2, %v10067_v61  ;;  %v10120_v35 = vld [vmem:[%s12879_s26 + $0x1c] ss:$12 sps:$4 sm:$0xff]  }
 0x334   : > { %1900 = vmatprep.subr.bf16.mxu0 %v11014_v0 }
 0x337   : > { %1901 = vmatpush1.bf16.msra.mxu0 %v1580_v43  ;;  %v10127_v43 = vld [vmem:[%s12879_s26 + $0x8] ss:$12 sps:$4 sm:$0xff]  }
 0x338   : > { %1902 = vmatprep.subr.bf16.mxu0 %v11014_v0  ;;  %8820 = vmatpush3.bf16.msra.mxu1 %v10127_v43 }
 0x339   : > { %8821 = vmatprep.subr.bf16.mxu1 %v11015_v51 }
 0x33a   : > { %1782 = vmatmul.mubr.bf16.gmra.mrb[76].mxu0 %v10069_v7 }
 0x33b   : > { %1903 = vmatpush1.bf16.msra.mxu0 %v1583_v57  ;;  %7836 = vmatprep.mubr.msk.bf16.mxu0 %vm1687_vm2, %v10070_v9  ;;  %v10126_v57 = vld [vmem:[%s12879_s26 + $0x4c] ss:$12 sps:$4 sm:$0xff]  }
 0x33c   : > { %1904 = vmatprep.subr.bf16.mxu0 %v11014_v0  ;;  %8822 = vmatpush3.bf16.msra.mxu1 %v10128_v4 }
 0x33d   : > { %8823 = vmatprep.subr.bf16.mxu1 %v11015_v51 }
 0x33f   : > { %1905 = vmatpush1.bf16.msra.mxu0 %v1586_v11  ;;  %v10133_v11 = vld [vmem:[%s12879_s26 + $0x50] ss:$12 sps:$4 sm:$0xff]  }
 0x340   : > { %1906 = vmatprep.subr.bf16.mxu0 %v11014_v0  ;;  %8824 = vmatpush3.bf16.msra.mxu1 %v10132_v5 }
 0x341   : > { %8825 = vmatprep.subr.bf16.mxu1 %v11015_v51 }
 0x342   : > { %1790 = vmatmul.mubr.bf16.gmra.mrb[80].mxu0 %v10072_v10 }
 0x343   : > { %1907 = vmatpush1.bf16.msra.mxu0 %v1589_v25  ;;  %7851 = vmatprep.mubr.msk.bf16.mxu0 %vm1687_vm2, %v10078_v19 }
 0x344   : > { %1908 = vmatprep.subr.bf16.mxu0 %v11014_v0  ;;  %8826 = vmatpush3.bf16.msra.mxu1 %v10133_v11 }
 0x345   : > { %8827 = vmatprep.subr.bf16.mxu1 %v11015_v51 }
 0x347   : > { %1909 = vmatpush1.bf16.msra.mxu0 %v1592_v39 }
 0x348   : > { %2377 = vmatprep.subr.bf16.mxu0 %v10117_v29  ;;  %8828 = vmatpush3.bf16.msra.mxu1 %v10137_v12 }
 0x349   : > { %8829 = vmatprep.subr.bf16.mxu1 %v11015_v51 }
 0x34a   : > { %1915 = vmatmul.mubr.bf16.vlgmr.msra.gmra.mrb[84].mxu0 %v10076_v21 }
 0x34b   : > { %7852 = vmatprep.mubr.msk.bf16.mxu0 %vm1687_vm2, %v10081_v22  ;;  %2378 = vmatpush1.bf16.msra.mxu0 %v10115_v17 }
 0x34c   : > { %2379 = vmatprep.subr.bf16.mxu0 %v10120_v35  ;;  %8830 = vmatpush3.bf16.msra.mxu1 %v10138_v18 }
 0x34d   : > { %8831 = vmatprep.subr.bf16.mxu1 %v11015_v51 }
 0x34f   : > { %2380 = vmatpush1.bf16.msra.mxu0 %v10118_v32 }
 0x350   : > { %2381 = vmatprep.subr.bf16.mxu0 %v10123_v42  ;;  %8832 = vmatpush3.bf16.msra.mxu1 %v10142_v24 }
 0x352   : > { %1923 = vmatmul.mubr.bf16.gmra.mrb[88].mxu0 %v10084_v31 }
 0x353   : > { %7853 = vmatprep.mubr.msk.bf16.mxu0 %vm1687_vm2, %v10087_v33  ;;  %2382 = vmatpush1.bf16.msra.mxu0 %v10121_v40 }
 0x354   : > { %2383 = vmatprep.subr.bf16.mxu0 %v10126_v57 }
 0x357   : > { %2384 = vmatpush1.bf16.msra.mxu0 %v10124_v56 }
 0x358   : > { %2385 = vmatprep.subr.bf16.mxu0 %v10131_v8 }
 0x35a   : > { %1931 = vmatmul.mubr.bf16.gmra.mrb[92].mxu0 %v10090_v34 }
 0x35b   : > { %7854 = vmatprep.mubr.msk.bf16.mxu0 %vm1687_vm2, %v10093_v44  ;;  %2386 = vmatpush1.bf16.msra.mxu0 %v10129_v6 }
 0x35c   : > { %2387 = vmatprep.subr.bf16.mxu0 %v10136_v13 }
 0x35f   : > { %2388 = vmatpush1.bf16.msra.mxu0 %v10134_v15 }
 0x360   : > { %2389 = vmatprep.subr.bf16.mxu0 %v10141_v20  ;;  %v11849_v20 = vld [vmem:[#allocation5] ss:$0 sm:$0xff] }
 0x362   : > { %1939 = vmatmul.mubr.bf16.gmra.mrb[96].mxu0 %v10096_v46 }
 0x363   : > { %7855 = vmatprep.mubr.msk.bf16.mxu0 %vm1687_vm2, %v10099_v47  ;;  %2390 = vmatpush1.bf16.msra.mxu0 %v10139_v23 }
 0x36a   : > { %1947 = vmatmul.mubr.bf16.gmra.mrb[100].mxu0 %v10102_v62 }
 0x36b   : > { %7856 = vmatprep.mubr.msk.bf16.mxu0 %vm1687_vm2, %v10105_v1 }
 0x372   : > { %1955 = vmatmul.mubr.bf16.gmra.mrb[104].mxu0 %v10108_v2 }
 0x373   : > { %7857 = vmatprep.mubr.msk.bf16.mxu0 %vm1687_vm2, %v10111_v14 }
 0x37a   : > { %1963 = vmatmul.mubr.bf16.gmra.mrb[108].mxu0 %v10114_v16 }
 0x37b   : > { %2409 = vmatprep.mubr.bf16.mxu0 %v11014_v0 }
 0x3b3   : > { %v2104_v25 = vpop.f32.mrb[28].mxu1 }
 0x3b4   : > { %v2106_v26 = vpop.f32.mrb[29].mxu1 }
 0x3b5   : > { %v11807_v27 = vpop.f32.mrb[30].mxu1 }
 0x3b6   : > { %v2109_v28 = vpop.f32.mrb[31].mxu1 }
 0x3bb   : > { %v11809_v30 = vpop.f32.mrb[32].mxu1 }
 0x3bc   : > { %v2114_v36 = vpop.f32.mrb[33].mxu1 }
 0x3bd   : > { %v11811_v37 = vpop.f32.mrb[34].mxu1 }
 0x3be   : > { %v2117_v38 = vpop.f32.mrb[35].mxu1 }
 0x3c3   : > { %v11813_v39 = vpop.f32.mrb[36].mxu1 }
 0x3c4   : > { %v2122_v41 = vpop.f32.mrb[37].mxu1 }
 0x3c5   : > { %v11815_v45 = vpop.f32.mrb[38].mxu1 }
 0x3c6   : > { %v2125_v48 = vpop.f32.mrb[39].mxu1 }
 0x3cb   : > { %v11817_v49 = vpop.f32.mrb[40].mxu1 }
 0x3cc   : > { %v2130_v50 = vpop.f32.mrb[41].mxu1 }
 0x3cd   : > { %v11819_v53 = vpop.f32.mrb[42].mxu1 }
 0x3ce   : > { %v2133_v59 = vpop.f32.mrb[43].mxu1 }
 0x3d3   : > { %v11821_v63 = vpop.f32.mrb[44].mxu1 }
 0x3d4   : > { %v2138_v3 = vpop.f32.mrb[45].mxu1 }
 0x3d5   : > { %v11823_v52 = vpop.f32.mrb[46].mxu1 }
 0x3d6   : > { %v2141_v54 = vpop.f32.mrb[47].mxu1 }
 0x3db   : > { %v11825_v55 = vpop.f32.mrb[48].mxu1 }
 0x3dc   : > { %v2146_v60 = vpop.f32.mrb[49].mxu1 }
 0x3dd   : > { %v11827_v7 = vpop.f32.mrb[50].mxu1 }
 0x3de   : > { %v2149_v10 = vpop.f32.mrb[51].mxu1 }
 0x3e3   : > { %v11829_v21 = vpop.f32.mrb[52].mxu1 }
 0x3e4   : > { %v2154_v31 = vpop.f32.mrb[53].mxu1 }
 0x3e5   : > { %v1743_v58 = vpop.f32.mrb[56].mxu0  ;;  %v11831_v34 = vpop.f32.mrb[54].mxu1 }
 0x3e6   : > { %v1745_v61 = vpop.f32.mrb[57].mxu0  ;;  %v2157_v46 = vpop.f32.mrb[55].mxu1 }
 0x3e7   : > { %v1746_v9 = vpop.f32.mrb[58].mxu0 }
 0x3e8   : > { %v1748_v19 = vpop.f32.mrb[59].mxu0 }
 0x3ed   : > { %v1751_v22 = vpop.f32.mrb[60].mxu0 }
 0x3ee   : > { %v1753_v33 = vpop.f32.mrb[61].mxu0 }
 0x3ef   : > { %v1754_v44 = vpop.f32.mrb[62].mxu0 }
 0x3f0   : > { %v1756_v47 = vpop.f32.mrb[63].mxu0 }
 0x3f5   : > { %v1759_v62 = vpop.f32.mrb[64].mxu0 }
 0x3f6   : > { %v1761_v1 = vpop.f32.mrb[65].mxu0 }
 0x3f7   : > { %v1762_v2 = vpop.f32.mrb[66].mxu0 }
 0x3f8   : > { %v1764_v14 = vpop.f32.mrb[67].mxu0 }
 0x3fd   : > { %v11833_v16 = vpop.f32.mrb[68].mxu0 }
 0x3fe   : > { %v1769_v17 = vpop.f32.mrb[69].mxu0 }
 0x3ff   : > { %v11835_v29 = vpop.f32.mrb[70].mxu0 }
 0x400   : > { %v1772_v32 = vpop.f32.mrb[71].mxu0 }
 0x405   : > { %v11837_v35 = vpop.f32.mrb[72].mxu0 }
 0x406   : > { %v1777_v40 = vpop.f32.mrb[73].mxu0 }
 0x407   : > { %v11839_v42 = vpop.f32.mrb[74].mxu0 }
 0x408   : > { %v1780_v43 = vpop.f32.mrb[75].mxu0 }
 0x40d   : > { %v11841_v56 = vpop.f32.mrb[76].mxu0 }
 0x40e   : > { %v1785_v57 = vpop.f32.mrb[77].mxu0 }
 0x40f   : > { %v11843_v4 = vpop.f32.mrb[78].mxu0 }
 0x410   : > { %v1788_v5 = vpop.f32.mrb[79].mxu0 }
 0x415   : > { %v11845_v6 = vpop.f32.mrb[80].mxu0 }
 0x416   : > { %v1793_v8 = vpop.f32.mrb[81].mxu0 }
 0x417   : > { %v11847_v11 = vpop.f32.mrb[82].mxu0 }
 0x418   : > { %v1796_v12 = vpop.f32.mrb[83].mxu0 }
 0x41d   : > { %v1916_v13 = vpop.f32.mrb[84].mxu0 }
 0x41e   : > { %v1917_v15 = vadd.f32 %v1916_v13, %v1743_v58  ;;  %v1918_v18 = vpop.f32.mrb[85].mxu0 }
 0x41f   : > { %v1919_v23 = vpop.f32.mrb[86].mxu0 }
 0x420   : > { %v2159_v24 = vadd.f32 %v2104_v25, %v1917_v15  ;;  %v1920_v26 = vadd.f32 %v1919_v23, %v1746_v9  ;;  %v1921_v28 = vpop.f32.mrb[87].mxu0 }
 0x422   : > { %v2180_v36 = vadd.f32 %v11849_v20, %v2159_v24  ;;  %v2160_v38 = vadd.f32 %v11807_v27, %v1920_v26 }
 0x424   : > { %v2181_v41 = vadd.f32 %v11849_v20, %v2160_v38  ;;  %v2194_v50 = vmax.f32 %v2180_v36, 0.0 }
 0x425   : > { %v1924_v48 = vpop.f32.mrb[88].mxu0 }
 0x426   : > { %v2195_v59 = vmax.f32 %v2181_v41, 0.0  ;;  %v1925_v3 = vadd.f32 %v1924_v48, %v1751_v22  ;;  %v1926_v54 = vpop.f32.mrb[89].mxu0 }
 0x427   : > { %v1927_v60 = vpop.f32.mrb[90].mxu0 }
 0x428   : > { %v2208_v58 = vpack.c.bf16 %v2195_v59, %v2194_v50  ;;  %v2161_v61 = vadd.f32 %v11809_v30, %v1925_v3  ;;  %v1928_v10 = vadd.f32 %v1927_v60, %v1754_v44  ;;  %v1929_v25 = vpop.f32.mrb[91].mxu0 }
 0x42a   : > { %v2182_v9 = vadd.f32 %v11849_v20, %v2161_v61  ;;  %v2162_v19 = vadd.f32 %v11811_v37, %v1928_v10  ;;  %7915 = vmatmul.mubr.msk.bf16.vlgmr.msra.gmra.mrb[112].mxu0 %vm2355_vm4, %v2208_v58  ;;  %8834 = vmatmul.mubr.msk.bf16.vlgmr.msra.gmra.mrb[56].mxu1 %vm2355_vm4, %v2208_v58 }
 0x42b   : > { %2419 = vmatprep.mubr.bf16.mxu0 %v11014_v0  ;;  %8837 = vmatprep.mubr.msk.bf16.mxu1 %vm11016_vm3, %v11015_v51 }
 0x42c   : > { %v2183_v27 = vadd.f32 %v11849_v20, %v2162_v19  ;;  %v2196_v31 = vmax.f32 %v2182_v9, 0.0 }
 0x42d   : > { %v1932_v22 = vpop.f32.mrb[92].mxu0 }
 0x42e   : > { %v2197_v30 = vmax.f32 %v2183_v27, 0.0  ;;  %v1933_v33 = vadd.f32 %v1932_v22, %v1759_v62  ;;  %v1934_v44 = vpop.f32.mrb[93].mxu0 }
 0x42f   : > { %v1935_v46 = vpop.f32.mrb[94].mxu0 }
 0x430   : > { %v2209_v47 = vpack.c.bf16 %v2197_v30, %v2196_v31  ;;  %v2163_v37 = vadd.f32 %v11813_v39, %v1933_v33  ;;  %v1936_v1 = vadd.f32 %v1935_v46, %v1762_v2  ;;  %v1937_v14 = vpop.f32.mrb[95].mxu0 }
 0x431   : > { %v10157_v14 = vld [vmem:[%s12880_s23 + $0x4] ss:$12 sps:$4 sm:$0xff]  }
 0x432   : > { %v2184_v17 = vadd.f32 %v11849_v20, %v2163_v37  ;;  %v2164_v32 = vadd.f32 %v11815_v45, %v1936_v1  ;;  %7916 = vmatmul.mubr.msk.bf16.gmra.mrb[116].mxu0 %vm2355_vm4, %v2209_v47  ;;  %8838 = vmatmul.mubr.msk.bf16.gmra.mrb[60].mxu1 %vm2355_vm4, %v2209_v47  ;;  %v10155_v1 = vld [vmem:[%s12880_s23] ss:$12 sps:$4 sm:$0xff]  }
 0x433   : > { %2429 = vmatprep.mubr.bf16.mxu0 %v11014_v0  ;;  %8841 = vmatprep.mubr.msk.bf16.mxu1 %vm11016_vm3, %v11015_v51 }
 0x434   : > { %v2185_v62 = vadd.f32 %v11849_v20, %v2164_v32  ;;  %v2198_v43 = vmax.f32 %v2184_v17, 0.0  ;;  %3079 = vmatprep.subr.bf16.mxu1 %v10157_v14 }
 0x435   : > { %v1940_v40 = vpop.f32.mrb[96].mxu0  ;;  %3080 = vmatpush1.bf16.msra.mxu1 %v10155_v1 }
 0x436   : > { %v2199_v39 = vmax.f32 %v2185_v62, 0.0  ;;  %v1941_v2 = vadd.f32 %v1940_v40, %v11833_v16  ;;  %v1942_v57 = vpop.f32.mrb[97].mxu0 }
 0x437   : > { %v1943_v5 = vpop.f32.mrb[98].mxu0 }
 0x438   : > { %v2210_v8 = vpack.c.bf16 %v2199_v39, %v2198_v43  ;;  %v2165_v45 = vadd.f32 %v11817_v49, %v1941_v2  ;;  %v1944_v12 = vadd.f32 %v1943_v5, %v11835_v29  ;;  %v1945_v13 = vpop.f32.mrb[99].mxu0 }
 0x43a   : > { %v2186_v15 = vadd.f32 %v11849_v20, %v2165_v45  ;;  %v2166_v18 = vadd.f32 %v11819_v53, %v1944_v12  ;;  %7917 = vmatmul.mubr.msk.bf16.gmra.mrb[120].mxu0 %vm2355_vm4, %v2210_v8  ;;  %8842 = vmatmul.mubr.msk.bf16.gmra.mrb[64].mxu1 %vm2355_vm4, %v2210_v8 }
 0x43b   : > { %2439 = vmatprep.mubr.bf16.mxu0 %v11014_v0  ;;  %8845 = vmatprep.mubr.msk.bf16.mxu1 %vm11016_vm3, %v11015_v51 }
 0x43c   : > { %v2187_v16 = vadd.f32 %v11849_v20, %v2166_v18  ;;  %v2200_v49 = vmax.f32 %v2186_v15, 0.0 }
 0x43d   : > { %v1948_v23 = vpop.f32.mrb[100].mxu0 }
 0x43e   : > { %v2201_v24 = vmax.f32 %v2187_v16, 0.0  ;;  %v1949_v29 = vadd.f32 %v1948_v23, %v11837_v35  ;;  %v1950_v26 = vpop.f32.mrb[101].mxu0 }
 0x43f   : > { %v1951_v28 = vpop.f32.mrb[102].mxu0 }
 0x440   : > { %v2211_v36 = vpack.c.bf16 %v2201_v24, %v2200_v49  ;;  %v2167_v53 = vadd.f32 %v11821_v63, %v1949_v29  ;;  %v1952_v38 = vadd.f32 %v1951_v28, %v11839_v42  ;;  %v1953_v41 = vpop.f32.mrb[103].mxu0 }
 0x442   : > { %v2188_v48 = vadd.f32 %v11849_v20, %v2167_v53  ;;  %v2168_v50 = vadd.f32 %v11823_v52, %v1952_v38  ;;  %7918 = vmatmul.mubr.msk.bf16.gmra.mrb[124].mxu0 %vm2355_vm4, %v2211_v36  ;;  %8846 = vmatmul.mubr.msk.bf16.gmra.mrb[68].mxu1 %vm2355_vm4, %v2211_v36 }
 0x443   : > { %2449 = vmatprep.mubr.bf16.mxu0 %v11014_v0  ;;  %8849 = vmatprep.mubr.msk.bf16.mxu1 %vm11016_vm3, %v11015_v51 }
 0x444   : > { %v2189_v35 = vadd.f32 %v11849_v20, %v2168_v50  ;;  %v2202_v63 = vmax.f32 %v2188_v48, 0.0 }
 0x445   : > { %v1956_v59 = vpop.f32.mrb[104].mxu0 }
 0x446   : > { %v2203_v3 = vmax.f32 %v2189_v35, 0.0  ;;  %v1957_v42 = vadd.f32 %v1956_v59, %v11841_v56  ;;  %v1958_v54 = vpop.f32.mrb[105].mxu0 }
 0x447   : > { %v1959_v60 = vpop.f32.mrb[106].mxu0 }
 0x448   : > { %v2212_v58 = vpack.c.bf16 %v2203_v3, %v2202_v63  ;;  %v2169_v52 = vadd.f32 %v11825_v55, %v1957_v42  ;;  %v1960_v61 = vadd.f32 %v1959_v60, %v11843_v4  ;;  %v1961_v10 = vpop.f32.mrb[107].mxu0 }
 0x44a   : > { %v2190_v25 = vadd.f32 %v11849_v20, %v2169_v52  ;;  %v2170_v9 = vadd.f32 %v11827_v7, %v1960_v61  ;;  %7919 = vmatmul.mubr.msk.bf16.gmra.mrb[128].mxu0 %vm2355_vm4, %v2212_v58  ;;  %8850 = vmatmul.mubr.msk.bf16.gmra.mrb[72].mxu1 %vm2355_vm4, %v2212_v58 }
 0x44b   : > { %2459 = vmatprep.mubr.bf16.mxu0 %v11014_v0  ;;  %8853 = vmatprep.mubr.msk.bf16.mxu1 %vm11016_vm3, %v11015_v51 }
 0x44c   : > { %v2191_v56 = vadd.f32 %v11849_v20, %v2170_v9  ;;  %v2204_v55 = vmax.f32 %v2190_v25, 0.0 }
 0x44d   : > { %v1964_v19 = vpop.f32.mrb[108].mxu0 }
 0x44e   : > { %v2205_v27 = vmax.f32 %v2191_v56, 0.0  ;;  %v1965_v4 = vadd.f32 %v1964_v19, %v11845_v6  ;;  %v1966_v22 = vpop.f32.mrb[109].mxu0 }
 0x44f   : > { %v1967_v31 = vpop.f32.mrb[110].mxu0 }
 0x450   : > { %v2213_v30 = vpack.c.bf16 %v2205_v27, %v2204_v55  ;;  %v2171_v7 = vadd.f32 %v11829_v21, %v1965_v4  ;;  %v1968_v33 = vadd.f32 %v1967_v31, %v11847_v11  ;;  %v1969_v44 = vpop.f32.mrb[111].mxu0 }
 0x452   : > { %v2192_v46 = vadd.f32 %v11849_v20, %v2171_v7  ;;  %v2172_v47 = vadd.f32 %v11831_v34, %v1968_v33  ;;  %7920 = vmatmul.mubr.msk.bf16.gmra.mrb[132].mxu0 %vm2355_vm4, %v2213_v30  ;;  %8854 = vmatmul.mubr.msk.bf16.gmra.mrb[76].mxu1 %vm2355_vm4, %v2213_v30  ;;  %v10143_v34 = vld [vmem:[#allocation7 + $0x1c] sm:$0xff]  }
 0x453   : > { %2469 = vmatprep.mubr.bf16.mxu0 %v11014_v0  ;;  %8857 = vmatprep.mubr.msk.bf16.mxu1 %vm11016_vm3, %v11015_v51 }
 0x454   : > { %v2193_v21 = vadd.f32 %v11849_v20, %v2172_v47  ;;  %v2206_v6 = vmax.f32 %v2192_v46, 0.0 }
 0x456   : > { %v2207_v11 = vmax.f32 %v2193_v21, 0.0 }
 0x458   : > { %v2214_v37 = vpack.c.bf16 %v2207_v11, %v2206_v6 }
 0x45a   : > { %7921 = vmatmul.mubr.msk.bf16.gmra.mrb[136].mxu0 %vm2355_vm4, %v2214_v37  ;;  %8858 = vmatmul.mubr.msk.bf16.gmra.mrb[80].mxu1 %vm2355_vm4, %v2214_v37 }
 0x45b   : > { %3111 = vmatprep.mubr.bf16.mxu1 %v11014_v0  ;;  %8875 = vmatprep.mubr.msk.bf16.mxu0 %vm2355_vm4, %v10143_v34 }
 0x4fd   : > { %v2411_v17 = vpop.f32.mrb[112].mxu0  ;;  %v2514_v32 = vpop.f32.mrb[56].mxu1 }
 0x4fe   : > { %v2413_v62 = vpop.f32.mrb[113].mxu0  ;;  %v8835_v20 = vpop.f32.mrb[57].mxu1 }
 0x4ff   : > { %v2415_v40 = vpop.f32.mrb[114].mxu0  ;;  %v2517_v43 = vpop.f32.mrb[58].mxu1 }
 0x500   : > { %v11922_v39 = vpack.c.bf16 %v2415_v40, %v2411_v17  ;;  %v11924_v2 = vpack.c.bf16 %v2517_v43, %v2514_v32  ;;  %v2417_v57 = vpop.f32.mrb[115].mxu0  ;;  %v8836_v5 = vpop.f32.mrb[59].mxu1 }
 0x501   : > { %v2570_v8 = vpack.c.bf16 %v2417_v57, %v2413_v62 }
 0x503   : > { %8861 = vmatprep.subr.bf16.mxu0 %v2570_v8 }
 0x504   : > { %8862 = vmatpush3.bf16.msra.mxu0 %v2570_v8 }
 0x505   : > { %v2421_v45 = vpop.f32.mrb[116].mxu0  ;;  %v2522_v12 = vpop.f32.mrb[60].mxu1 }
 0x506   : > { %v2423_v13 = vpop.f32.mrb[117].mxu0  ;;  %v8839_v15 = vpop.f32.mrb[61].mxu1 }
 0x507   : > { %v2425_v18 = vpop.f32.mrb[118].mxu0  ;;  %v2525_v16 = vpop.f32.mrb[62].mxu1 }
 0x508   : > { %v11926_v23 = vpack.c.bf16 %v2425_v18, %v2421_v45  ;;  %v11928_v49 = vpack.c.bf16 %v2525_v16, %v2522_v12  ;;  %v2427_v24 = vpop.f32.mrb[119].mxu0  ;;  %v8840_v29 = vpop.f32.mrb[63].mxu1 }
 0x509   : > { %v2573_v26 = vpack.c.bf16 %v2427_v24, %v2423_v13  ;;  %v10144_v24 = vld [vmem:[#allocation7 + $0x24] sm:$0xff]   ;;  %v10145_v29 = vld [vmem:[#allocation7 + $0x2c] sm:$0xff]  }
 0x50b   : > { %8863 = vmatprep.subr.bf16.mxu0 %v2573_v26 }
 0x50c   : > { %8864 = vmatpush3.bf16.msra.mxu0 %v2573_v26  ;;  %v10146_v26 = vld [vmem:[#allocation7 + $0x34] ss:$0 sps:$4 sm:$0xff]  }
 0x50d   : > { %v2431_v28 = vpop.f32.mrb[120].mxu0  ;;  %v2530_v36 = vpop.f32.mrb[64].mxu1 }
 0x50e   : > { %v2433_v53 = vpop.f32.mrb[121].mxu0  ;;  %v8843_v38 = vpop.f32.mrb[65].mxu1 }
 0x50f   : > { %v2435_v41 = vpop.f32.mrb[122].mxu0  ;;  %v2533_v48 = vpop.f32.mrb[66].mxu1  ;;  %v10154_v38 = vld [vmem:[#allocation7 + $0x50] ss:$0 sps:$4 sm:$0xff]  }
 0x510   : > { %v11930_v50 = vpack.c.bf16 %v2435_v41, %v2431_v28  ;;  %v11932_v35 = vpack.c.bf16 %v2533_v48, %v2530_v36  ;;  %v2437_v59 = vpop.f32.mrb[123].mxu0  ;;  %v8844_v63 = vpop.f32.mrb[67].mxu1  ;;  %v10147_v28 = vld [vmem:[#allocation7] sm:$0xff]   ;;  %v10149_v36 = vld [vmem:[#allocation7 + $0x10] sm:$0xff]  }
 0x511   : > { %v2576_v3 = vpack.c.bf16 %v2437_v59, %v2433_v53  ;;  %v10151_v53 = vld [vmem:[#allocation7 + $0x38] sm:$0xff]   ;;  %v10158_v41 = vld [vmem:[%s12880_s23 + $0x18] ss:$12 sps:$4 sm:$0xff]  }
 0x512   : > { %v10160_v48 = vld [vmem:[%s12880_s23 + $0x1c] ss:$12 sps:$4 sm:$0xff]   ;;  %v10166_v63 = vld [vmem:[%s12880_s23 + $0x4c] ss:$12 sps:$4 sm:$0xff]  }
 0x513   : > { %8865 = vmatprep.subr.bf16.mxu0 %v2576_v3  ;;  %3081 = vmatprep.subr.bf16.mxu1 %v10160_v48  ;;  %v10164_v59 = vld [vmem:[%s12880_s23 + $0x48] ss:$12 sps:$4 sm:$0xff]  }
 0x514   : > { %8866 = vmatpush3.bf16.msra.mxu0 %v2576_v3  ;;  %3082 = vmatpush1.bf16.msra.mxu1 %v10158_v41  ;;  %v10169_v3 = vld [vmem:[%s12880_s23 + $0x64] ss:$12 sps:$4 sm:$0xff]  }
 0x515   : > { %v2441_v42 = vpop.f32.mrb[124].mxu0  ;;  %v2538_v54 = vpop.f32.mrb[68].mxu1 }
 0x516   : > { %v2443_v60 = vpop.f32.mrb[125].mxu0  ;;  %v8847_v58 = vpop.f32.mrb[69].mxu1 }
 0x517   : > { %v2445_v52 = vpop.f32.mrb[126].mxu0  ;;  %v2541_v61 = vpop.f32.mrb[70].mxu1  ;;  %v10175_v58 = vld [vmem:[%s12880_s23 + $0x94] ss:$12 sps:$4 sm:$0xff]  }
 0x518   : > { %v2578_v10 = vpack.c.bf16 %v2445_v52, %v2441_v42  ;;  %v11934_v25 = vpack.c.bf16 %v2541_v61, %v2538_v54  ;;  %v2447_v9 = vpop.f32.mrb[127].mxu0  ;;  %v8848_v56 = vpop.f32.mrb[71].mxu1  ;;  %v10167_v42 = vld [vmem:[%s12880_s23 + $0x60] ss:$12 sps:$4 sm:$0xff]   ;;  %v10172_v54 = vld [vmem:[%s12880_s23 + $0x7c] ss:$12 sps:$4 sm:$0xff]  }
 0x519   : > { %v2579_v19 = vpack.c.bf16 %v2447_v9, %v2443_v60  ;;  %v10170_v60 = vld [vmem:[%s12880_s23 + $0x78] ss:$12 sps:$4 sm:$0xff]   ;;  %v10173_v52 = vld [vmem:[%s12880_s23 + $0x90] ss:$12 sps:$4 sm:$0xff]   ;;  %v10176_v61 = vld [vmem:[%s12880_s23 + $0x8] ss:$12 sps:$4 sm:$0xff]  }
 0x51b   : > { %8867 = vmatprep.subr.bf16.mxu0 %v2579_v19 }
 0x51c   : > { %8868 = vmatpush3.bf16.msra.mxu0 %v2579_v19 }
 0x51d   : > { %v2451_v55 = vpop.f32.mrb[128].mxu0  ;;  %v2546_v27 = vpop.f32.mrb[72].mxu1 }
 0x51e   : > { %v2453_v4 = vpop.f32.mrb[129].mxu0  ;;  %v8851_v22 = vpop.f32.mrb[73].mxu1 }
 0x51f   : > { %v2455_v31 = vpop.f32.mrb[130].mxu0  ;;  %v2549_v30 = vpop.f32.mrb[74].mxu1 }
 0x520   : > { %v2581_v7 = vpack.c.bf16 %v2455_v31, %v2451_v55  ;;  %v11936_v33 = vpack.c.bf16 %v2549_v30, %v2546_v27  ;;  %v2457_v44 = vpop.f32.mrb[131].mxu0  ;;  %v8852_v46 = vpop.f32.mrb[75].mxu1 }
 0x521   : > { %v2582_v47 = vpack.c.bf16 %v2457_v44, %v2453_v4 }
 0x523   : > { %8869 = vmatprep.subr.bf16.mxu0 %v2582_v47 }
 0x524   : > { %8870 = vmatpush3.bf16.msra.mxu0 %v2582_v47 }
 0x525   : > { %v2461_v21 = vpop.f32.mrb[132].mxu0  ;;  %v2554_v6 = vpop.f32.mrb[76].mxu1 }
 0x526   : > { %v2463_v11 = vpop.f32.mrb[133].mxu0  ;;  %v8855_v37 = vpop.f32.mrb[77].mxu1 }
 0x527   : > { %v2465_v34 = vpop.f32.mrb[134].mxu0  ;;  %v2557_v1 = vpop.f32.mrb[78].mxu1 }
 0x528   : > { %v2584_v14 = vpack.c.bf16 %v2465_v34, %v2461_v21  ;;  %v2586_v17 = vpack.c.bf16 %v2557_v1, %v2554_v6  ;;  %v2467_v32 = vpop.f32.mrb[135].mxu0  ;;  %v8856_v62 = vpop.f32.mrb[79].mxu1 }
 0x529   : > { %v2585_v20 = vpack.c.bf16 %v2467_v32, %v2463_v11 }
 0x52b   : > { %8871 = vmatprep.subr.bf16.mxu0 %v2585_v20 }
 0x52c   : > { %8872 = vmatpush3.bf16.msra.mxu0 %v2585_v20 }
 0x52d   : > { %v2471_v40 = vpop.f32.mrb[136].mxu0  ;;  %v2562_v43 = vpop.f32.mrb[80].mxu1 }
 0x52e   : > { %v2473_v57 = vpop.f32.mrb[137].mxu0  ;;  %v8859_v5 = vpop.f32.mrb[81].mxu1 }
 0x52f   : > { %v2475_v8 = vpop.f32.mrb[138].mxu0  ;;  %v2565_v45 = vpop.f32.mrb[82].mxu1 }
 0x530   : > { %v2587_v12 = vpack.c.bf16 %v2475_v8, %v2471_v40  ;;  %v2589_v13 = vpack.c.bf16 %v2565_v45, %v2562_v43  ;;  %v2477_v15 = vpop.f32.mrb[139].mxu0  ;;  %v8860_v18 = vpop.f32.mrb[83].mxu1  ;;  %v10177_v40 = vld [vmem:[%s12880_s23 + $0x20] ss:$12 sps:$4 sm:$0xff]  }
 0x531   : > { %v2588_v16 = vpack.c.bf16 %v2477_v15, %v2473_v57  ;;  %v10178_v15 = vld [vmem:[%s12880_s23 + $0x38] ss:$12 sps:$4 sm:$0xff]  }
 0x533   : > { %8873 = vmatprep.subr.bf16.mxu0 %v2588_v16 }
 0x534   : > { %8874 = vmatpush3.bf16.msra.mxu0 %v2588_v16 }
 0x535   : > { %8883 = vmatprep.subr.bf16.mxu0 %v11922_v39 }
 0x537   : > { %8876 = vmatmul.mubr.msk.bf16.vlgmr.msra.gmra.mrb[140].mxu0 %vm2355_vm4, %v10144_v24 }
 0x538   : > { %8884 = vmatpush3.bf16.msra.mxu0 %v11922_v39  ;;  %8879 = vmatprep.mubr.msk.bf16.mxu0 %vm2355_vm4, %v10145_v29  ;;  %v10148_v39 = vld [vmem:[#allocation7 + $0x8] sm:$0xff]  }
 0x539   : > { %8885 = vmatprep.subr.bf16.mxu0 %v11926_v23  ;;  %v10179_v29 = vld [vmem:[%s12880_s23 + $0x50] ss:$12 sps:$4 sm:$0xff]  }
 0x53c   : > { %8886 = vmatpush3.bf16.msra.mxu0 %v11926_v23  ;;  %v10150_v23 = vld [vmem:[#allocation7 + $0x18] ss:$0 sps:$4 sm:$0xff]  }
 0x53d   : > { %8887 = vmatprep.subr.bf16.mxu0 %v11930_v50 }
 0x53f   : > { %8880 = vmatmul.mubr.msk.bf16.gmra.mrb[144].mxu0 %vm2355_vm4, %v10146_v26 }
 0x540   : > { %8888 = vmatpush3.bf16.msra.mxu0 %v11930_v50  ;;  %8897 = vmatprep.mubr.msk.bf16.mxu0 %vm2355_vm4, %v10147_v28  ;;  %v10163_v50 = vld [vmem:[%s12880_s23 + $0x34] ss:$12 sps:$4 sm:$0xff]  }
 0x541   : > { %8889 = vmatprep.subr.bf16.mxu0 %v2578_v10  ;;  %3083 = vmatprep.subr.bf16.mxu1 %v10163_v50  ;;  %v10180_v28 = vld [vmem:[%s12880_s23 + $0x68] ss:$12 sps:$4 sm:$0xff]  }
 0x544   : > { %8890 = vmatpush3.bf16.msra.mxu0 %v2578_v10 }
 0x545   : > { %8891 = vmatprep.subr.bf16.mxu0 %v2581_v7 }
 0x548   : > { %8892 = vmatpush3.bf16.msra.mxu0 %v2581_v7  ;;  %v7953_v7 = vld [vmem:[#allocation8] ss:$0 sm:$0xff] }
 0x549   : > { %8893 = vmatprep.subr.bf16.mxu0 %v2584_v14 }
 0x54c   : > { %8894 = vmatpush3.bf16.msra.mxu0 %v2584_v14 }
 0x54d   : > { %8895 = vmatprep.subr.bf16.mxu0 %v2587_v12 }
 0x550   : > { %8896 = vmatpush3.bf16.msra.mxu0 %v2587_v12 }
 0x551   : > { %8905 = vmatprep.subr.bf16.mxu0 %v11924_v2 }
 0x553   : > { %8898 = vmatmul.mubr.msk.bf16.vlgmr.msra.gmra.mrb[140].mxu0 %vm2355_vm4, %v10148_v39 }
 0x554   : > { %8906 = vmatpush3.bf16.msra.mxu0 %v11924_v2  ;;  %8901 = vmatprep.mubr.msk.bf16.mxu0 %vm2355_vm4, %v10149_v36  ;;  %v10152_v2 = vld [vmem:[#allocation7 + $0x40] sm:$0xff]   ;;  %v10181_v36 = vld [vmem:[%s12880_s23 + $0x80] ss:$12 sps:$4 sm:$0xff]  }
 0x555   : > { %8907 = vmatprep.subr.bf16.mxu0 %v11928_v49 }
 0x558   : > { %8908 = vmatpush3.bf16.msra.mxu0 %v11928_v49  ;;  %v10153_v49 = vld [vmem:[#allocation7 + $0x48] sm:$0xff]  }
 0x559   : > { %8909 = vmatprep.subr.bf16.mxu0 %v11932_v35 }
 0x55b   : > { %8902 = vmatmul.mubr.msk.bf16.gmra.mrb[148].mxu0 %vm2355_vm4, %v10150_v23 }
 0x55c   : > { %8910 = vmatpush3.bf16.msra.mxu0 %v11932_v35  ;;  %8919 = vmatprep.mubr.msk.bf16.mxu0 %vm2355_vm4, %v10151_v53  ;;  %v10161_v35 = vld [vmem:[%s12880_s23 + $0x30] ss:$12 sps:$4 sm:$0xff]   ;;  %v10182_v53 = vld [vmem:[%s12880_s23 + $0x98] ss:$12 sps:$4 sm:$0xff]  }
 0x55d   : > { %8911 = vmatprep.subr.bf16.mxu0 %v11934_v25  ;;  %3084 = vmatpush1.bf16.msra.mxu1 %v10161_v35 }
 0x55e   : > { %3085 = vmatprep.subr.bf16.mxu1 %v10166_v63 }
 0x560   : > { %8912 = vmatpush3.bf16.msra.mxu0 %v11934_v25 }
 0x561   : > { %8913 = vmatprep.subr.bf16.mxu0 %v11936_v33  ;;  %3086 = vmatpush1.bf16.msra.mxu1 %v10164_v59 }
 0x562   : > { %3087 = vmatprep.subr.bf16.mxu1 %v10169_v3 }
 0x564   : > { %8914 = vmatpush3.bf16.msra.mxu0 %v11936_v33 }
 0x565   : > { %8915 = vmatprep.subr.bf16.mxu0 %v2586_v17  ;;  %3088 = vmatpush1.bf16.msra.mxu1 %v10167_v42 }
 0x566   : > { %3089 = vmatprep.subr.bf16.mxu1 %v10172_v54 }
 0x568   : > { %8916 = vmatpush3.bf16.msra.mxu0 %v2586_v17 }
 0x569   : > { %8917 = vmatprep.subr.bf16.mxu0 %v2589_v13  ;;  %3090 = vmatpush1.bf16.msra.mxu1 %v10170_v60 }
 0x56a   : > { %3091 = vmatprep.subr.bf16.mxu1 %v10175_v58 }
 0x56c   : > { %8918 = vmatpush3.bf16.msra.mxu0 %v2589_v13 }
 0x56d   : > { %3092 = vmatpush1.bf16.msra.mxu1 %v10173_v52 }
 0x56e   : > { %8927 = vmatprep.subr.bf16.mxu1 %v10176_v61 }
 0x56f   : > { %8920 = vmatmul.mubr.msk.bf16.vlgmr.msra.gmra.mrb[140].mxu0 %vm2355_vm4, %v10152_v2 }
 0x570   : > { %8923 = vmatprep.mubr.msk.bf16.mxu0 %vm2355_vm4, %v10153_v49  ;;  %v10183_v49 = vld [vmem:[#allocation10 + $0xc] sm:$0xff]  }
 0x577   : > { %8924 = vmatmul.mubr.msk.bf16.gmra.mrb[152].mxu0 %vm2355_vm4, %v10154_v38  ;;  %v10187_v38 = vld [vmem:[#allocation10 + $0x18] sm:$0xff]  }
 0x578   : > { %8981 = vmatprep.mubr.msk.bf16.mxu0 %vm3241_vm5, %v10187_v38 }
 0x612   : > { %v8881_v10 = vpop.f32.mrb[144].mxu0 }
 0x613   : > { %v2685_v25 = vpop.f32.mrb[145].mxu0 }
 0x614   : > { %v8882_v9 = vpop.f32.mrb[146].mxu0 }
 0x615   : > { %v2688_v56 = vpop.f32.mrb[147].mxu0 }
 0x62e   : > { %v8903_v19 = vpop.f32.mrb[148].mxu0 }
 0x62f   : > { %v2788_v55 = vadd.f32 %v8903_v19, %v8881_v10  ;;  %v2779_v27 = vpop.f32.mrb[149].mxu0 }
 0x630   : > { %v2780_v4 = vadd.f32 %v2779_v27, %v2685_v25  ;;  %v8904_v22 = vpop.f32.mrb[150].mxu0 }
 0x631   : > { %v2782_v31 = vpop.f32.mrb[151].mxu0 }
 0x632   : > { %v2783_v30 = vadd.f32 %v2782_v31, %v2688_v56 }
 0x642   : > { %v8921_v33 = vpop.f32.mrb[140].mxu0 }
 0x643   : > { %v2911_v44 = vadd.f32 %v8921_v33, %v7953_v7  ;;  %v2865_v46 = vpop.f32.mrb[141].mxu0  ;;  %v10185_v33 = vld [vmem:[#allocation10] sm:$0xff]  }
 0x644   : > { %v2909_v47 = vadd.f32 %v7953_v7, %v2865_v46  ;;  %v8922_v21 = vpop.f32.mrb[142].mxu0 }
 0x645   : > { %v2912_v6 = vadd.f32 %v8922_v21, %v7953_v7  ;;  %v2868_v11 = vpop.f32.mrb[143].mxu0  ;;  %v2918_v34 = vmax.f32 %v2911_v44, 0.0 }
 0x646   : > { %v2910_v37 = vadd.f32 %v7953_v7, %v2868_v11  ;;  %v2916_v14 = vmax.f32 %v2909_v47, 0.0 }
 0x647   : > { %v2919_v1 = vmax.f32 %v2912_v6, 0.0 }
 0x648   : > { %v2917_v17 = vmax.f32 %v2910_v37, 0.0 }
 0x649   : > { %v2924_v32 = vpack.c.bf16 %v2919_v1, %v2918_v34 }
 0x64a   : > { %v2923_v62 = vpack.c.bf16 %v2917_v17, %v2916_v14  ;;  %v8925_v20 = vpop.f32.mrb[152].mxu0 }
 0x64b   : > { %v2901_v43 = vadd.f32 %v8925_v20, %v2788_v55  ;;  %v2881_v57 = vpop.f32.mrb[153].mxu0  ;;  %v10186_v20 = vld [vmem:[#allocation10 + $0x8] ss:$0 sps:$4 sm:$0xff]  }
 0x64c   : > { %v2899_v5 = vadd.f32 %v2881_v57, %v2780_v4  ;;  %v8926_v8 = vpop.f32.mrb[154].mxu0  ;;  %7975 = vmatmul.mubr.msk.bf16.vlgmr.msra.gmra.mrb[84].mxu1 %vm2355_vm4, %v2923_v62  ;;  %v10188_v57 = vld [vmem:[#allocation10 + $0x20] ss:$0 sps:$4 sm:$0xff]  }
 0x64d   : > { %v2884_v45 = vpop.f32.mrb[155].mxu0  ;;  %8928 = vmatpush3.bf16.msra.mxu1 %v10176_v61  ;;  %3121 = vmatprep.mubr.bf16.mxu1 %v11014_v0  ;;  %v2915_v39 = vadd.f32 %v7953_v7, %v2901_v43  ;;  %v10191_v8 = vld [vmem:[%s12882_s14 + $0x4] ss:$12 sps:$4 sm:$0xff]  }
 0x64e   : > { %v2913_v12 = vadd.f32 %v7953_v7, %v2899_v5  ;;  %v2900_v13 = vadd.f32 %v2884_v45, %v2783_v30  ;;  %8929 = vmatprep.subr.bf16.mxu1 %v10177_v40  ;;  %v10189_v5 = vld [vmem:[%s12881_s7] ss:$12 sps:$4 sm:$0xff]   ;;  %v10192_v45 = vld [vmem:[%s12882_s14 + $0x8] ss:$12 sps:$4 sm:$0xff]   ;;  %s12889_s7 = sld [smem:[#allocation51_spill]] }
 0x64f   : > { %v2922_v23 = vmax.f32 %v2915_v39, 0.0  ;;  %v10207_v39 = vld [vmem:[%s12882_s14 + $0x64] ss:$12 sps:$4 sm:$0xff]  }
 0x650   : > { %v2914_v18 = vadd.f32 %v7953_v7, %v2900_v13  ;;  %v2920_v16 = vmax.f32 %v2913_v12, 0.0  ;;  %v10184_v7 = vld [vmem:[#allocation10 + $0x14] ss:$0 sps:$4 sm:$0xff]   ;;  %v10196_v13 = vld [vmem:[%s12882_s14 + $0x20] ss:$12 sps:$4 sm:$0xff]  }
 0x651   : > { %8930 = vmatpush3.bf16.msra.mxu1 %v10177_v40  ;;  %v2926_v2 = vpack.c.bf16 %v2922_v23, %v2922_v23  ;;  %v10195_v12 = vld [vmem:[%s12882_s14 + $0x1c] ss:$12 sps:$4 sm:$0xff]  }
 0x652   : > { %v2921_v24 = vmax.f32 %v2914_v18, 0.0  ;;  %8931 = vmatprep.subr.bf16.mxu1 %v10178_v15  ;;  %v10199_v18 = vld [vmem:[%s12882_s14 + $0x34] ss:$12 sps:$4 sm:$0xff]  }
 0x653   : > { %v10208_v23 = vld [vmem:[%s12882_s14 + $0x68] ss:$12 sps:$4 sm:$0xff]  }
 0x654   : > { %v2925_v26 = vpack.c.bf16 %v2921_v24, %v2920_v16  ;;  %7976 = vmatmul.mubr.msk.bf16.gmra.mrb[88].mxu1 %vm2355_vm4, %v2924_v32  ;;  %v10197_v16 = vld [vmem:[%s12882_s14 + $0x30] ss:$12 sps:$4 sm:$0xff]   ;;  %v10200_v24 = vld [vmem:[%s12882_s14 + $0x38] ss:$12 sps:$4 sm:$0xff]   ;;  %s12890_s1 = smov %s12889_s7 }
 0x655   : > { %8932 = vmatpush3.bf16.msra.mxu1 %v10178_v15  ;;  %3131 = vmatprep.mubr.bf16.mxu1 %v11014_v0  ;;  %v10193_v15 = vld [vmem:[%s12882_s14 + $0x18] ss:$12 sps:$4 sm:$0xff]  }
 0x656   : > { %8933 = vmatprep.subr.bf16.mxu1 %v10179_v29 }
 0x659   : > { %8934 = vmatpush3.bf16.msra.mxu1 %v10179_v29  ;;  %v10203_v29 = vld [vmem:[%s12882_s14 + $0x4c] ss:$12 sps:$4 sm:$0xff]  }
 0x65a   : > { %8935 = vmatprep.subr.bf16.mxu1 %v10180_v28 }
 0x65c   : > { %7977 = vmatmul.mubr.msk.bf16.gmra.mrb[92].mxu1 %vm2355_vm4, %v2925_v26 }
 0x65d   : > { %8936 = vmatpush3.bf16.msra.mxu1 %v10180_v28  ;;  %3141 = vmatprep.mubr.bf16.mxu1 %v11014_v0  ;;  %v10204_v28 = vld [vmem:[%s12882_s14 + $0x50] ss:$12 sps:$4 sm:$0xff]  }
 0x65e   : > { %8937 = vmatprep.subr.bf16.mxu1 %v10181_v36 }
 0x661   : > { %8938 = vmatpush3.bf16.msra.mxu1 %v10181_v36  ;;  %v10205_v36 = vld [vmem:[%s12882_s14 + $0x60] ss:$12 sps:$4 sm:$0xff]  }
 0x662   : > { %8939 = vmatprep.subr.bf16.mxu1 %v10182_v53 }
 0x664   : > { %7978 = vmatmul.mubr.msk.bf16.gmra.mrb[96].mxu1 %vm2355_vm4, %v2926_v2 }
 0x665   : > { %8941 = vmatprep.mubr.msk.bf16.mxu1 %vm2355_vm4, %v2923_v62  ;;  %8940 = vmatpush3.bf16.msra.mxu1 %v10182_v53  ;;  %v10211_v53 = vld [vmem:[%s12882_s14 + $0x7c] ss:$12 sps:$4 sm:$0xff]  }
 0x66c   : > { %8942 = vmatmul.mubr.msk.bf16.vlgmr.msra.gmra.mrb[100].mxu1 %vm2355_vm4, %v2924_v32 }
 0x66d   : > { %8945 = vmatprep.mubr.msk.bf16.mxu1 %vm2355_vm4, %v2925_v26  ;;  %v10201_v26 = vld [vmem:[%s12882_s14 + $0x48] ss:$12 sps:$4 sm:$0xff]  }
 0x674   : > { %8946 = vmatmul.mubr.msk.bf16.gmra.mrb[104].mxu1 %vm2355_vm4, %v2926_v2  ;;  %v10209_v2 = vld [vmem:[%s12882_s14 + $0x78] ss:$12 sps:$4 sm:$0xff]  }
 0x675   : > { %8957 = vmatprep.mubr.msk.bf16.mxu1 %vm3241_vm5, %v10183_v49  ;;  %v10212_v49 = vld [vmem:[%s12882_s14 + $0x80] ss:$12 sps:$4 sm:$0xff]  }
 0x71f   : > { %v3113_v41 = vpop.f32.mrb[84].mxu1 }
 0x720   : > { %v3115_v48 = vpop.f32.mrb[85].mxu1 }
 0x721   : > { %v3117_v50 = vpop.f32.mrb[86].mxu1 }
 0x722   : > { %v3214_v35 = vpack.c.bf16 %v3117_v50, %v3113_v41  ;;  %v3119_v59 = vpop.f32.mrb[87].mxu1 }
 0x723   : > { %v3215_v63 = vpack.c.bf16 %v3119_v59, %v3115_v48 }
 0x725   : > { %8949 = vmatprep.subr.bf16.mxu1 %v3215_v63 }
 0x726   : > { %8950 = vmatpush3.bf16.msra.mxu1 %v3215_v63 }
 0x727   : > { %v3123_v3 = vpop.f32.mrb[88].mxu1 }
 0x728   : > { %v3125_v42 = vpop.f32.mrb[89].mxu1 }
 0x729   : > { %v3127_v54 = vpop.f32.mrb[90].mxu1 }
 0x72a   : > { %v3217_v60 = vpack.c.bf16 %v3127_v54, %v3123_v3  ;;  %v3129_v58 = vpop.f32.mrb[91].mxu1 }
 0x72b   : > { %v3218_v52 = vpack.c.bf16 %v3129_v58, %v3125_v42 }
 0x72d   : > { %8951 = vmatprep.subr.bf16.mxu1 %v3218_v52 }
 0x72e   : > { %8952 = vmatpush3.bf16.msra.mxu1 %v3218_v52  ;;  %v7995_v52 = vld [vmem:[#allocation11] ss:$0 sm:$0xff] }
 0x72f   : > { %v3133_v61 = vpop.f32.mrb[92].mxu1 }
 0x730   : > { %v3135_v10 = vpop.f32.mrb[93].mxu1 }
 0x731   : > { %v3137_v25 = vpop.f32.mrb[94].mxu1 }
 0x732   : > { %v3220_v9 = vpack.c.bf16 %v3137_v25, %v3133_v61  ;;  %v3139_v56 = vpop.f32.mrb[95].mxu1 }
 0x733   : > { %v3221_v19 = vpack.c.bf16 %v3139_v56, %v3135_v10 }
 0x735   : > { %8953 = vmatprep.subr.bf16.mxu1 %v3221_v19 }
 0x736   : > { %8954 = vmatpush3.bf16.msra.mxu1 %v3221_v19 }
 0x737   : > { %v3143_v55 = vpop.f32.mrb[96].mxu1 }
 0x738   : > { %v3145_v27 = vpop.f32.mrb[97].mxu1  ;;  %v3223_v37 = vpack.c.bf16 %v3143_v55, %v3143_v55 }
 0x739   : > { %v3224_v4 = vpack.c.bf16 %v3145_v27, %v3145_v27  ;;  %v3147_v22 = vpop.f32.mrb[98].mxu1 }
 0x73a   : > { %v3148_v31 = vpop.f32.mrb[99].mxu1  ;;  %v3315_v32 = vsel %vm3248_vm6, %v3223_v37, 0 }
 0x73b   : > { %v3250_v30 = vsel %vm3248_vm6, %v3224_v4, 0  ;;  %9803 = vmatprep.subr.msk.bf16.mxu1 %vm3248_vm6, %v3224_v4 }
 0x73c   : > { %8956 = vmatpush3.bf16.msra.mxu1 %v3250_v30 }
 0x73d   : > { %8961 = vmatprep.subr.bf16.mxu1 %v3214_v35 }
 0x73f   : > { %v8943_v44 = vpop.f32.mrb[100].mxu1  ;;  %8958 = vmatmul.mubr.msk.bf16.vlgmr.msra.gmra.mrb[108].mxu1 %vm3241_vm5, %v10184_v7 }
 0x740   : > { %v3184_v46 = vpop.f32.mrb[101].mxu1  ;;  %8962 = vmatpush3.bf16.msra.mxu1 %v3214_v35  ;;  %8969 = vmatprep.mubr.msk.bf16.mxu1 %vm3241_vm5, %v10185_v33 }
 0x741   : > { %v8944_v47 = vpop.f32.mrb[102].mxu1  ;;  %8963 = vmatprep.subr.bf16.mxu1 %v3217_v60 }
 0x742   : > { %v3219_v21 = vpack.c.bf16 %v8944_v47, %v8943_v44  ;;  %v3187_v6 = vpop.f32.mrb[103].mxu1 }
 0x743   : > { %v3216_v11 = vpack.c.bf16 %v3187_v6, %v3184_v46 }
 0x744   : > { %8964 = vmatpush3.bf16.msra.mxu1 %v3217_v60 }
 0x745   : > { %8965 = vmatprep.subr.bf16.mxu1 %v3220_v9  ;;  %8973 = vmatprep.subr.bf16.mxu0 %v3216_v11 }
 0x746   : > { %8974 = vmatpush3.bf16.msra.mxu0 %v3216_v11 }
 0x747   : > { %v8947_v34 = vpop.f32.mrb[104].mxu1  ;;  %8975 = vmatprep.subr.bf16.mxu0 %v3219_v21 }
 0x748   : > { %v3200_v1 = vpop.f32.mrb[105].mxu1  ;;  %8966 = vmatpush3.bf16.msra.mxu1 %v3220_v9  ;;  %v3225_v40 = vpack.c.bf16 %v8947_v34, %v8947_v34 }
 0x749   : > { %v8948_v14 = vpop.f32.mrb[106].mxu1  ;;  %9804 = vmatprep.subr.msk.bf16.mxu1 %vm3248_vm6, %v3223_v37 }
 0x74a   : > { %v3203_v17 = vpop.f32.mrb[107].mxu1  ;;  %8976 = vmatpush3.bf16.msra.mxu0 %v3219_v21  ;;  %v3384_v43 = vsel %vm3248_vm6, %v3225_v40, 0 }
 0x74b   : > { %v3222_v62 = vpack.c.bf16 %v3203_v17, %v3200_v1 }
 0x74c   : > { %8968 = vmatpush3.bf16.msra.mxu1 %v3315_v32 }
 0x74d   : > { %8977 = vmatprep.subr.bf16.mxu0 %v3222_v62  ;;  %3578 = vmatprep.subr.bf16.mxu1 %v10191_v8 }
 0x74e   : > { %8978 = vmatpush3.bf16.msra.mxu0 %v3222_v62 }
 0x74f   : > { %8970 = vmatmul.mubr.msk.bf16.vlgmr.msra.gmra.mrb[112].mxu1 %vm3241_vm5, %v10186_v20  ;;  %9805 = vmatprep.subr.msk.bf16.mxu0 %vm3248_vm6, %v3225_v40  ;;  %v3837_v40 = vld [vmem:[#allocation14] sm:$0xff] }
 0x750   : > { %3610 = vmatprep.mubr.bf16.mxu1 %v11014_v0  ;;  %3579 = vmatpush1.bf16.msra.mxu1 %v10189_v5 }
 0x751   : > { %3580 = vmatprep.subr.bf16.mxu1 %v10195_v12 }
 0x752   : > { %8980 = vmatpush3.bf16.msra.mxu0 %v3384_v43  ;;  %v3838_v43 = vld [vmem:[#allocation14 + $0x8] sm:$0xff] }
 0x753   : > { %8985 = vmatprep.subr.bf16.mxu0 %v10192_v45 }
 0x754   : > { %3581 = vmatpush1.bf16.msra.mxu1 %v10193_v15  ;;  %v9545_v15 = vpack.c.bf16 %v3838_v43, %v3837_v40  ;;  %v10213_v40 = vld [vmem:[%s12884_s22] ss:$12 sps:$4 sm:$0xff]  }
 0x755   : > { %8982 = vmatmul.mubr.msk.bf16.vlgmr.msra.gmra.mrb[156].mxu0 %vm3241_vm5, %v10188_v57  ;;  %3582 = vmatprep.subr.bf16.mxu1 %v10199_v18  ;;  %v8018_v18 = vld [vmem:[%s12883_s18 + $0x4] sm:$0xf] }
 0x756   : > { %8986 = vmatpush3.bf16.msra.mxu0 %v10192_v45 }
 0x757   : > { %8987 = vmatprep.subr.bf16.mxu0 %v10196_v13 }
 0x758   : > { %3583 = vmatpush1.bf16.msra.mxu1 %v10197_v16  ;;  %v11017_v16 = vmov 0.0|0.0  }
 0x759   : > { %3584 = vmatprep.subr.bf16.mxu1 %v10203_v29  ;;  %v3840_v29 = vld [vmem:[#allocation14 + $0x18] sm:$0xff] }
 0x75a   : > { %8988 = vmatpush3.bf16.msra.mxu0 %v10196_v13  ;;  %v3683_v13 = vld [vmem:[%s12883_s18] sm:$0xf] }
 0x75b   : > { %8989 = vmatprep.subr.bf16.mxu0 %v10200_v24 }
 0x75c   : > { %3585 = vmatpush1.bf16.msra.mxu1 %v10201_v26 }
 0x75d   : > { %3586 = vmatprep.subr.bf16.mxu1 %v10207_v39  ;;  %v3841_v39 = vld [vmem:[#allocation14 + $0x20] sm:$0xff] }
 0x75e   : > { %8990 = vmatpush3.bf16.msra.mxu0 %v10200_v24  ;;  %v3839_v24 = vld [vmem:[#allocation14 + $0x10] sm:$0xff] }
 0x75f   : > { %8991 = vmatprep.subr.bf16.mxu0 %v10204_v28 }
 0x760   : > { %3587 = vmatpush1.bf16.msra.mxu1 %v10205_v36  ;;  %v3842_v36 = vld [vmem:[#allocation14 + $0x28] sm:$0xff] }
 0x761   : > { %3588 = vmatprep.subr.bf16.mxu1 %v10211_v53  ;;  %v9551_v53 = vpack.c.bf16 %v3842_v36, %v3841_v39  ;;  %v10240_v39 = vld [vmem:[%s12884_s22 + $0x98] ss:$12 sps:$4 sm:$0xff]  }
 0x762   : > { %8992 = vmatpush3.bf16.msra.mxu0 %v10204_v28  ;;  %v9548_v28 = vpack.c.bf16 %v3840_v29, %v3839_v24  ;;  %v10235_v24 = vld [vmem:[%s12884_s22 + $0x7c] ss:$12 sps:$4 sm:$0xff]   ;;  %v10233_v29 = vld [vmem:[%s12884_s22 + $0x78] ss:$12 sps:$4 sm:$0xff]  }
 0x763   : > { %8993 = vmatprep.subr.bf16.mxu0 %v10208_v23  ;;  %v10243_v36 = vld [vmem:[%s12884_s22 + $0xac] ss:$12 sps:$4 sm:$0xff]  }
 0x764   : > { %3589 = vmatpush1.bf16.msra.mxu1 %v10209_v2  ;;  %v8021_v2 = vld [vmem:[%s12883_s18 + $0x8] sm:$0xf] }
 0x765   : > { %9009 = vmatprep.subr.bf16.mxu1 %v11015_v51 }
 0x766   : > { %8994 = vmatpush3.bf16.msra.mxu0 %v10208_v23 }
 0x767   : > { %8995 = vmatprep.subr.bf16.mxu0 %v10212_v49 }
 0x76a   : > { %8996 = vmatpush3.bf16.msra.mxu0 %v10212_v49  ;;  %v3843_v49 = vld [vmem:[#allocation14 + $0x30] sm:$0xff] }
 0x76b   : > { %9001 = vmatprep.subr.bf16.mxu0 %v11015_v51 }
 0x812   : > { %v8959_v38 = vpop.f32.mrb[108].mxu1 }
 0x813   : > { %v3286_v41 = vpop.f32.mrb[109].mxu1 }
 0x814   : > { %v8960_v48 = vpop.f32.mrb[110].mxu1 }
 0x815   : > { %v3289_v50 = vpop.f32.mrb[111].mxu1  ;;  %v3845_v48 = vld [vmem:[#allocation14 + $0x40] sm:$0xff] }
 0x822   : > { %v8971_v35 = vpop.f32.mrb[112].mxu1 }
 0x823   : > { %v3360_v59 = vadd.f32 %v8971_v35, %v8959_v38  ;;  %v3351_v63 = vpop.f32.mrb[113].mxu1  ;;  %v3844_v38 = vld [vmem:[#allocation14 + $0x38] sm:$0xff] }
 0x824   : > { %v3352_v3 = vadd.f32 %v3351_v63, %v3286_v41  ;;  %v8972_v42 = vpop.f32.mrb[114].mxu1  ;;  %v9554_v41 = vpack.c.bf16 %v3844_v38, %v3843_v49  ;;  %v3848_v63 = vld [vmem:[#allocation14 + $0x58] sm:$0xff] }
 0x825   : > { %v3354_v54 = vpop.f32.mrb[115].mxu1  ;;  %v3849_v42 = vld [vmem:[#allocation14 + $0x60] sm:$0xff] }
 0x826   : > { %v3355_v60 = vadd.f32 %v3354_v54, %v3289_v50  ;;  %v3846_v50 = vld [vmem:[#allocation14 + $0x48] sm:$0xff] }
 0x827   : > { %v9557_v35 = vpack.c.bf16 %v3846_v50, %v3845_v48  ;;  %v3850_v54 = vld [vmem:[#allocation14 + $0x68] sm:$0xff] }
 0x828   : > { %v8983_v58 = vpop.f32.mrb[156].mxu0 }
 0x829   : > { %v3436_v61 = vadd.f32 %v8983_v58, %v3360_v59  ;;  %v3420_v10 = vpop.f32.mrb[157].mxu0  ;;  %v3847_v59 = vld [vmem:[#allocation14 + $0x50] sm:$0xff] }
 0x82a   : > { %v3434_v25 = vadd.f32 %v3420_v10, %v3352_v3  ;;  %v8984_v9 = vpop.f32.mrb[158].mxu0  ;;  %v9560_v3 = vpack.c.bf16 %v3848_v63, %v3847_v59  ;;  %v3851_v58 = vld [vmem:[#allocation14 + $0x70] sm:$0xff] }
 0x82b   : > { %v3446_v56 = vadd.f32 %v7995_v52, %v3436_v61  ;;  %v3423_v19 = vpop.f32.mrb[159].mxu0  ;;  %v10251_v59 = vld [vmem:[%s12887_s16] ss:$12 sps:$4 sm:$0xff]   ;;  %v10253_v63 = vld [vmem:[%s12887_s16 + $0x4] ss:$12 sps:$4 sm:$0xff]  }
 0x82c   : > { %v3444_v55 = vadd.f32 %v7995_v52, %v3434_v25  ;;  %v3435_v27 = vadd.f32 %v3423_v19, %v3355_v60  ;;  %v9563_v60 = vpack.c.bf16 %v3850_v54, %v3849_v42  ;;  %v10255_v42 = vld [vmem:[%s12887_s16 + $0x18] ss:$12 sps:$4 sm:$0xff]   ;;  %v10261_v54 = vld [vmem:[%s12887_s16 + $0x34] ss:$12 sps:$4 sm:$0xff]  }
 0x82d   : > { %v3449_v22 = vmax.f32 %v3446_v56, 0.0 }
 0x82e   : > { %v3445_v4 = vadd.f32 %v7995_v52, %v3435_v27  ;;  %v3447_v31 = vmax.f32 %v3444_v55, 0.0  ;;  %v3852_v52 = vld [vmem:[#allocation14 + $0x78] sm:$0xff] }
 0x82f   : > { %v3451_v33 = vpack.c.bf16 %v3449_v22, %v3449_v22  ;;  %v9566_v61 = vpack.c.bf16 %v3852_v52, %v3851_v58  ;;  %v10265_v58 = vld [vmem:[%s12887_s16 + $0x4c] ss:$12 sps:$4 sm:$0xff]   ;;  %v10263_v52 = vld [vmem:[%s12887_s16 + $0x48] ss:$12 sps:$4 sm:$0xff]  }
 0x830   : > { %v3448_v30 = vmax.f32 %v3445_v4, 0.0 }
 0x832   : > { %v3450_v7 = vpack.c.bf16 %v3448_v30, %v3447_v31  ;;  %v8023_v30 = vld [vmem:[#allocation13] ss:$0 sm:$0xff] }
 0x834   : > { %8014 = vmatmul.mubr.msk.bf16.vlgmr.msra.gmra.mrb[116].mxu1 %vm1687_vm2, %v3450_v7  ;;  %8997 = vmatprep.mubr.msk.bf16.mxu0 %vm1687_vm2, %v3450_v7 }
 0x835   : > { %8998 = vmatmul.mubr.msk.bf16.vlgmr.msra.gmra.mrb[160].mxu0 %vm1687_vm2, %v3451_v33  ;;  %3620 = vmatprep.mubr.bf16.mxu1 %v11014_v0 }
 0x836   : > { %9005 = vmatprep.mubr.msk.bf16.mxu0 %vm11016_vm3, %v11015_v51 }
 0x83c   : > { %8015 = vmatmul.mubr.msk.bf16.gmra.mrb[120].mxu1 %vm1687_vm2, %v3451_v33 }
 0x83d   : > { %9013 = vmatprep.mubr.msk.bf16.mxu1 %vm11016_vm3, %v11015_v51 }
 0x907   : > { %v3612_v44 = vpop.f32.mrb[116].mxu1 }
 0x908   : > { %v3614_v46 = vpop.f32.mrb[117].mxu1  ;;  %v8999_v47 = vpop.f32.mrb[160].mxu0 }
 0x909   : > { %v3616_v21 = vpop.f32.mrb[118].mxu1  ;;  %v3663_v6 = vpop.f32.mrb[161].mxu0  ;;  %v3682_v26 = vpack.c.bf16 %v8999_v47, %v8999_v47 }
 0x90a   : > { %v3677_v11 = vpack.c.bf16 %v3616_v21, %v3612_v44  ;;  %v3618_v37 = vpop.f32.mrb[119].mxu1  ;;  %v9000_v34 = vpop.f32.mrb[162].mxu0 }
 0x90b   : > { %v3678_v1 = vpack.c.bf16 %v3618_v37, %v3614_v46  ;;  %v3666_v14 = vpop.f32.mrb[163].mxu0  ;;  %v3785_v23 = vsel %vm3248_vm6, %v3682_v26, 0  ;;  %v10216_v37 = vld [vmem:[%s12884_s22 + $0x8] ss:$12 sps:$4 sm:$0xff]   ;;  %v10220_v34 = vld [vmem:[%s12884_s22 + $0x20] ss:$12 sps:$4 sm:$0xff]  }
 0x90c   : > { %v3679_v17 = vpack.c.bf16 %v3666_v14, %v3663_v6  ;;  %9010 = vmatpush3.bf16.msra.mxu1 %v3677_v11  ;;  %v3930_v6 = vld [vmem:[#allocation17] sm:$0xff] }
 0x90d   : > { %9002 = vmatpush3.bf16.msra.mxu0 %v3678_v1  ;;  %9011 = vmatprep.subr.bf16.mxu1 %v11015_v51  ;;  %v10215_v11 = vld [vmem:[%s12884_s22 + $0x4] ss:$12 sps:$4 sm:$0xff]   ;;  %v10239_v26 = vld [vmem:[%s12884_s22 + $0x94] ss:$12 sps:$4 sm:$0xff]  }
 0x90e   : > { %9003 = vmatprep.subr.bf16.mxu0 %v11015_v51  ;;  %v10224_v1 = vld [vmem:[%s12884_s22 + $0x38] ss:$12 sps:$4 sm:$0xff]   ;;  %v10228_v14 = vld [vmem:[%s12884_s22 + $0x50] ss:$12 sps:$4 sm:$0xff]  }
 0x90f   : > { %v3622_v32 = vpop.f32.mrb[120].mxu1 }
 0x910   : > { %v3680_v62 = vpack.c.bf16 %v3622_v32, %v3622_v32  ;;  %v3624_v20 = vpop.f32.mrb[121].mxu1  ;;  %v10236_v32 = vld [vmem:[%s12884_s22 + $0x80] ss:$12 sps:$4 sm:$0xff]  }
 0x911   : > { %v3681_v57 = vpack.c.bf16 %v3624_v20, %v3624_v20  ;;  %v3626_v5 = vpop.f32.mrb[122].mxu1 }
 0x912   : > { %v3737_v8 = vsel %vm3248_vm6, %v3680_v62, 0  ;;  %v3627_v45 = vpop.f32.mrb[123].mxu1  ;;  %v8024_v62 = vld [vmem:[#allocation16] ss:$0 sm:$0xff]  ;;  %v10219_v5 = vld [vmem:[%s12884_s22 + $0x1c] ss:$12 sps:$4 sm:$0xff]  }
 0x913   : > { %v3691_v12 = vsel %vm3248_vm6, %v3681_v57, 0  ;;  %9012 = vmatpush3.bf16.msra.mxu1 %v3737_v8  ;;  %v10217_v8 = vld [vmem:[%s12884_s22 + $0x18] ss:$12 sps:$4 sm:$0xff]   ;;  %v10223_v45 = vld [vmem:[%s12884_s22 + $0x34] ss:$12 sps:$4 sm:$0xff]  }
 0x914   : > { %9004 = vmatpush3.bf16.msra.mxu0 %v3691_v12  ;;  %9544 = vmatprep.subr.bf16.mxu1 %v11017_v16  ;;  %v10221_v12 = vld [vmem:[%s12884_s22 + $0x30] ss:$12 sps:$4 sm:$0xff]  }
 0x915   : > { %9017 = vmatprep.subr.bf16.mxu0 %v11015_v51 }
 0x916   : > { %9014 = vmatmul.mubr.msk.bf16.vlgmr.msra.gmra.mrb[124].mxu1 %vm3686_vm7, %v3683_v13  ;;  %v10227_v13 = vld [vmem:[%s12884_s22 + $0x4c] ss:$12 sps:$4 sm:$0xff]  }
 0x917   : > { %9006 = vmatmul.mubr.msk.bf16.vlgmr.msra.gmra.mrb[164].mxu0 %vm3686_vm7, %v8018_v18  ;;  %9546 = vmatpush3.bf16.msra.mxu1 %v9545_v15  ;;  %v10225_v15 = vld [vmem:[%s12884_s22 + $0x48] ss:$12 sps:$4 sm:$0xff]   ;;  %v10231_v18 = vld [vmem:[%s12884_s22 + $0x64] ss:$12 sps:$4 sm:$0xff]  }
 0x918   : > { %9018 = vmatpush3.bf16.msra.mxu0 %v3679_v17  ;;  %9021 = vmatprep.mubr.msk.bf16.mxu0 %vm11016_vm3, %v11015_v51  ;;  %v10232_v17 = vld [vmem:[%s12884_s22 + $0x68] ss:$12 sps:$4 sm:$0xff]  }
 0x919   : > { %9019 = vmatprep.subr.bf16.mxu0 %v11015_v51  ;;  %9547 = vmatprep.subr.bf16.mxu1 %v11017_v16 }
 0x91a   : > { %9057 = vmatprep.mubr.msk.f32.mxu1 %vm11016_vm3, %v11015_v51 }
 0x91b   : > { %9549 = vmatpush3.bf16.msra.mxu1 %v9548_v28  ;;  %v10237_v28 = vld [vmem:[%s12884_s22 + $0x90] ss:$12 sps:$4 sm:$0xff]  }
 0x91c   : > { %9020 = vmatpush3.bf16.msra.mxu0 %v3785_v23  ;;  %9550 = vmatprep.subr.bf16.mxu1 %v11017_v16  ;;  %v10241_v23 = vld [vmem:[%s12884_s22 + $0xa8] ss:$12 sps:$4 sm:$0xff]  }
 0x91d   : > { %9060 = vmatprep.subr.mxu0 %v11015_v51 }
 0x91f   : > { %9022 = vmatmul.mubr.msk.bf16.vlgmr.msra.gmra.mrb[168].mxu0 %vm3686_vm7, %v8021_v2  ;;  %9552 = vmatpush3.bf16.msra.mxu1 %v9551_v53  ;;  %v10244_v53 = vld [vmem:[%s12884_s22 + $0xb0] ss:$12 sps:$4 sm:$0xff]   ;;  %v8025_v2 = vld [vmem:[#allocation19] ss:$0 sm:$0xff] }
 0x920   : > { %9553 = vmatprep.subr.bf16.mxu1 %v11017_v16  ;;  %9062 = vmatprep.mubr.msk.f32.mxu0 %vm11016_vm3, %v11015_v51 }
 0x921   : > { %9061 = vmatpush3.msra.mxu0 %v3930_v6 }
 0x922   : > { %4191 = vmatprep.subr.bf16.mxu0 %v10215_v11 }
 0x923   : > { %9555 = vmatpush3.bf16.msra.mxu1 %v9554_v41 }
 0x924   : > { %9556 = vmatprep.subr.bf16.mxu1 %v11017_v16 }
 0x927   : > { %9558 = vmatpush3.bf16.msra.mxu1 %v9557_v35  ;;  %v10245_v35 = vld [vmem:[%s12885_s11 + $0xc] sm:$0xff]   ;;  %s12814_s11 = sand.u32 1, %s10954_s10  }
 0x928   : > { %9559 = vmatprep.subr.bf16.mxu1 %v11017_v16 }
 0x92b   : > { %9561 = vmatpush3.bf16.msra.mxu1 %v9560_v3  ;;  %v10257_v3 = vld [vmem:[%s12887_s16 + $0x1c] ss:$12 sps:$4 sm:$0xff]  }
 0x92c   : > { %9562 = vmatprep.subr.bf16.mxu1 %v11017_v16 }
 0x92f   : > { %9564 = vmatpush3.bf16.msra.mxu1 %v9563_v60  ;;  %v10259_v60 = vld [vmem:[%s12887_s16 + $0x30] ss:$12 sps:$4 sm:$0xff]  }
 0x930   : > { %9565 = vmatprep.subr.bf16.mxu1 %v11017_v16  ;;  %v10229_v16 = vld [vmem:[%s12884_s22 + $0x60] ss:$12 sps:$4 sm:$0xff]  }
 0x933   : > { %9567 = vmatpush3.bf16.msra.mxu1 %v9566_v61  ;;  %v10269_v61 = vld [vmem:[%s12887_s16 + $0x64] ss:$12 sps:$4 sm:$0xff]  }
 0x934   : > { %9065 = vmatprep.subr.bf16.mxu1 %v11015_v51 }
 0x9e9   : > { %v3773_v10 = vpop.f32.mrb[124].mxu1 }
 0x9ea   : > { %v3727_v25 = vpop.f32.mrb[164].mxu0  ;;  %v9015_v9 = vpop.f32.mrb[125].mxu1 }
 0x9eb   : > { %v3774_v56 = vadd.f32 %v3773_v10, %v3727_v25  ;;  %v9007_v19 = vpop.f32.mrb[165].mxu0  ;;  %v3776_v55 = vpop.f32.mrb[126].mxu1  ;;  %v10267_v10 = vld [vmem:[%s12887_s16 + $0x60] ss:$12 sps:$4 sm:$0xff]   ;;  %v4048_v25 = vlaneseq }
 0x9ec   : > { %v3730_v27 = vpop.f32.mrb[166].mxu0  ;;  %v9016_v4 = vpop.f32.mrb[127].mxu1  ;;  %v4046_v19 = vld [vmem:[#allocation20] sm:$0x7] }
 0x9ed   : > { %v9008_v22 = vpop.f32.mrb[167].mxu0  ;;  %v4049_v9 = vshrl.u32 %v4048_v25, 7 }
 0x9ef   : > { %v4054_v55 = vsub.s32 1, %v4049_v9  ;;  %v4058_v27 = vsub.s32 2, %v4049_v9 }
 0x9f1   : > { %v4055_v22 = vrot.slane %v4046_v19, %v4054_v55  ;;  %v10276_v55 = vld [vmem:[#allocation22 + $0x24] sm:$0xff]  }
 0x9f2   : > { %v3821_v31 = vpop.f32.mrb[168].mxu0 }
 0x9f3   : > { %v3827_v7 = vadd.f32 %v3821_v31, %v3774_v56  ;;  %v9023_v33 = vpop.f32.mrb[169].mxu0  ;;  %v4050_v56 = vsub.s32 0, %v4049_v9 }
 0x9f4   : > { %v3824_v44 = vpop.f32.mrb[170].mxu0 }
 0x9f5   : > { %v3835_v46 = vadd.f32 %v8023_v30, %v3827_v7  ;;  %v9024_v47 = vpop.f32.mrb[171].mxu0  ;;  %v4051_v4 = vrot.slane %v4046_v19, %v4050_v56  ;;  %v4059_v30 = vrot.slane %v4046_v19, %v4058_v27  ;;  %v10277_v27 = vld [vmem:[#allocation22 + $0x2c] sm:$0xff]  }
 0x9f7   : > { %v3836_v21 = vmax.f32 %v3835_v46, 0.0 }
 0x9f9   : > { %9058 = vmatmul.mubr.f32.vlgmr.msra.gmra.mrb[128].mxu1 %v3836_v21 }
 0x9fa   : > { %9081 = vmatprep.mubr.msk.bf16.mxu1 %vm11016_vm3, %v11015_v51  ;;  %9066 = vmatpush3.bf16.msra.mxu1 %v10216_v37 }
 0x9fb   : > { %9067 = vmatprep.subr.bf16.mxu1 %v11015_v51 }
 0x9fe   : > { %9068 = vmatpush3.bf16.msra.mxu1 %v10220_v34 }
 0x9ff   : > { %9069 = vmatprep.subr.bf16.mxu1 %v11015_v51 }
 0xa02   : > { %9070 = vmatpush3.bf16.msra.mxu1 %v10224_v1 }
 0xa03   : > { %9071 = vmatprep.subr.bf16.mxu1 %v11015_v51 }
 0xa06   : > { %9072 = vmatpush3.bf16.msra.mxu1 %v10228_v14 }
 0xa07   : > { %9073 = vmatprep.subr.bf16.mxu1 %v11015_v51 }
 0xa0a   : > { %9074 = vmatpush3.bf16.msra.mxu1 %v10232_v17 }
 0xa0b   : > { %9075 = vmatprep.subr.bf16.mxu1 %v11015_v51 }
 0xa0e   : > { %9076 = vmatpush3.bf16.msra.mxu1 %v10236_v32 }
 0xa0f   : > { %9077 = vmatprep.subr.bf16.mxu1 %v11015_v51 }
 0xa12   : > { %9078 = vmatpush3.bf16.msra.mxu1 %v10240_v39  ;;  %v10274_v39 = vld [vmem:[%s12887_s16 + $0x80] ss:$12 sps:$4 sm:$0xff]  }
 0xa13   : > { %9079 = vmatprep.subr.bf16.mxu1 %v11015_v51 }
 0xa16   : > { %9080 = vmatpush3.bf16.msra.mxu1 %v10244_v53 }
 0xa17   : > { %4615 = vmatprep.subr.bf16.mxu1 %v10253_v63 }
 0xacc   : > { %v3926_v20 = vpop.f32.mrb[128].mxu1 }
 0xacd   : > { %v3927_v43 = vadd.f32 %v8024_v62, %v3926_v20  ;;  %v9059_v57 = vpop.f32.mrb[129].mxu1 }
 0xacf   : > { %9063 = vmatmul.mubr.msk.f32.vlgmr.msra.gmra.mrb[172].mxu0 %vm3938_vm8, %v3927_v43  ;;  %v10247_v43 = vld [vmem:[%s12886_s2] sm:$0xff]  }
 0xad0   : > { %4192 = vmatpush1.bf16.msra.mxu0 %v10213_v40  ;;  %4223 = vmatprep.mubr.bf16.mxu0 %v11014_v0  ;;  %v10246_v40 = vld [vmem:[%s12886_s2 + $0x14] ss:$0 sps:$4 sm:$0xff]  }
 0xad1   : > { %4193 = vmatprep.subr.bf16.mxu0 %v10219_v5 }
 0xad4   : > { %4194 = vmatpush1.bf16.msra.mxu0 %v10217_v8  ;;  %v10248_v8 = vld [vmem:[%s12886_s2 + $0x8] ss:$0 sps:$4 sm:$0xff]  }
 0xad5   : > { %4195 = vmatprep.subr.bf16.mxu0 %v10223_v45  ;;  %v10249_v45 = vld [vmem:[%s12886_s2 + $0x18] sm:$0xff]  }
 0xad8   : > { %4196 = vmatpush1.bf16.msra.mxu0 %v10221_v12  ;;  %v10254_v12 = vld [vmem:[%s12887_s16 + $0x8] ss:$12 sps:$4 sm:$0xff]  }
 0xad9   : > { %4197 = vmatprep.subr.bf16.mxu0 %v10227_v13 }
 0xadc   : > { %4198 = vmatpush1.bf16.msra.mxu0 %v10225_v15  ;;  %v10250_v15 = vld [vmem:[%s12886_s2 + $0x20] ss:$0 sps:$4 sm:$0xff]  }
 0xadd   : > { %4199 = vmatprep.subr.bf16.mxu0 %v10231_v18  ;;  %v10258_v18 = vld [vmem:[%s12887_s16 + $0x20] ss:$12 sps:$4 sm:$0xff]  }
 0xae0   : > { %4200 = vmatpush1.bf16.msra.mxu0 %v10229_v16  ;;  %v10262_v16 = vld [vmem:[%s12887_s16 + $0x38] ss:$12 sps:$4 sm:$0xff]  }
 0xae1   : > { %4201 = vmatprep.subr.bf16.mxu0 %v10235_v24  ;;  %v10266_v24 = vld [vmem:[%s12887_s16 + $0x50] ss:$12 sps:$4 sm:$0xff]  }
 0xae4   : > { %4202 = vmatpush1.bf16.msra.mxu0 %v10233_v29  ;;  %v10270_v29 = vld [vmem:[%s12887_s16 + $0x68] ss:$12 sps:$4 sm:$0xff]  }
 0xae5   : > { %4203 = vmatprep.subr.bf16.mxu0 %v10239_v26  ;;  %v10273_v26 = vld [vmem:[%s12887_s16 + $0x7c] ss:$12 sps:$4 sm:$0xff]  }
 0xae8   : > { %4204 = vmatpush1.bf16.msra.mxu0 %v10237_v28  ;;  %v10271_v28 = vld [vmem:[%s12887_s16 + $0x78] ss:$12 sps:$4 sm:$0xff]  }
 0xae9   : > { %4205 = vmatprep.subr.bf16.mxu0 %v10243_v36 }
 0xaec   : > { %4206 = vmatpush1.bf16.msra.mxu0 %v10241_v23 }
 0xba2   : > { %v4008_v49 = vpop.f32.mrb[172].mxu0 }
 0xba3   : > { %v4009_v38 = vadd.f32 %v8025_v2, %v4008_v49  ;;  %v9064_v41 = vpop.f32.mrb[173].mxu0 }
 0xba4   : > { %v10275_v41 = vld [vmem:[#allocation22 + $0x1c] sm:$0xff]  }
 0xba5   : > { %v4012_v48 = vmax.f32 %v4009_v38, 0.0 }
 0xba7   : > { %v4013_v50 = vpack.c.bf16 %v4012_v48, %v4012_v48 }
 0xba9   : > { %4224 = vmatmul.mubr.bf16.vlgmr.msra.gmra.mrb[176].mxu0 %v4013_v50  ;;  %9082 = vmatmul.mubr.bf16.vlgmr.msra.gmra.mrb[132].mxu1 %v4013_v50 }
 0xbaa   : > { %4647 = vmatprep.mubr.bf16.mxu1 %v11014_v0  ;;  %9087 = vmatprep.mubr.msk.bf16.mxu0 %vm3938_vm8, %v10245_v35 }
 0xbab   : > { %4616 = vmatpush1.bf16.msra.mxu1 %v10251_v59 }
 0xbac   : > { %4617 = vmatprep.subr.bf16.mxu1 %v10257_v3 }
 0xbaf   : > { %4618 = vmatpush1.bf16.msra.mxu1 %v10255_v42 }
 0xbb0   : > { %4619 = vmatprep.subr.bf16.mxu1 %v10261_v54 }
 0xbb3   : > { %4620 = vmatpush1.bf16.msra.mxu1 %v10259_v60 }
 0xbb4   : > { %4621 = vmatprep.subr.bf16.mxu1 %v10265_v58 }
 0xbb7   : > { %4622 = vmatpush1.bf16.msra.mxu1 %v10263_v52 }
 0xbb8   : > { %4623 = vmatprep.subr.bf16.mxu1 %v10269_v61 }
 0xbbb   : > { %4624 = vmatpush1.bf16.msra.mxu1 %v10267_v10 }
 0xbbc   : > { %4625 = vmatprep.subr.bf16.mxu1 %v10273_v26 }
 0xbbf   : > { %4626 = vmatpush1.bf16.msra.mxu1 %v10271_v28 }
 0xc7c   : > { %v4225_v31 = vpop.f32.mrb[176].mxu0  ;;  %v4266_v7 = vpop.f32.mrb[132].mxu1 }
 0xc7d   : > { %v4226_v33 = vadd.f32 %v4225_v31, %v4051_v4  ;;  %v4227_v44 = vpop.f32.mrb[177].mxu0  ;;  %v9083_v46 = vpop.f32.mrb[133].mxu1  ;;  %v4267_v1 = vadd.f32 %v4266_v7, %v4059_v30  ;;  %v10278_v31 = vld [vmem:[#allocation22 + $0x34] ss:$0 sps:$4 sm:$0xff]   ;;  %v10279_v30 = vld [vmem:[#allocation22] sm:$0xff]   ;;  %v10280_v7 = vld [vmem:[#allocation22 + $0x8] sm:$0xff]  }
 0xc7e   : > { %v4228_v47 = vadd.f32 %v4227_v44, %v4055_v22  ;;  %v4229_v21 = vpop.f32.mrb[178].mxu0  ;;  %v4269_v6 = vpop.f32.mrb[134].mxu1 }
 0xc7f   : > { %v4230_v11 = vpop.f32.mrb[179].mxu0  ;;  %v9084_v37 = vpop.f32.mrb[135].mxu1  ;;  %v4272_v34 = vmax.f32 %v4226_v33, 0.0  ;;  %v4274_v62 = vmax.f32 %v4267_v1, 0.0  ;;  %v10281_v33 = vld [vmem:[#allocation22 + $0x10] sm:$0xff]   ;;  %v10283_v21 = vld [vmem:[#allocation22 + $0x38] sm:$0xff]  }
 0xc80   : > { %v4273_v14 = vmax.f32 %v4228_v47, 0.0  ;;  %v10282_v47 = vld [vmem:[#allocation22 + $0x18] ss:$0 sps:$4 sm:$0xff]   ;;  %v10284_v6 = vld [vmem:[#allocation22 + $0x40] sm:$0xff]   ;;  %v10285_v11 = vld [vmem:[#allocation22 + $0x48] sm:$0xff]  }
 0xc81   : > { %v4275_v32 = vpack.c.bf16 %v4272_v34, %v4272_v34  ;;  %v4277_v57 = vpack.c.bf16 %v4274_v62, %v4274_v62  ;;  %v10286_v37 = vld [vmem:[#allocation22 + $0x50] ss:$0 sps:$4 sm:$0xff]   ;;  %v10287_v34 = vld [vmem:[%s12888_s29] ss:$12 sps:$4 sm:$0xff]  }
 0xc82   : > { %v4276_v17 = vpack.c.bf16 %v4273_v14, %v4273_v14  ;;  %v10289_v1 = vld [vmem:[%s12888_s29 + $0x4] ss:$12 sps:$4 sm:$0xff]   ;;  %v10292_v14 = vld [vmem:[%s12888_s29 + $0x1c] ss:$12 sps:$4 sm:$0xff]  }
 0xc83   : > { %v4365_v5 = vsel %vm3248_vm6, %v4275_v32, 0  ;;  %v4434_v13 = vsel %vm3248_vm6, %v4277_v57, 0  ;;  %5218 = vmatprep.subr.bf16.mxu1 %v10289_v1  ;;  %v10293_v62 = vld [vmem:[%s12888_s29 + $0x30] ss:$12 sps:$4 sm:$0xff]  }
 0xc84   : > { %9806 = vmatprep.subr.msk.bf16.mxu0 %vm3248_vm6, %v4276_v17  ;;  %v4300_v20 = vsel %vm3248_vm6, %v4276_v17, 0  ;;  %v10290_v17 = vld [vmem:[%s12888_s29 + $0x18] ss:$12 sps:$4 sm:$0xff]  }
 0xc85   : > { %9086 = vmatpush3.bf16.msra.mxu0 %v4300_v20  ;;  %v10298_v20 = vld [vmem:[%s12888_s29 + $0x4c] ss:$12 sps:$4 sm:$0xff]  }
 0xc86   : > { %9807 = vmatprep.subr.msk.bf16.mxu0 %vm3248_vm6, %v4275_v32  ;;  %v10295_v32 = vld [vmem:[%s12888_s29 + $0x34] ss:$12 sps:$4 sm:$0xff]  }
 0xc88   : > { %9088 = vmatmul.mubr.msk.bf16.vlgmr.msra.gmra.mrb[180].mxu0 %vm3938_vm8, %v10246_v40  ;;  %v10296_v40 = vld [vmem:[%s12888_s29 + $0x48] ss:$12 sps:$4 sm:$0xff]  }
 0xc89   : > { %9092 = vmatpush3.bf16.msra.mxu0 %v4365_v5  ;;  %9093 = vmatprep.mubr.msk.bf16.mxu0 %vm3938_vm8, %v10247_v43  ;;  %v10299_v43 = vld [vmem:[%s12888_s29 + $0x60] ss:$12 sps:$4 sm:$0xff]   ;;  %v10304_v5 = vld [vmem:[%s12888_s29 + $0x7c] ss:$12 sps:$4 sm:$0xff]  }
 0xc8a   : > { %9808 = vmatprep.subr.msk.bf16.mxu0 %vm3248_vm6, %v4277_v57  ;;  %v10301_v57 = vld [vmem:[%s12888_s29 + $0x64] ss:$12 sps:$4 sm:$0xff]  }
 0xc94   : > { %9094 = vmatmul.mubr.msk.bf16.vlgmr.msra.gmra.mrb[180].mxu0 %vm3938_vm8, %v10248_v8  ;;  %v10302_v8 = vld [vmem:[%s12888_s29 + $0x78] ss:$12 sps:$4 sm:$0xff]  }
 0xc95   : > { %9098 = vmatpush3.bf16.msra.mxu0 %v4434_v13  ;;  %9099 = vmatprep.mubr.msk.bf16.mxu0 %vm3938_vm8, %v10249_v45  ;;  %v10307_v45 = vld [vmem:[%s12888_s29 + $0x94] ss:$12 sps:$4 sm:$0xff]  }
 0xc96   : > { %9103 = vmatprep.subr.bf16.mxu0 %v10254_v12  ;;  %v10308_v13 = vld [vmem:[%s12888_s29 + $0x8] ss:$12 sps:$4 sm:$0xff]  }
 0xca0   : > { %9100 = vmatmul.mubr.msk.bf16.vlgmr.msra.gmra.mrb[180].mxu0 %vm3938_vm8, %v10250_v15 }
 0xca1   : > { %9104 = vmatpush3.bf16.msra.mxu0 %v10254_v12  ;;  %v10305_v12 = vld [vmem:[%s12888_s29 + $0x90] ss:$12 sps:$4 sm:$0xff]  }
 0xca2   : > { %9105 = vmatprep.subr.bf16.mxu0 %v10258_v18 }
 0xca5   : > { %9106 = vmatpush3.bf16.msra.mxu0 %v10258_v18 }
 0xca6   : > { %9107 = vmatprep.subr.bf16.mxu0 %v10262_v16 }
 0xca9   : > { %9108 = vmatpush3.bf16.msra.mxu0 %v10262_v16 }
 0xcaa   : > { %9109 = vmatprep.subr.bf16.mxu0 %v10266_v24 }
 0xcad   : > { %9110 = vmatpush3.bf16.msra.mxu0 %v10266_v24 }
 0xcae   : > { %9111 = vmatprep.subr.bf16.mxu0 %v10270_v29 }
 0xcb1   : > { %9112 = vmatpush3.bf16.msra.mxu0 %v10270_v29 }
 0xcb2   : > { %9113 = vmatprep.subr.bf16.mxu0 %v10274_v39 }
 0xcb5   : > { %9114 = vmatpush3.bf16.msra.mxu0 %v10274_v39 }
 0xd73   : > { %v9101_v36 = vpop.f32.mrb[180].mxu0 }
 0xd74   : > { %v4470_v23 = vpop.f32.mrb[181].mxu0  ;;  %v4488_v38 = vpack.c.bf16 %v9101_v36, %v9101_v36 }
 0xd75   : > { %v9102_v53 = vpop.f32.mrb[182].mxu0 }
 0xd76   : > { %v4473_v2 = vpop.f32.mrb[183].mxu0 }
 0xd77   : > { %v4487_v49 = vpack.c.bf16 %v4473_v2, %v4470_v23  ;;  %v8115_v2 = vld [vmem:[#allocation23] ss:$0 sm:$0xff] }
 0xd79   : > { %8087 = vmatmul.mubr.msk.bf16.vlgmr.msra.gmra.mrb[136].mxu1 %vm1687_vm2, %v4487_v49  ;;  %9115 = vmatprep.mubr.msk.bf16.mxu0 %vm1687_vm2, %v4487_v49 }
 0xd7a   : > { %9116 = vmatmul.mubr.msk.bf16.vlgmr.msra.gmra.mrb[184].mxu0 %vm1687_vm2, %v4488_v38  ;;  %4657 = vmatprep.mubr.bf16.mxu1 %v11014_v0 }
 0xd7b   : > { %9123 = vmatprep.mubr.msk.bf16.mxu0 %vm3686_vm7, %v10275_v41  ;;  %5219 = vmatpush1.bf16.msra.mxu1 %v10287_v34 }
 0xd7c   : > { %5220 = vmatprep.subr.bf16.mxu1 %v10292_v14 }
 0xd7f   : > { %5221 = vmatpush1.bf16.msra.mxu1 %v10290_v17 }
 0xd80   : > { %5222 = vmatprep.subr.bf16.mxu1 %v10295_v32 }
 0xd81   : > { %8088 = vmatmul.mubr.msk.bf16.gmra.mrb[140].mxu1 %vm1687_vm2, %v4488_v38 }
 0xd82   : > { %5250 = vmatprep.mubr.bf16.mxu1 %v11014_v0 }
 0xd83   : > { %5223 = vmatpush1.bf16.msra.mxu1 %v10293_v62 }
 0xd84   : > { %5224 = vmatprep.subr.bf16.mxu1 %v10298_v20 }
 0xd87   : > { %5225 = vmatpush1.bf16.msra.mxu1 %v10296_v40 }
 0xd88   : > { %5226 = vmatprep.subr.bf16.mxu1 %v10301_v57 }
 0xd8b   : > { %5227 = vmatpush1.bf16.msra.mxu1 %v10299_v43 }
 0xd8c   : > { %5228 = vmatprep.subr.bf16.mxu1 %v10304_v5 }
 0xd8f   : > { %5229 = vmatpush1.bf16.msra.mxu1 %v10302_v8 }
 0xd90   : > { %5230 = vmatprep.subr.bf16.mxu1 %v10307_v45 }
 0xd93   : > { %5231 = vmatpush1.bf16.msra.mxu1 %v10305_v12 }
 0xd94   : > { %9155 = vmatprep.subr.bf16.mxu1 %v10308_v13 }
 0xe4c   : > { %v4649_v48 = vpop.f32.mrb[136].mxu1 }
 0xe4d   : > { %v4651_v50 = vpop.f32.mrb[137].mxu1  ;;  %v9117_v35 = vpop.f32.mrb[184].mxu0 }
 0xe4e   : > { %v4653_v59 = vpop.f32.mrb[138].mxu1  ;;  %v4700_v63 = vpop.f32.mrb[185].mxu0  ;;  %v4719_v44 = vpack.c.bf16 %v9117_v35, %v9117_v35 }
 0xe4f   : > { %v4714_v3 = vpack.c.bf16 %v4653_v59, %v4649_v48  ;;  %v4655_v42 = vpop.f32.mrb[139].mxu1  ;;  %v9118_v54 = vpop.f32.mrb[186].mxu0 }
 0xe50   : > { %v4715_v60 = vpack.c.bf16 %v4655_v42, %v4651_v50  ;;  %v4703_v58 = vpop.f32.mrb[187].mxu0  ;;  %v4968_v46 = vsel %vm3248_vm6, %v4719_v44, 0 }
 0xe51   : > { %v4716_v52 = vpack.c.bf16 %v4703_v58, %v4700_v63 }
 0xe52   : > { %9119 = vmatprep.subr.bf16.mxu0 %v4715_v60 }
 0xe53   : > { %9120 = vmatpush3.bf16.msra.mxu0 %v4715_v60 }
 0xe54   : > { %v4659_v61 = vpop.f32.mrb[140].mxu1 }
 0xe55   : > { %v4661_v10 = vpop.f32.mrb[141].mxu1  ;;  %v4717_v4 = vpack.c.bf16 %v4659_v61, %v4659_v61 }
 0xe56   : > { %v4718_v25 = vpack.c.bf16 %v4661_v10, %v4661_v10  ;;  %v4663_v9 = vpop.f32.mrb[142].mxu1  ;;  %v10309_v10 = vld [vmem:[%s12888_s29 + $0x20] ss:$12 sps:$4 sm:$0xff]  }
 0xe57   : > { %v4664_v56 = vpop.f32.mrb[143].mxu1  ;;  %v4863_v22 = vsel %vm3248_vm6, %v4717_v4, 0 }
 0xe58   : > { %v4766_v19 = vsel %vm3248_vm6, %v4718_v25, 0  ;;  %9809 = vmatprep.subr.msk.bf16.mxu0 %vm3248_vm6, %v4718_v25 }
 0xe59   : > { %9122 = vmatpush3.bf16.msra.mxu0 %v4766_v19 }
 0xe5a   : > { %9131 = vmatprep.subr.bf16.mxu0 %v4714_v3 }
 0xe5c   : > { %9124 = vmatmul.mubr.msk.bf16.vlgmr.msra.gmra.mrb[188].mxu0 %vm3686_vm7, %v10276_v55 }
 0xe5d   : > { %9132 = vmatpush3.bf16.msra.mxu0 %v4714_v3  ;;  %9127 = vmatprep.mubr.msk.bf16.mxu0 %vm3686_vm7, %v10277_v27 }
 0xe5e   : > { %9810 = vmatprep.subr.msk.bf16.mxu0 %vm3248_vm6, %v4717_v4 }
 0xe61   : > { %9134 = vmatpush3.bf16.msra.mxu0 %v4863_v22  ;;  %v10310_v22 = vld [vmem:[%s12888_s29 + $0x38] ss:$12 sps:$4 sm:$0xff]  }
 0xe62   : > { %9143 = vmatprep.subr.bf16.mxu0 %v4716_v52 }
 0xe64   : > { %9128 = vmatmul.mubr.msk.bf16.gmra.mrb[192].mxu0 %vm3686_vm7, %v10278_v31 }
 0xe65   : > { %9135 = vmatprep.mubr.msk.bf16.mxu0 %vm3686_vm7, %v10279_v30 }
 0xe6c   : > { %9136 = vmatmul.mubr.msk.bf16.vlgmr.msra.gmra.mrb[188].mxu0 %vm3686_vm7, %v10280_v7 }
 0xe6d   : > { %9144 = vmatpush3.bf16.msra.mxu0 %v4716_v52  ;;  %9139 = vmatprep.mubr.msk.bf16.mxu0 %vm3686_vm7, %v10281_v33  ;;  %v10311_v33 = vld [vmem:[%s12888_s29 + $0x50] ss:$12 sps:$4 sm:$0xff]  }
 0xe6e   : > { %9811 = vmatprep.subr.msk.bf16.mxu0 %vm3248_vm6, %v4719_v44 }
 0xe71   : > { %9146 = vmatpush3.bf16.msra.mxu0 %v4968_v46  ;;  %v10312_v46 = vld [vmem:[%s12888_s29 + $0x68] ss:$12 sps:$4 sm:$0xff]  }
 0xe72   : > { %9177 = vmatprep.subr.bf16.mxu0 %v11015_v51 }
 0xe74   : > { %9140 = vmatmul.mubr.msk.bf16.gmra.mrb[196].mxu0 %vm3686_vm7, %v10282_v47 }
 0xe75   : > { %9147 = vmatprep.mubr.msk.bf16.mxu0 %vm3686_vm7, %v10283_v21  ;;  %v10313_v21 = vld [vmem:[%s12888_s29 + $0x80] ss:$12 sps:$4 sm:$0xff]  }
 0xe7c   : > { %9148 = vmatmul.mubr.msk.bf16.vlgmr.msra.gmra.mrb[188].mxu0 %vm3686_vm7, %v10284_v6 }
 0xe7d   : > { %9151 = vmatprep.mubr.msk.bf16.mxu0 %vm3686_vm7, %v10285_v11  ;;  %v10314_v11 = vld [vmem:[%s12888_s29 + $0x98] ss:$12 sps:$4 sm:$0xff]  }
 0xe84   : > { %9152 = vmatmul.mubr.msk.bf16.gmra.mrb[200].mxu0 %vm3686_vm7, %v10286_v37 }
 0xe85   : > { %9185 = vmatprep.mubr.msk.bf16.mxu0 %vm11016_vm3, %v11015_v51 }
 0xf37   : > { %v9129_v15 = vpop.f32.mrb[192].mxu0 }
 0xf38   : > { %v4818_v18 = vpop.f32.mrb[193].mxu0 }
 0xf39   : > { %v9130_v16 = vpop.f32.mrb[194].mxu0 }
 0xf3a   : > { %v4821_v24 = vpop.f32.mrb[195].mxu0 }
 0xf47   : > { %v9141_v29 = vpop.f32.mrb[196].mxu0 }
 0xf48   : > { %v4924_v26 = vadd.f32 %v9141_v29, %v9129_v15  ;;  %v4915_v28 = vpop.f32.mrb[197].mxu0 }
 0xf49   : > { %v4916_v39 = vadd.f32 %v4915_v28, %v4818_v18  ;;  %v9142_v36 = vpop.f32.mrb[198].mxu0 }
 0xf4a   : > { %v4918_v23 = vpop.f32.mrb[199].mxu0 }
 0xf4b   : > { %v4919_v53 = vadd.f32 %v4918_v23, %v4821_v24  ;;  %v10316_v23 = vld [vmem:[%s12889_s7] sm:$0xff]   ;;  %s9812_s7 = smul.u32 224, %s12814_s11 }
 0xf4d   : > { %s12673_s11 = scalar_lea.vmem [#allocation26], %s9812_s7  ;;  %s8416_s7 = smul.u32 3584, %s11197_s0 }
 0xf4e   : > { %s12892_s0 = sand.u32 1, %s10954_s10  }
 0xf4f   : > { %v9149_v49 = vpop.f32.mrb[188].mxu0  ;;  %s12744_s2 = scalar_lea.hbm %s11174_s4, %s8416_s7  ;;  %s12752_s3 = scalar_lea.sflag [#allocation4], %s12892_s0 }
 0xf50   : > { %v5050_v38 = vadd.f32 %v9149_v49, %v8115_v2  ;;  %v5004_v41 = vpop.f32.mrb[189].mxu0 }
 0xf51   : > { %v5048_v48 = vadd.f32 %v8115_v2, %v5004_v41  ;;  %v9150_v50 = vpop.f32.mrb[190].mxu0 }
 0xf52   : > { %v5051_v35 = vadd.f32 %v9150_v50, %v8115_v2  ;;  %v5007_v59 = vpop.f32.mrb[191].mxu0  ;;  %v5057_v3 = vmax.f32 %v5050_v38, 0.0 }
 0xf53   : > { %v5049_v63 = vadd.f32 %v8115_v2, %v5007_v59  ;;  %v5055_v54 = vmax.f32 %v5048_v48, 0.0 }
 0xf54   : > { %v5058_v42 = vmax.f32 %v5051_v35, 0.0  ;;  %v10318_v35 = vld [vmem:[%s12890_s1 + $0x8] sm:$0xff]  }
 0xf55   : > { %v5056_v60 = vmax.f32 %v5049_v63, 0.0  ;;  %v10317_v63 = vld [vmem:[%s12890_s1 + $0x40] sm:$0xff]  }
 0xf56   : > { %v5063_v58 = vpack.c.bf16 %v5058_v42, %v5057_v3 }
 0xf57   : > { %v5062_v52 = vpack.c.bf16 %v5056_v60, %v5055_v54  ;;  %v9153_v61 = vpop.f32.mrb[200].mxu0 }
 0xf58   : > { %v5040_v25 = vadd.f32 %v9153_v61, %v4924_v26  ;;  %v5020_v9 = vpop.f32.mrb[201].mxu0  ;;  %v10319_v61 = vld [vmem:[%s12890_s1 + $0x48] sm:$0xff]  }
 0xf59   : > { %v5038_v56 = vadd.f32 %v5020_v9, %v4916_v39  ;;  %v9154_v19 = vpop.f32.mrb[202].mxu0  ;;  %8137 = vmatmul.mubr.msk.bf16.vlgmr.msra.gmra.mrb[144].mxu1 %vm2355_vm4, %v5062_v52  ;;  %v10322_v9 = vld [vmem:[%s12890_s1 + $0x18] sm:$0xff]  }
 0xf5a   : > { %v5023_v55 = vpop.f32.mrb[203].mxu0  ;;  %9156 = vmatpush3.bf16.msra.mxu1 %v10308_v13  ;;  %5260 = vmatprep.mubr.bf16.mxu1 %v11014_v0  ;;  %v5054_v47 = vadd.f32 %v8115_v2, %v5040_v25  ;;  %v10324_v19 = vld [vmem:[%s12890_s1 + $0x20] sm:$0xff]  }
 0xf5b   : > { %v5052_v27 = vadd.f32 %v8115_v2, %v5038_v56  ;;  %v5039_v4 = vadd.f32 %v5023_v55, %v4919_v53  ;;  %9157 = vmatprep.subr.bf16.mxu1 %v10309_v10  ;;  %v10321_v56 = vld [vmem:[%s12890_s1 + $0x50] sm:$0xff]   ;;  %v10323_v55 = vld [vmem:[%s12890_s1 + $0x58] sm:$0xff]  }
 0xf5c   : > { %v5061_v6 = vmax.f32 %v5054_v47, 0.0  ;;  %v10334_v47 = vld [vmem:[%s12890_s1 + $0x98] sm:$0xff]  }
 0xf5d   : > { %v5053_v31 = vadd.f32 %v8115_v2, %v5039_v4  ;;  %v5059_v30 = vmax.f32 %v5052_v27, 0.0  ;;  %v10315_v2 = vld [vmem:[%s12890_s1 + $0x38] sm:$0xff]   ;;  %v10326_v27 = vld [vmem:[%s12890_s1 + $0x28] sm:$0xff]   ;;  %v10325_v4 = vld [vmem:[%s12890_s1 + $0x60] sm:$0xff]  }
 0xf5e   : > { %9158 = vmatpush3.bf16.msra.mxu1 %v10309_v10  ;;  %v5065_v37 = vpack.c.bf16 %v5061_v6, %v5061_v6  ;;  %v5906_v6 = vld [vmem:[%s11164_s25 + $0x20] sm:$0xff] }
 0xf5f   : > { %v5060_v7 = vmax.f32 %v5053_v31, 0.0  ;;  %9159 = vmatprep.subr.bf16.mxu1 %v10310_v22  ;;  %v10327_v31 = vld [vmem:[%s12890_s1 + $0x68] sm:$0xff]  }
 0xf61   : > { %v5064_v44 = vpack.c.bf16 %v5060_v7, %v5059_v30  ;;  %8138 = vmatmul.mubr.msk.bf16.gmra.mrb[148].mxu1 %vm2355_vm4, %v5063_v58  ;;  %v10329_v30 = vld [vmem:[%s12890_s1 + $0x70] sm:$0xff]   ;;  %v10330_v7 = vld [vmem:[%s12890_s1 + $0x78] sm:$0xff]  }
 0xf62   : > { %9160 = vmatpush3.bf16.msra.mxu1 %v10310_v22  ;;  %5270 = vmatprep.mubr.bf16.mxu1 %v11014_v0  ;;  %v10328_v22 = vld [vmem:[%s12890_s1 + $0x30] sm:$0xff]  }
 0xf63   : > { %9161 = vmatprep.subr.bf16.mxu1 %v10311_v33 }
 0xf66   : > { %9162 = vmatpush3.bf16.msra.mxu1 %v10311_v33  ;;  %v10331_v33 = vld [vmem:[%s12890_s1 + $0x80] sm:$0xff]  }
 0xf67   : > { %9163 = vmatprep.subr.bf16.mxu1 %v10312_v46 }
 0xf69   : > { %8139 = vmatmul.mubr.msk.bf16.gmra.mrb[152].mxu1 %vm2355_vm4, %v5064_v44 }
 0xf6a   : > { %9164 = vmatpush3.bf16.msra.mxu1 %v10312_v46  ;;  %5280 = vmatprep.mubr.bf16.mxu1 %v11014_v0  ;;  %v10333_v46 = vld [vmem:[%s12890_s1 + $0x90] sm:$0xff]  }
 0xf6b   : > { %9165 = vmatprep.subr.bf16.mxu1 %v10313_v21 }
 0xf6e   : > { %9166 = vmatpush3.bf16.msra.mxu1 %v10313_v21  ;;  %v5903_v21 = vld [vmem:[%s11164_s25 + $0x8] sm:$0xff] }
 0xf6f   : > { %9167 = vmatprep.subr.bf16.mxu1 %v10314_v11 }
 0xf71   : > { %8140 = vmatmul.mubr.msk.bf16.gmra.mrb[156].mxu1 %vm2355_vm4, %v5065_v37 }
 0xf72   : > { %9169 = vmatprep.mubr.msk.bf16.mxu1 %vm2355_vm4, %v5062_v52  ;;  %9168 = vmatpush3.bf16.msra.mxu1 %v10314_v11  ;;  %v5902_v11 = vld [vmem:[%s11164_s25] sm:$0xff] }
 0xf73   : > { %9213 = vmatprep.subr.bf16.mxu1 %v11015_v51 }
 0xf79   : > { %9170 = vmatmul.mubr.msk.bf16.vlgmr.msra.gmra.mrb[160].mxu1 %vm2355_vm4, %v5063_v58  ;;  %v10320_v58 = vld [vmem:[%s12890_s1 + $0x10] sm:$0xff]  }
 0xf7a   : > { %9173 = vmatprep.mubr.msk.bf16.mxu1 %vm2355_vm4, %v5064_v44  ;;  %v10332_v44 = vld [vmem:[%s12890_s1 + $0x88] sm:$0xff]  }
 0xf81   : > { %9174 = vmatmul.mubr.msk.bf16.gmra.mrb[164].mxu1 %vm2355_vm4, %v5065_v37  ;;  %v9568_v37 = vpack.c.bf16 %v5906_v6, %v5903_v21 }
 0xf82   : > { %9221 = vmatprep.mubr.msk.bf16.mxu1 %vm11016_vm3, %v11015_v51 }
0x102c   : > { %v5252_v0 = vpop.f32.mrb[144].mxu1 }
0x102d   : > { %v5254_v34 = vpop.f32.mrb[145].mxu1 }
0x102e   : > { %v5256_v1 = vpop.f32.mrb[146].mxu1 }
0x102f   : > { %v5353_v14 = vpack.c.bf16 %v5256_v1, %v5252_v0  ;;  %v5258_v17 = vpop.f32.mrb[147].mxu1  ;;  %v5905_v0 = vld [vmem:[%s11164_s25 + $0x18] sm:$0xff]  ;;  %v10335_v1 = vld [vmem:[%s12890_s1 + $0xa0] sm:$0xff]   ;;  %s7496_s1 = sshll.u32 %s12673_s11, 4  ;;  %s12741_s1 = int_to_ptr.vmem [resolvable:$true] %s7496_s1 }
0x1030   : > { %v5354_v32 = vpack.c.bf16 %v5258_v17, %v5254_v34  ;;  %v9570_v34 = vpack.c.bf16 %v5905_v0, %v5902_v11  ;;  %v5912_v17 = vld [vmem:[%s11164_s25 + $0x50] sm:$0xff]  ;;  %p10875_p6 = scmp.lt.s32.totalorder %s12741_s1, %s10873_s8 }
0x1031   : > { %9214 = vmatpush3.bf16.msra.mxu1 %v5353_v14  ;;  %v5909_v14 = vld [vmem:[%s11164_s25 + $0x38] sm:$0xff] }
0x1032   : > { %9178 = vmatpush3.bf16.msra.mxu0 %v5354_v32  ;;  %9215 = vmatprep.subr.bf16.mxu1 %v11015_v51  ;;  %v5908_v32 = vld [vmem:[%s11164_s25 + $0x30] sm:$0xff] }
0x1033   : > { %9179 = vmatprep.subr.bf16.mxu0 %v11015_v51 }
0x1034   : > { %v5262_v62 = vpop.f32.mrb[148].mxu1 }
0x1035   : > { %v5264_v20 = vpop.f32.mrb[149].mxu1 }
0x1036   : > { %v5266_v40 = vpop.f32.mrb[150].mxu1 }
0x1037   : > { %v5356_v43 = vpack.c.bf16 %v5266_v40, %v5262_v62  ;;  %v5268_v57 = vpop.f32.mrb[151].mxu1  ;;  %v9572_v62 = vpack.c.bf16 %v5912_v17, %v5909_v14 }
0x1038   : > { %v5357_v5 = vpack.c.bf16 %v5268_v57, %v5264_v20  ;;  %v5911_v20 = vld [vmem:[%s11164_s25 + $0x48] sm:$0xff]  ;;  %v5918_v57 = vld [vmem:[%s11164_s25 + $0x80] sm:$0xff] }
0x1039   : > { %9216 = vmatpush3.bf16.msra.mxu1 %v5356_v43  ;;  %v9574_v40 = vpack.c.bf16 %v5911_v20, %v5908_v32  ;;  %v5915_v43 = vld [vmem:[%s11164_s25 + $0x68] sm:$0xff] }
0x103a   : > { %9180 = vmatpush3.bf16.msra.mxu0 %v5357_v5  ;;  %9217 = vmatprep.subr.bf16.mxu1 %v11015_v51  ;;  %v5914_v5 = vld [vmem:[%s11164_s25 + $0x60] sm:$0xff] }
0x103b   : > { %9181 = vmatprep.subr.bf16.mxu0 %v11015_v51 }
0x103c   : > { %v5272_v8 = vpop.f32.mrb[152].mxu1 }
0x103d   : > { %v5274_v45 = vpop.f32.mrb[153].mxu1 }
0x103e   : > { %v5276_v12 = vpop.f32.mrb[154].mxu1 }
0x103f   : > { %v5359_v13 = vpack.c.bf16 %v5276_v12, %v5272_v8  ;;  %v5278_v15 = vpop.f32.mrb[155].mxu1  ;;  %v9576_v8 = vpack.c.bf16 %v5918_v57, %v5915_v43 }
0x1040   : > { %v5360_v18 = vpack.c.bf16 %v5278_v15, %v5274_v45  ;;  %v5917_v45 = vld [vmem:[%s11164_s25 + $0x78] sm:$0xff]  ;;  %v5924_v15 = vld [vmem:[%s11164_s25 + $0xb0] sm:$0xff] }
0x1041   : > { %9218 = vmatpush3.bf16.msra.mxu1 %v5359_v13  ;;  %v9578_v12 = vpack.c.bf16 %v5917_v45, %v5914_v5  ;;  %v5921_v13 = vld [vmem:[%s11164_s25 + $0x98] sm:$0xff] }
0x1042   : > { %9182 = vmatpush3.bf16.msra.mxu0 %v5360_v18  ;;  %9219 = vmatprep.subr.bf16.mxu1 %v11015_v51  ;;  %v5920_v18 = vld [vmem:[%s11164_s25 + $0x90] sm:$0xff] }
0x1043   : > { %9183 = vmatprep.subr.bf16.mxu0 %v11015_v51 }
0x1044   : > { %v5282_v16 = vpop.f32.mrb[156].mxu1 }
0x1045   : > { %v5362_v24 = vpack.c.bf16 %v5282_v16, %v5282_v16  ;;  %v5284_v29 = vpop.f32.mrb[157].mxu1  ;;  %v9580_v16 = vpack.c.bf16 %v5924_v15, %v5921_v13 }
0x1046   : > { %v5363_v26 = vpack.c.bf16 %v5284_v29, %v5284_v29  ;;  %v5286_v28 = vpop.f32.mrb[158].mxu1  ;;  %v5904_v29 = vld [vmem:[%s11164_s25 + $0x10] sm:$0xff] }
0x1047   : > { %v5599_v39 = vsel %vm3248_vm6, %v5362_v24, 0  ;;  %v5287_v36 = vpop.f32.mrb[159].mxu1  ;;  %v5923_v24 = vld [vmem:[%s11164_s25 + $0xa8] sm:$0xff] }
0x1048   : > { %v5451_v53 = vsel %vm3248_vm6, %v5363_v26, 0  ;;  %9220 = vmatpush3.bf16.msra.mxu1 %v5599_v39  ;;  %v5907_v26 = vld [vmem:[%s11164_s25 + $0x28] sm:$0xff]  ;;  %v9582_v28 = vpack.c.bf16 %v5923_v24, %v5920_v18  ;;  %v5910_v36 = vld [vmem:[%s11164_s25 + $0x40] sm:$0xff] }
0x1049   : > { %9184 = vmatpush3.bf16.msra.mxu0 %v5451_v53  ;;  %9569 = vmatprep.subr.bf16.mxu1 %v9568_v37  ;;  %v9596_v39 = vpack.c.bf16 %v5907_v26, %v5904_v29 }
0x104a   : > { %9249 = vmatprep.subr.bf16.mxu0 %v11015_v51 }
0x104b   : > { %9222 = vmatmul.mubr.msk.bf16.vlgmr.msra.gmra.mrb[168].mxu1 %vm3241_vm5, %v10316_v23  ;;  %v5913_v23 = vld [vmem:[%s11164_s25 + $0x58] sm:$0xff] }
0x104c   : > { %v9171_v49 = vpop.f32.mrb[160].mxu1  ;;  %9186 = vmatmul.mubr.msk.bf16.vlgmr.msra.gmra.mrb[204].mxu0 %vm3241_vm5, %v10315_v2  ;;  %9225 = vmatprep.mubr.msk.bf16.mxu1 %vm11016_vm3, %v11015_v51  ;;  %v9600_v53 = vpack.c.bf16 %v5913_v23, %v5910_v36  ;;  %v5927_v2 = vld [vmem:[%s11164_s25 + $0xc8] sm:$0xff] }
0x104d   : > { %v5323_v38 = vpop.f32.mrb[161].mxu1  ;;  %9189 = vmatprep.mubr.msk.bf16.mxu0 %vm11016_vm3, %v11015_v51  ;;  %9571 = vmatpush1.bf16.msra.mxu1 %v9570_v34 }
0x104e   : > { %v9172_v41 = vpop.f32.mrb[162].mxu1  ;;  %9573 = vmatprep.subr.bf16.mxu1 %v9572_v62 }
0x104f   : > { %v5358_v48 = vpack.c.bf16 %v9172_v41, %v9171_v49  ;;  %v5326_v50 = vpop.f32.mrb[163].mxu1  ;;  %v5930_v49 = vld [vmem:[%s11164_s25 + $0xe0] sm:$0xff] }
0x1050   : > { %v5355_v59 = vpack.c.bf16 %v5326_v50, %v5323_v38  ;;  %v5926_v38 = vld [vmem:[%s11164_s25 + $0xc0] sm:$0xff]  ;;  %v9584_v41 = vpack.c.bf16 %v5930_v49, %v5927_v2  ;;  %v5916_v50 = vld [vmem:[%s11164_s25 + $0x70] sm:$0xff] }
0x1051   : > { %9575 = vmatpush1.bf16.msra.mxu1 %v9574_v40 }
0x1052   : > { %9250 = vmatpush3.bf16.msra.mxu0 %v5355_v59  ;;  %9577 = vmatprep.subr.bf16.mxu1 %v9576_v8 }
0x1053   : > { %9226 = vmatmul.mubr.msk.bf16.gmra.mrb[172].mxu1 %vm3241_vm5, %v10318_v35  ;;  %9251 = vmatprep.subr.bf16.mxu0 %v11015_v51  ;;  %v5919_v35 = vld [vmem:[%s11164_s25 + $0x88] sm:$0xff] }
0x1054   : > { %v9175_v3 = vpop.f32.mrb[164].mxu1  ;;  %9190 = vmatmul.mubr.msk.bf16.gmra.mrb[208].mxu0 %vm3241_vm5, %v10317_v63  ;;  %9229 = vmatprep.mubr.msk.bf16.mxu1 %vm11016_vm3, %v11015_v51  ;;  %v9604_v63 = vpack.c.bf16 %v5919_v35, %v5916_v50 }
0x1055   : > { %v5339_v42 = vpop.f32.mrb[165].mxu1  ;;  %9193 = vmatprep.mubr.msk.bf16.mxu0 %vm11016_vm3, %v11015_v51  ;;  %v5364_v10 = vpack.c.bf16 %v9175_v3, %v9175_v3  ;;  %9579 = vmatpush1.bf16.msra.mxu1 %v9578_v12  ;;  %v5922_v3 = vld [vmem:[%s11164_s25 + $0xa0] sm:$0xff] }
0x1056   : > { %v9176_v54 = vpop.f32.mrb[166].mxu1  ;;  %9252 = vmatpush3.bf16.msra.mxu0 %v5358_v48  ;;  %9581 = vmatprep.subr.bf16.mxu1 %v9580_v16  ;;  %v5929_v48 = vld [vmem:[%s11164_s25 + $0xd8] sm:$0xff] }
0x1057   : > { %v5342_v60 = vpop.f32.mrb[167].mxu1  ;;  %9253 = vmatprep.subr.bf16.mxu0 %v11015_v51  ;;  %v5762_v25 = vsel %vm3248_vm6, %v5364_v10, 0  ;;  %v9586_v59 = vpack.c.bf16 %v5929_v48, %v5926_v38  ;;  %v5935_v10 = vld [vmem:[%s11164_s25 + $0x108] sm:$0xff] }
0x1058   : > { %v5361_v52 = vpack.c.bf16 %v5342_v60, %v5339_v42  ;;  %v5925_v42 = vld [vmem:[%s11164_s25 + $0xb8] sm:$0xff] }
0x1059   : > { %9583 = vmatpush1.bf16.msra.mxu1 %v9582_v28  ;;  %v9608_v54 = vpack.c.bf16 %v5925_v42, %v5922_v3  ;;  %v5933_v60 = vld [vmem:[%s11164_s25 + $0xf8] sm:$0xff] }
0x105a   : > { %9254 = vmatpush3.bf16.msra.mxu0 %v5361_v52  ;;  %9585 = vmatprep.subr.bf16.mxu1 %v9584_v41  ;;  %v5932_v52 = vld [vmem:[%s11164_s25 + $0xf0] sm:$0xff] }
0x105b   : > { %9230 = vmatmul.mubr.msk.bf16.gmra.mrb[176].mxu1 %vm3241_vm5, %v10320_v58  ;;  %9255 = vmatprep.subr.bf16.mxu0 %v11015_v51  ;;  %v5936_v58 = vld [vmem:[%s11164_s25 + $0x110] sm:$0xff] }
0x105c   : > { %9194 = vmatmul.mubr.msk.bf16.gmra.mrb[212].mxu0 %vm3241_vm5, %v10319_v61  ;;  %9233 = vmatprep.mubr.msk.bf16.mxu1 %vm11016_vm3, %v11015_v51  ;;  %v9588_v61 = vpack.c.bf16 %v5936_v58, %v5933_v60 }
0x105d   : > { %9197 = vmatprep.mubr.msk.bf16.mxu0 %vm11016_vm3, %v11015_v51  ;;  %9587 = vmatpush1.bf16.msra.mxu1 %v9586_v59 }
0x105e   : > { %9256 = vmatpush3.bf16.msra.mxu0 %v5762_v25  ;;  %v5928_v25 = vld [vmem:[%s11164_s25 + $0xd0] sm:$0xff]  ;;  %9589 = vmatprep.subr.bf16.mxu1 %v9588_v61 }
0x105f   : > { %9597 = vmatprep.subr.bf16.mxu0 %v9596_v39 }
0x1063   : > { %9234 = vmatmul.mubr.msk.bf16.gmra.mrb[180].mxu1 %vm3241_vm5, %v10322_v9  ;;  %v5931_v9 = vld [vmem:[%s11164_s25 + $0xe8] sm:$0xff] }
0x1064   : > { %9198 = vmatmul.mubr.msk.bf16.gmra.mrb[216].mxu0 %vm3241_vm5, %v10321_v56  ;;  %9237 = vmatprep.mubr.msk.bf16.mxu1 %vm11016_vm3, %v11015_v51  ;;  %v9590_v56 = vpack.c.bf16 %v5935_v10, %v5932_v52 }
0x1065   : > { %9201 = vmatprep.mubr.msk.bf16.mxu0 %vm11016_vm3, %v11015_v51 }
0x1066   : > { %9591 = vmatpush1.bf16.msra.mxu1 %v9590_v56 }
0x106b   : > { %9238 = vmatmul.mubr.msk.bf16.gmra.mrb[184].mxu1 %vm3241_vm5, %v10324_v19  ;;  %v9612_v19 = vpack.c.bf16 %v5931_v9, %v5928_v25 }
0x106c   : > { %9202 = vmatmul.mubr.msk.bf16.gmra.mrb[220].mxu0 %vm3241_vm5, %v10323_v55  ;;  %9241 = vmatprep.mubr.msk.bf16.mxu1 %vm11016_vm3, %v11015_v51  ;;  %v5934_v55 = vld [vmem:[%s11164_s25 + $0x100] sm:$0xff] }
0x106d   : > { %9205 = vmatprep.mubr.msk.bf16.mxu0 %vm11016_vm3, %v11015_v51 }
0x1073   : > { %9242 = vmatmul.mubr.msk.bf16.gmra.mrb[188].mxu1 %vm3241_vm5, %v10326_v27  ;;  %v5937_v27 = vld [vmem:[%s11164_s25 + $0x118] sm:$0xff] }
0x1074   : > { %9206 = vmatmul.mubr.msk.bf16.gmra.mrb[224].mxu0 %vm3241_vm5, %v10325_v4  ;;  %9245 = vmatprep.mubr.msk.bf16.mxu1 %vm11016_vm3, %v11015_v51  ;;  %v9616_v4 = vpack.c.bf16 %v5937_v27, %v5934_v55 }
0x1075   : > { %9209 = vmatprep.mubr.msk.bf16.mxu0 %vm11016_vm3, %v11015_v51 }
0x107b   : > { %9246 = vmatmul.mubr.msk.bf16.gmra.mrb[192].mxu1 %vm3241_vm5, %v10328_v22  ;;  %v5939_v22 = vld [vmem:[%s11164_s25 + $0x128] sm:$0xff] }
0x107c   : > { %9210 = vmatmul.mubr.msk.bf16.gmra.mrb[228].mxu0 %vm3241_vm5, %v10327_v31  ;;  %6050 = vmatprep.mubr.f32.mxu1 %v11015_v51  ;;  %v5942_v31 = vld [vmem:[%s11164_s25 + $0x140] sm:$0xff] }
0x107d   : > { %9257 = vmatprep.mubr.msk.bf16.mxu0 %vm11016_vm3, %v11015_v51 }
0x1084   : > { %9258 = vmatmul.mubr.msk.bf16.vlgmr.msra.gmra.mrb[232].mxu0 %vm3241_vm5, %v10329_v30  ;;  %v9592_v30 = vpack.c.bf16 %v5942_v31, %v5939_v22 }
0x1085   : > { %9261 = vmatprep.mubr.msk.bf16.mxu0 %vm11016_vm3, %v11015_v51  ;;  %9599 = vmatpush3.bf16.msra.mxu0 %v9596_v39 }
0x1086   : > { %9601 = vmatprep.subr.bf16.mxu0 %v9600_v53  ;;  %9593 = vmatprep.subr.bf16.mxu1 %v9592_v30 }
0x1089   : > { %9603 = vmatpush3.bf16.msra.mxu0 %v9600_v53 }
0x108a   : > { %9605 = vmatprep.subr.bf16.mxu0 %v9604_v63 }
0x108c   : > { %9262 = vmatmul.mubr.msk.bf16.gmra.mrb[236].mxu0 %vm3241_vm5, %v10330_v7  ;;  %v5938_v7 = vld [vmem:[%s11164_s25 + $0x120] sm:$0xff] }
0x108d   : > { %9265 = vmatprep.mubr.msk.bf16.mxu0 %vm11016_vm3, %v11015_v51  ;;  %9607 = vmatpush3.bf16.msra.mxu0 %v9604_v63 }
0x108e   : > { %9609 = vmatprep.subr.bf16.mxu0 %v9608_v54 }
0x1091   : > { %9611 = vmatpush3.bf16.msra.mxu0 %v9608_v54 }
0x1092   : > { %9613 = vmatprep.subr.bf16.mxu0 %v9612_v19 }
0x1094   : > { %9266 = vmatmul.mubr.msk.bf16.gmra.mrb[240].mxu0 %vm3241_vm5, %v10331_v33  ;;  %v5941_v33 = vld [vmem:[%s11164_s25 + $0x138] sm:$0xff] }
0x1095   : > { %9269 = vmatprep.mubr.msk.bf16.mxu0 %vm11016_vm3, %v11015_v51  ;;  %9615 = vmatpush3.bf16.msra.mxu0 %v9612_v19 }
0x1096   : > { %9617 = vmatprep.subr.bf16.mxu0 %v9616_v4 }
0x1099   : > { %9619 = vmatpush3.bf16.msra.mxu0 %v9616_v4 }
0x109c   : > { %9270 = vmatmul.mubr.msk.bf16.gmra.mrb[244].mxu0 %vm3241_vm5, %v10332_v44  ;;  %v9594_v44 = vpack.c.bf16 %v5941_v33, %v5938_v7 }
0x109d   : > { %9273 = vmatprep.mubr.msk.bf16.mxu0 %vm11016_vm3, %v11015_v51 }
0x109e   : > { %9595 = vmatpush1.bf16.msra.mxu1 %v9594_v44 }
0x10a4   : > { %9274 = vmatmul.mubr.msk.bf16.gmra.mrb[248].mxu0 %vm3241_vm5, %v10333_v46  ;;  %v5940_v46 = vld [vmem:[%s11164_s25 + $0x130] sm:$0xff] }
0x10a5   : > { %9277 = vmatprep.mubr.msk.bf16.mxu0 %vm11016_vm3, %v11015_v51 }
0x10ac   : > { %9278 = vmatmul.mubr.msk.bf16.gmra.mrb[252].mxu0 %vm3241_vm5, %v10334_v47  ;;  %v5943_v47 = vld [vmem:[%s11164_s25 + $0x148] sm:$0xff] }
0x10ad   : > { %9281 = vmatprep.mubr.msk.bf16.mxu0 %vm11016_vm3, %v11015_v51  ;;  %v9620_v21 = vpack.c.bf16 %v5943_v47, %v5940_v46 }
0x10af   : > { %9621 = vmatprep.subr.bf16.mxu0 %v9620_v21 }
0x10b0   : > { %9623 = vmatpush3.bf16.msra.mxu0 %v9620_v21 }
0x10b4   : > { %9282 = vmatmul.mubr.msk.bf16.gmra.mrb[0].mxu0 %vm3241_vm5, %v10335_v1 }
0x111e   : > { %v5635_v6 = vpop.f32.mrb[168].mxu1 }
0x111f   : > { %v5487_v11 = vpop.f32.mrb[204].mxu0  ;;  %v9223_v37 = vpop.f32.mrb[169].mxu1 }
0x1120   : > { %v12328_v0 = vadd.f32 %v5635_v6, %v5487_v11  ;;  %v9187_v34 = vpop.f32.mrb[205].mxu0  ;;  %v5638_v1 = vpop.f32.mrb[170].mxu1 }
0x1121   : > { %v5490_v14 = vpop.f32.mrb[206].mxu0  ;;  %v9224_v17 = vpop.f32.mrb[171].mxu1 }
0x1122   : > { %v12330_v32 = vadd.f32 %v5638_v1, %v5490_v14  ;;  %v9188_v62 = vpop.f32.mrb[207].mxu0 }
0x1126   : > { %v5643_v20 = vpop.f32.mrb[172].mxu1 }
0x1127   : > { %v5495_v40 = vpop.f32.mrb[208].mxu0  ;;  %v9227_v43 = vpop.f32.mrb[173].mxu1 }
0x1128   : > { %v12332_v57 = vadd.f32 %v5643_v20, %v5495_v40  ;;  %v9191_v5 = vpop.f32.mrb[209].mxu0  ;;  %v5646_v8 = vpop.f32.mrb[174].mxu1  ;;  %v12356_v20 = vld [vmem:[#allocation25] ss:$0 sm:$0xff] }
0x1129   : > { %v5498_v45 = vpop.f32.mrb[210].mxu0  ;;  %v9228_v12 = vpop.f32.mrb[175].mxu1 }
0x112a   : > { %v12334_v13 = vadd.f32 %v5646_v8, %v5498_v45  ;;  %v9192_v15 = vpop.f32.mrb[211].mxu0 }
0x112e   : > { %v5651_v18 = vpop.f32.mrb[176].mxu1 }
0x112f   : > { %v5503_v16 = vpop.f32.mrb[212].mxu0  ;;  %v9231_v24 = vpop.f32.mrb[177].mxu1 }
0x1130   : > { %v12336_v29 = vadd.f32 %v5651_v18, %v5503_v16  ;;  %v9195_v26 = vpop.f32.mrb[213].mxu0  ;;  %v5654_v28 = vpop.f32.mrb[178].mxu1 }
0x1131   : > { %v5506_v39 = vpop.f32.mrb[214].mxu0  ;;  %v9232_v36 = vpop.f32.mrb[179].mxu1 }
0x1132   : > { %v12338_v23 = vadd.f32 %v5654_v28, %v5506_v39  ;;  %v9196_v53 = vpop.f32.mrb[215].mxu0 }
0x1136   : > { %v5659_v2 = vpop.f32.mrb[180].mxu1 }
0x1137   : > { %v5511_v49 = vpop.f32.mrb[216].mxu0  ;;  %v9235_v38 = vpop.f32.mrb[181].mxu1 }
0x1138   : > { %v12340_v41 = vadd.f32 %v5659_v2, %v5511_v49  ;;  %v9199_v48 = vpop.f32.mrb[217].mxu0  ;;  %v5662_v50 = vpop.f32.mrb[182].mxu1 }
0x1139   : > { %v5514_v35 = vpop.f32.mrb[218].mxu0  ;;  %v9236_v59 = vpop.f32.mrb[183].mxu1 }
0x113a   : > { %v12342_v63 = vadd.f32 %v5662_v50, %v5514_v35  ;;  %v9200_v3 = vpop.f32.mrb[219].mxu0 }
0x113e   : > { %v5667_v42 = vpop.f32.mrb[184].mxu1 }
0x113f   : > { %v5519_v54 = vpop.f32.mrb[220].mxu0  ;;  %v9239_v60 = vpop.f32.mrb[185].mxu1 }
0x1140   : > { %v12344_v58 = vadd.f32 %v5667_v42, %v5519_v54  ;;  %v9203_v52 = vpop.f32.mrb[221].mxu0  ;;  %v5670_v61 = vpop.f32.mrb[186].mxu1 }
0x1141   : > { %v5522_v10 = vpop.f32.mrb[222].mxu0  ;;  %v9240_v25 = vpop.f32.mrb[187].mxu1 }
0x1142   : > { %v12346_v9 = vadd.f32 %v5670_v61, %v5522_v10  ;;  %v9204_v56 = vpop.f32.mrb[223].mxu0 }
0x1146   : > { %v5675_v19 = vpop.f32.mrb[188].mxu1 }
0x1147   : > { %v5527_v55 = vpop.f32.mrb[224].mxu0  ;;  %v9243_v27 = vpop.f32.mrb[189].mxu1 }
0x1148   : > { %v12348_v4 = vadd.f32 %v5675_v19, %v5527_v55  ;;  %v9207_v22 = vpop.f32.mrb[225].mxu0  ;;  %v5678_v31 = vpop.f32.mrb[190].mxu1 }
0x1149   : > { %v5530_v30 = vpop.f32.mrb[226].mxu0  ;;  %v9244_v7 = vpop.f32.mrb[191].mxu1 }
0x114a   : > { %v12350_v33 = vadd.f32 %v5678_v31, %v5530_v30  ;;  %v9208_v44 = vpop.f32.mrb[227].mxu0 }
0x114e   : > { %v5683_v46 = vpop.f32.mrb[192].mxu1 }
0x114f   : > { %v5535_v47 = vpop.f32.mrb[228].mxu0  ;;  %v9247_v21 = vpop.f32.mrb[193].mxu1 }
0x1150   : > { %v12352_v6 = vadd.f32 %v5683_v46, %v5535_v47  ;;  %v9211_v11 = vpop.f32.mrb[229].mxu0  ;;  %v5686_v37 = vpop.f32.mrb[194].mxu1 }
0x1151   : > { %v5538_v34 = vpop.f32.mrb[230].mxu0  ;;  %v9248_v1 = vpop.f32.mrb[195].mxu1 }
0x1152   : > { %v12354_v14 = vadd.f32 %v5686_v37, %v5538_v34  ;;  %v9212_v17 = vpop.f32.mrb[231].mxu0 }
0x1157   : > { %v5798_v62 = vpop.f32.mrb[232].mxu0 }
0x1158   : > { %v5853_v40 = vadd.f32 %v5798_v62, %v12328_v0  ;;  %v9259_v43 = vpop.f32.mrb[233].mxu0 }
0x1159   : > { %v5801_v5 = vpop.f32.mrb[234].mxu0 }
0x115a   : > { %v5874_v8 = vadd.f32 %v12356_v20, %v5853_v40  ;;  %v5854_v45 = vadd.f32 %v5801_v5, %v12330_v32  ;;  %v9260_v12 = vpop.f32.mrb[235].mxu0 }
0x115c   : > { %v5888_v15 = vmax.f32 %v5874_v8, 0.0  ;;  %v5875_v18 = vadd.f32 %v12356_v20, %v5854_v45 }
0x115e   : > { %v5889_v16 = vmax.f32 %v5875_v18, 0.0  ;;  %8216 = vmatmul.mubr.msk.f32.vlgmr.msra.gmra.mrb[130].mxu1 %vm2355_vm4, %v5888_v15  ;;  %9313 = vmatprep.mubr.msk.f32.mxu0 %vm2355_vm4, %v5888_v15 }
0x115f   : > { %v5806_v24 = vpop.f32.mrb[236].mxu0  ;;  %6056 = vmatprep.mubr.f32.mxu1 %v11015_v51 }
0x1160   : > { %v5855_v0 = vadd.f32 %v5806_v24, %v12332_v57  ;;  %v9263_v26 = vpop.f32.mrb[237].mxu0  ;;  %9314 = vmatmul.mubr.msk.f32.vlgmr.msra.gmra.mrb[174].mxu0 %vm2355_vm4, %v5889_v16 }
0x1161   : > { %v5809_v28 = vpop.f32.mrb[238].mxu0 }
0x1162   : > { %v5876_v32 = vadd.f32 %v12356_v20, %v5855_v0  ;;  %v5856_v39 = vadd.f32 %v5809_v28, %v12334_v13  ;;  %v9264_v36 = vpop.f32.mrb[239].mxu0  ;;  %8217 = vmatmul.mubr.msk.f32.gmra.mrb[196].mxu1 %vm2355_vm4, %v5889_v16 }
0x1163   : > { %6062 = vmatprep.mubr.f32.mxu1 %v11015_v51 }
0x1164   : > { %v5890_v53 = vmax.f32 %v5876_v32, 0.0  ;;  %v5877_v2 = vadd.f32 %v12356_v20, %v5856_v39 }
0x1166   : > { %v5891_v49 = vmax.f32 %v5877_v2, 0.0  ;;  %8218 = vmatmul.mubr.msk.f32.gmra.mrb[198].mxu1 %vm2355_vm4, %v5890_v53  ;;  %9316 = vmatprep.mubr.msk.f32.mxu0 %vm2355_vm4, %v5890_v53 }
0x1167   : > { %v5814_v57 = vpop.f32.mrb[240].mxu0  ;;  %6068 = vmatprep.mubr.f32.mxu1 %v11015_v51 }
0x1168   : > { %v5857_v38 = vadd.f32 %v5814_v57, %v12336_v29  ;;  %v9267_v48 = vpop.f32.mrb[241].mxu0  ;;  %9317 = vmatmul.mubr.msk.f32.gmra.mrb[4].mxu0 %vm2355_vm4, %v5891_v49 }
0x1169   : > { %v5817_v13 = vpop.f32.mrb[242].mxu0 }
0x116a   : > { %v5878_v50 = vadd.f32 %v12356_v20, %v5857_v38  ;;  %v5858_v35 = vadd.f32 %v5817_v13, %v12338_v23  ;;  %v9268_v59 = vpop.f32.mrb[243].mxu0  ;;  %8219 = vmatmul.mubr.msk.f32.gmra.mrb[200].mxu1 %vm2355_vm4, %v5891_v49 }
0x116b   : > { %6074 = vmatprep.mubr.f32.mxu1 %v11015_v51 }
0x116c   : > { %v5892_v3 = vmax.f32 %v5878_v50, 0.0  ;;  %v5879_v42 = vadd.f32 %v12356_v20, %v5858_v35 }
0x116e   : > { %v5893_v54 = vmax.f32 %v5879_v42, 0.0  ;;  %8220 = vmatmul.mubr.msk.f32.gmra.mrb[202].mxu1 %vm2355_vm4, %v5892_v3  ;;  %9319 = vmatprep.mubr.msk.f32.mxu0 %vm2355_vm4, %v5892_v3 }
0x116f   : > { %v5822_v29 = vpop.f32.mrb[244].mxu0  ;;  %6080 = vmatprep.mubr.f32.mxu1 %v11015_v51 }
0x1170   : > { %v5859_v60 = vadd.f32 %v5822_v29, %v12340_v41  ;;  %v9271_v52 = vpop.f32.mrb[245].mxu0  ;;  %9320 = vmatmul.mubr.msk.f32.gmra.mrb[6].mxu0 %vm2355_vm4, %v5893_v54 }
0x1171   : > { %v5825_v23 = vpop.f32.mrb[246].mxu0 }
0x1172   : > { %v5880_v61 = vadd.f32 %v12356_v20, %v5859_v60  ;;  %v5860_v10 = vadd.f32 %v5825_v23, %v12342_v63  ;;  %v9272_v25 = vpop.f32.mrb[247].mxu0  ;;  %8221 = vmatmul.mubr.msk.f32.gmra.mrb[204].mxu1 %vm2355_vm4, %v5893_v54  ;;  %v8244_v60 = vld [vmem:[%s12843_s5 + $0xe0] sm:$0xff] }
0x1173   : > { %6086 = vmatprep.mubr.f32.mxu1 %v11015_v51 }
0x1174   : > { %v5894_v56 = vmax.f32 %v5880_v61, 0.0  ;;  %v5881_v19 = vadd.f32 %v12356_v20, %v5860_v10 }
0x1176   : > { %v5895_v55 = vmax.f32 %v5881_v19, 0.0  ;;  %8222 = vmatmul.mubr.msk.f32.gmra.mrb[206].mxu1 %vm2355_vm4, %v5894_v56  ;;  %9322 = vmatprep.mubr.msk.f32.mxu0 %vm2355_vm4, %v5894_v56 }
0x1177   : > { %v5830_v41 = vpop.f32.mrb[248].mxu0  ;;  %6092 = vmatprep.mubr.f32.mxu1 %v11015_v51 }
0x1178   : > { %v5861_v27 = vadd.f32 %v5830_v41, %v12344_v58  ;;  %v9275_v22 = vpop.f32.mrb[249].mxu0  ;;  %9323 = vmatmul.mubr.msk.f32.gmra.mrb[8].mxu0 %vm2355_vm4, %v5895_v55 }
0x1179   : > { %v5833_v63 = vpop.f32.mrb[250].mxu0 }
0x117a   : > { %v5882_v31 = vadd.f32 %v12356_v20, %v5861_v27  ;;  %v5862_v30 = vadd.f32 %v5833_v63, %v12346_v9  ;;  %v9276_v7 = vpop.f32.mrb[251].mxu0  ;;  %8223 = vmatmul.mubr.msk.f32.gmra.mrb[208].mxu1 %vm2355_vm4, %v5895_v55 }
0x117b   : > { %6098 = vmatprep.mubr.f32.mxu1 %v11015_v51 }
0x117c   : > { %v5896_v44 = vmax.f32 %v5882_v31, 0.0  ;;  %v5883_v46 = vadd.f32 %v12356_v20, %v5862_v30 }
0x117e   : > { %v5897_v47 = vmax.f32 %v5883_v46, 0.0  ;;  %8224 = vmatmul.mubr.msk.f32.gmra.mrb[210].mxu1 %vm2355_vm4, %v5896_v44  ;;  %9325 = vmatprep.mubr.msk.f32.mxu0 %vm2355_vm4, %v5896_v44 }
0x117f   : > { %v5838_v58 = vpop.f32.mrb[252].mxu0  ;;  %6104 = vmatprep.mubr.f32.mxu1 %v11015_v51 }
0x1180   : > { %v5863_v21 = vadd.f32 %v5838_v58, %v12348_v4  ;;  %v9279_v11 = vpop.f32.mrb[253].mxu0  ;;  %9326 = vmatmul.mubr.msk.f32.gmra.mrb[10].mxu0 %vm2355_vm4, %v5897_v47 }
0x1181   : > { %v5841_v9 = vpop.f32.mrb[254].mxu0 }
0x1182   : > { %v5884_v37 = vadd.f32 %v12356_v20, %v5863_v21  ;;  %v5864_v34 = vadd.f32 %v5841_v9, %v12350_v33  ;;  %v9280_v1 = vpop.f32.mrb[255].mxu0  ;;  %8225 = vmatmul.mubr.msk.f32.gmra.mrb[212].mxu1 %vm2355_vm4, %v5897_v47 }
0x1183   : > { %6110 = vmatprep.mubr.f32.mxu1 %v11015_v51 }
0x1184   : > { %v5898_v17 = vmax.f32 %v5884_v37, 0.0  ;;  %v5885_v62 = vadd.f32 %v12356_v20, %v5864_v34 }
0x1186   : > { %v5899_v40 = vmax.f32 %v5885_v62, 0.0  ;;  %8226 = vmatmul.mubr.msk.f32.gmra.mrb[214].mxu1 %vm2355_vm4, %v5898_v17  ;;  %9328 = vmatprep.mubr.msk.f32.mxu0 %vm2355_vm4, %v5898_v17 }
0x1187   : > { %v5846_v4 = vpop.f32.mrb[0].mxu0  ;;  %6116 = vmatprep.mubr.f32.mxu1 %v11015_v51 }
0x1188   : > { %v5865_v43 = vadd.f32 %v5846_v4, %v12352_v6  ;;  %v9283_v5 = vpop.f32.mrb[1].mxu0  ;;  %9329 = vmatmul.mubr.msk.f32.gmra.mrb[12].mxu0 %vm2355_vm4, %v5899_v40  ;;  %v8254_v6 = vld [vmem:[%s12843_s5 + $0x130] sm:$0xff] }
0x1189   : > { %v5849_v33 = vpop.f32.mrb[2].mxu0 }
0x118a   : > { %v5886_v8 = vadd.f32 %v12356_v20, %v5865_v43  ;;  %v5866_v45 = vadd.f32 %v5849_v33, %v12354_v14  ;;  %v9284_v12 = vpop.f32.mrb[3].mxu0  ;;  %8227 = vmatmul.mubr.msk.f32.gmra.mrb[216].mxu1 %vm2355_vm4, %v5899_v40 }
0x118b   : > { %6122 = vmatprep.mubr.f32.mxu1 %v11015_v51 }
0x118c   : > { %v5900_v15 = vmax.f32 %v5886_v8, 0.0  ;;  %v5887_v18 = vadd.f32 %v12356_v20, %v5866_v45 }
0x118e   : > { %v5901_v16 = vmax.f32 %v5887_v18, 0.0  ;;  %8228 = vmatmul.mubr.msk.f32.gmra.mrb[218].mxu1 %vm2355_vm4, %v5900_v15  ;;  %9331 = vmatprep.mubr.msk.f32.mxu0 %vm2355_vm4, %v5900_v15 }
0x118f   : > { %6128 = vmatprep.mubr.f32.mxu1 %v11015_v51 }
0x1190   : > { %9332 = vmatmul.mubr.msk.f32.gmra.mrb[14].mxu0 %vm2355_vm4, %v5901_v16 }
0x1191   : > { %9362 = vmatprep.mubr.msk.f32.mxu0 %vm2355_vm4, %v8244_v60  ;;  %v8267_v60 = vld [vmem:[%s12843_s5 + $0x198] sm:$0xff] }
0x1192   : > { %8229 = vmatmul.mubr.msk.f32.gmra.mrb[220].mxu1 %vm2355_vm4, %v5901_v16 }
0x1193   : > { %9377 = vmatprep.mubr.msk.f32.mxu1 %vm2355_vm4, %v8254_v6 }
0x1231   : > { %v6052_v14 = vpop.f32.mrb[130].mxu1 }
0x1232   : > { %v6054_v24 = vpop.f32.mrb[131].mxu1 }
0x1233   : > { %v9315_v0 = vpop.f32.mrb[174].mxu0 }
0x1234   : > { %v6201_v26 = vpop.f32.mrb[175].mxu0 }
0x1235   : > { %v12429_v28 = vpack.c.bf16 %v9315_v0, %v6201_v26  ;;  %v6058_v20 = vpop.f32.mrb[196].mxu1  ;;  %v8256_v0 = vld [vmem:[%s12843_s5 + $0x140] sm:$0xff]  ;;  %v8246_v26 = vld [vmem:[%s12843_s5 + $0xf0] sm:$0xff] }
0x1236   : > { %v12431_v32 = vpack.c.bf16 %v6058_v20, %v6052_v14  ;;  %v6060_v39 = vpop.f32.mrb[197].mxu1  ;;  %v8255_v14 = vld [vmem:[%s12843_s5 + $0x138] sm:$0xff]  ;;  %v8257_v20 = vld [vmem:[%s12843_s5 + $0x148] sm:$0xff] }
0x1237   : > { %v9624_v36 = vpack.c.bf16 %v6060_v39, %v6054_v24  ;;  %v8245_v24 = vld [vmem:[%s12843_s5 + $0xe8] sm:$0xff]  ;;  %v8247_v39 = vld [vmem:[%s12843_s5 + $0xf8] sm:$0xff] }
0x1239   : > { %v6064_v53 = vpop.f32.mrb[198].mxu1  ;;  %9625 = vmatprep.subr.bf16.mxu0 %v9624_v36  ;;  %9708 = vmatprep.subr.bf16.mxu1 %v9624_v36 }
0x123a   : > { %v6066_v51 = vpop.f32.mrb[199].mxu1  ;;  %9627 = vmatpush3.bf16.msra.mxu0 %v9624_v36  ;;  %9715 = vmatpush3.bf16.msra.mxu1 %v9624_v36  ;;  %v8258_v36 = vld [vmem:[%s12843_s5 + $0x150] sm:$0xff] }
0x123b   : > { %v9318_v2 = vpop.f32.mrb[4].mxu0 }
0x123c   : > { %v6211_v49 = vpop.f32.mrb[5].mxu0 }
0x123d   : > { %v12433_v57 = vpack.c.bf16 %v9318_v2, %v6211_v49  ;;  %v6070_v38 = vpop.f32.mrb[200].mxu1  ;;  %v8260_v2 = vld [vmem:[%s12843_s5 + $0x160] sm:$0xff]  ;;  %v8250_v49 = vld [vmem:[%s12843_s5 + $0x110] sm:$0xff] }
0x123e   : > { %v12435_v48 = vpack.c.bf16 %v6070_v38, %v6064_v53  ;;  %v6072_v13 = vpop.f32.mrb[201].mxu1  ;;  %v8248_v53 = vld [vmem:[%s12843_s5 + $0x100] sm:$0xff]  ;;  %v8261_v38 = vld [vmem:[%s12843_s5 + $0x168] sm:$0xff] }
0x123f   : > { %v9628_v50 = vpack.c.bf16 %v6072_v13, %v6066_v51  ;;  %v8249_v51 = vld [vmem:[%s12843_s5 + $0x108] sm:$0xff]  ;;  %v8262_v13 = vld [vmem:[%s12843_s5 + $0x170] sm:$0xff] }
0x1241   : > { %v6076_v35 = vpop.f32.mrb[202].mxu1  ;;  %9629 = vmatprep.subr.bf16.mxu0 %v9628_v50  ;;  %9709 = vmatprep.subr.bf16.mxu1 %v9628_v50 }
0x1242   : > { %v6078_v59 = vpop.f32.mrb[203].mxu1  ;;  %9631 = vmatpush3.bf16.msra.mxu0 %v9628_v50  ;;  %9716 = vmatpush3.bf16.msra.mxu1 %v9628_v50  ;;  %v8252_v50 = vld [vmem:[%s12843_s5 + $0x120] sm:$0xff] }
0x1243   : > { %v9321_v3 = vpop.f32.mrb[6].mxu0 }
0x1244   : > { %v6221_v42 = vpop.f32.mrb[7].mxu0 }
0x1245   : > { %v12437_v54 = vpack.c.bf16 %v9321_v3, %v6221_v42  ;;  %v6082_v29 = vpop.f32.mrb[204].mxu1  ;;  %v8264_v3 = vld [vmem:[%s12843_s5 + $0x180] sm:$0xff]  ;;  %v8265_v42 = vld [vmem:[%s12843_s5 + $0x188] sm:$0xff] }
0x1246   : > { %v12440_v52 = vpack.c.bf16 %v6082_v29, %v6076_v35  ;;  %v6084_v23 = vpop.f32.mrb[205].mxu1  ;;  %v8263_v35 = vld [vmem:[%s12843_s5 + $0x178] sm:$0xff]  ;;  %v8266_v29 = vld [vmem:[%s12843_s5 + $0x190] sm:$0xff] }
0x1247   : > { %v9632_v61 = vpack.c.bf16 %v6084_v23, %v6078_v59  ;;  %v8253_v59 = vld [vmem:[%s12843_s5 + $0x128] sm:$0xff] }
0x1248   : > { %v8269_v23 = vld [vmem:[%s12843_s5 + $0x1a8] sm:$0xff] }
0x1249   : > { %v6088_v10 = vpop.f32.mrb[206].mxu1  ;;  %9633 = vmatprep.subr.bf16.mxu0 %v9632_v61  ;;  %9710 = vmatprep.subr.bf16.mxu1 %v9632_v61 }
0x124a   : > { %v6090_v25 = vpop.f32.mrb[207].mxu1  ;;  %9635 = vmatpush3.bf16.msra.mxu0 %v9632_v61  ;;  %9717 = vmatpush3.bf16.msra.mxu1 %v9632_v61  ;;  %v8270_v61 = vld [vmem:[%s12843_s5 + $0x1b0] sm:$0xff] }
0x124b   : > { %v9324_v56 = vpop.f32.mrb[8].mxu0 }
0x124c   : > { %v6231_v19 = vpop.f32.mrb[9].mxu0 }
0x124d   : > { %v12443_v55 = vpack.c.bf16 %v9324_v56, %v6231_v19  ;;  %v6094_v41 = vpop.f32.mrb[208].mxu1  ;;  %v6271_v56 = vld [vmem:[%s12843_s5 + $0x8] sm:$0xff]  ;;  %v6272_v19 = vld [vmem:[%s12843_s5 + $0x10] sm:$0xff] }
0x124e   : > { %v12445_v27 = vpack.c.bf16 %v6094_v41, %v6088_v10  ;;  %v6096_v22 = vpop.f32.mrb[209].mxu1  ;;  %v8271_v10 = vld [vmem:[%s12843_s5 + $0x1b8] sm:$0xff] }
0x124f   : > { %v9636_v63 = vpack.c.bf16 %v6096_v22, %v6090_v25  ;;  %v6270_v25 = vld [vmem:[%s12843_s5] sm:$0xff]  ;;  %v6273_v41 = vld [vmem:[%s12843_s5 + $0x18] sm:$0xff]  ;;  %v6275_v22 = vld [vmem:[%s12843_s5 + $0x28] sm:$0xff] }
0x1251   : > { %v6100_v31 = vpop.f32.mrb[210].mxu1  ;;  %9637 = vmatprep.subr.bf16.mxu0 %v9636_v63  ;;  %9711 = vmatprep.subr.bf16.mxu1 %v9636_v63 }
0x1252   : > { %v6102_v30 = vpop.f32.mrb[211].mxu1  ;;  %9639 = vmatpush3.bf16.msra.mxu0 %v9636_v63  ;;  %9718 = vmatpush3.bf16.msra.mxu1 %v9636_v63  ;;  %v6276_v63 = vld [vmem:[%s12843_s5 + $0x30] sm:$0xff] }
0x1253   : > { %v9327_v7 = vpop.f32.mrb[10].mxu0 }
0x1254   : > { %v6241_v44 = vpop.f32.mrb[11].mxu0 }
0x1255   : > { %v12447_v46 = vpack.c.bf16 %v9327_v7, %v6241_v44  ;;  %v6106_v47 = vpop.f32.mrb[212].mxu1  ;;  %v6283_v7 = vld [vmem:[%s12843_s5 + $0x68] sm:$0xff]  ;;  %v6284_v44 = vld [vmem:[%s12843_s5 + $0x70] sm:$0xff] }
0x1256   : > { %v12449_v58 = vpack.c.bf16 %v6106_v47, %v6100_v31  ;;  %v6108_v21 = vpop.f32.mrb[213].mxu1  ;;  %v6278_v31 = vld [vmem:[%s12843_s5 + $0x40] sm:$0xff] }
0x1257   : > { %v9640_v11 = vpack.c.bf16 %v6108_v21, %v6102_v30  ;;  %v6280_v30 = vld [vmem:[%s12843_s5 + $0x50] sm:$0xff]  ;;  %v6286_v47 = vld [vmem:[%s12843_s5 + $0x80] sm:$0xff] }
0x1258   : > { %v6288_v21 = vld [vmem:[%s12843_s5 + $0x90] sm:$0xff] }
0x1259   : > { %v6112_v9 = vpop.f32.mrb[214].mxu1  ;;  %9641 = vmatprep.subr.bf16.mxu0 %v9640_v11  ;;  %9712 = vmatprep.subr.bf16.mxu1 %v9640_v11 }
0x125a   : > { %v6114_v37 = vpop.f32.mrb[215].mxu1  ;;  %9643 = vmatpush3.bf16.msra.mxu0 %v9640_v11  ;;  %9719 = vmatpush3.bf16.msra.mxu1 %v9640_v11  ;;  %v6289_v11 = vld [vmem:[%s12843_s5 + $0x98] sm:$0xff] }
0x125b   : > { %v9330_v34 = vpop.f32.mrb[12].mxu0 }
0x125c   : > { %v6251_v1 = vpop.f32.mrb[13].mxu0 }
0x125d   : > { %v12451_v17 = vpack.c.bf16 %v9330_v34, %v6251_v1  ;;  %v6118_v62 = vpop.f32.mrb[216].mxu1  ;;  %v6292_v34 = vld [vmem:[%s12843_s5 + $0xb0] sm:$0xff]  ;;  %v6293_v1 = vld [vmem:[%s12843_s5 + $0xb8] sm:$0xff] }
0x125e   : > { %v12453_v40 = vpack.c.bf16 %v6118_v62, %v6112_v9  ;;  %v6120_v4 = vpop.f32.mrb[217].mxu1  ;;  %v6290_v9 = vld [vmem:[%s12843_s5 + $0xa0] sm:$0xff]  ;;  %v6295_v62 = vld [vmem:[%s12843_s5 + $0xc8] sm:$0xff] }
0x125f   : > { %v9644_v43 = vpack.c.bf16 %v6120_v4, %v6114_v37  ;;  %v6291_v37 = vld [vmem:[%s12843_s5 + $0xa8] sm:$0xff]  ;;  %v6297_v4 = vld [vmem:[%s12843_s5 + $0xd8] sm:$0xff] }
0x1261   : > { %v6124_v5 = vpop.f32.mrb[218].mxu1  ;;  %9645 = vmatprep.subr.bf16.mxu0 %v9644_v43  ;;  %9713 = vmatprep.subr.bf16.mxu1 %v9644_v43 }
0x1262   : > { %v6126_v33 = vpop.f32.mrb[219].mxu1  ;;  %9647 = vmatpush3.bf16.msra.mxu0 %v9644_v43  ;;  %9720 = vmatpush3.bf16.msra.mxu1 %v9644_v43  ;;  %v8328_v43 = vld [vmem:[%s12843_s5 + $0x1c0] sm:$0xff] }
0x1263   : > { %v9333_v8 = vpop.f32.mrb[14].mxu0 }
0x1264   : > { %v6261_v45 = vpop.f32.mrb[15].mxu0 }
0x1265   : > { %v12455_v12 = vpack.c.bf16 %v9333_v8, %v6261_v45  ;;  %v6130_v15 = vpop.f32.mrb[220].mxu1  ;;  %v8331_v8 = vld [vmem:[%s12843_s5 + $0x1d8] sm:$0xff]  ;;  %v8332_v45 = vld [vmem:[%s12843_s5 + $0x1e0] sm:$0xff] }
0x1266   : > { %v12457_v18 = vpack.c.bf16 %v6130_v15, %v6124_v5  ;;  %v6132_v16 = vpop.f32.mrb[221].mxu1  ;;  %v8329_v5 = vld [vmem:[%s12843_s5 + $0x1c8] sm:$0xff]  ;;  %v8334_v15 = vld [vmem:[%s12843_s5 + $0x1f0] sm:$0xff] }
0x1267   : > { %v9648_v6 = vpack.c.bf16 %v6132_v16, %v6126_v33  ;;  %v8330_v33 = vld [vmem:[%s12843_s5 + $0x1d0] sm:$0xff]  ;;  %v8336_v16 = vld [vmem:[%s12843_s5 + $0x200] sm:$0xff] }
0x1269   : > { %9649 = vmatprep.subr.bf16.mxu0 %v9648_v6  ;;  %9714 = vmatprep.subr.bf16.mxu1 %v9648_v6 }
0x126a   : > { %9651 = vmatpush3.bf16.msra.mxu0 %v9648_v6  ;;  %9721 = vmatpush3.bf16.msra.mxu1 %v9648_v6  ;;  %v8337_v6 = vld [vmem:[%s12843_s5 + $0x208] sm:$0xff] }
0x126b   : > { %9653 = vmatprep.subr.bf16.mxu1 %v12431_v32 }
0x126d   : > { %9378 = vmatmul.mubr.msk.f32.vlgmr.msra.gmra.mrb[222].mxu1 %vm2355_vm4, %v8255_v14  ;;  %9363 = vmatmul.mubr.msk.f32.vlgmr.msra.gmra.mrb[16].mxu0 %vm2355_vm4, %v8245_v24  ;;  %v8338_v14 = vld [vmem:[%s12843_s5 + $0x210] sm:$0xff]  ;;  %v8339_v24 = vld [vmem:[%s12843_s5 + $0x218] sm:$0xff] }
0x126e   : > { %9655 = vmatpush3.bf16.msra.mxu1 %v12431_v32  ;;  %9380 = vmatprep.mubr.msk.f32.mxu1 %vm2355_vm4, %v8256_v0  ;;  %v8259_v32 = vld [vmem:[%s12843_s5 + $0x158] sm:$0xff]  ;;  %v8340_v0 = vld [vmem:[%s12843_s5 + $0x220] sm:$0xff] }
0x126f   : > { %9657 = vmatprep.subr.bf16.mxu1 %v12435_v48  ;;  %9365 = vmatprep.mubr.msk.f32.mxu0 %vm2355_vm4, %v8246_v26  ;;  %v8341_v26 = vld [vmem:[%s12843_s5 + $0x228] sm:$0xff] }
0x1271   : > { %9381 = vmatmul.mubr.msk.f32.gmra.mrb[224].mxu1 %vm2355_vm4, %v8257_v20  ;;  %9366 = vmatmul.mubr.msk.f32.gmra.mrb[18].mxu0 %vm2355_vm4, %v8247_v39  ;;  %v8342_v20 = vld [vmem:[%s12843_s5 + $0x230] sm:$0xff]  ;;  %v8343_v39 = vld [vmem:[%s12843_s5 + $0x238] sm:$0xff] }
0x1272   : > { %9659 = vmatpush3.bf16.msra.mxu1 %v12435_v48  ;;  %9383 = vmatprep.mubr.msk.f32.mxu1 %vm2355_vm4, %v8258_v36  ;;  %v8251_v48 = vld [vmem:[%s12843_s5 + $0x118] sm:$0xff]  ;;  %v8344_v36 = vld [vmem:[%s12843_s5 + $0x240] sm:$0xff] }
0x1273   : > { %9661 = vmatprep.subr.bf16.mxu1 %v12440_v52  ;;  %9368 = vmatprep.mubr.msk.f32.mxu0 %vm2355_vm4, %v8248_v53  ;;  %v8345_v53 = vld [vmem:[%s12843_s5 + $0x248] sm:$0xff] }
0x1275   : > { %9384 = vmatmul.mubr.msk.f32.gmra.mrb[226].mxu1 %vm2355_vm4, %v8259_v32  ;;  %9369 = vmatmul.mubr.msk.f32.gmra.mrb[20].mxu0 %vm2355_vm4, %v8249_v51  ;;  %v8346_v32 = vld [vmem:[%s12843_s5 + $0x250] sm:$0xff]  ;;  %v8347_v51 = vld [vmem:[%s12843_s5 + $0x258] sm:$0xff] }
0x1276   : > { %9663 = vmatpush3.bf16.msra.mxu1 %v12440_v52  ;;  %9386 = vmatprep.mubr.msk.f32.mxu1 %vm2355_vm4, %v8260_v2  ;;  %v8268_v52 = vld [vmem:[%s12843_s5 + $0x1a0] sm:$0xff] }
0x1277   : > { %9665 = vmatprep.subr.bf16.mxu1 %v12445_v27  ;;  %9371 = vmatprep.mubr.msk.f32.mxu0 %vm2355_vm4, %v8250_v49  ;;  %v8348_v2 = vld [vmem:[%s12843_s5 + $0x260] sm:$0xff]  ;;  %v8349_v49 = vld [vmem:[%s12843_s5 + $0x268] sm:$0xff] }
0x1279   : > { %9387 = vmatmul.mubr.msk.f32.gmra.mrb[228].mxu1 %vm2355_vm4, %v8261_v38  ;;  %9372 = vmatmul.mubr.msk.f32.gmra.mrb[22].mxu0 %vm2355_vm4, %v8251_v48  ;;  %v8350_v38 = vld [vmem:[%s12843_s5 + $0x270] sm:$0xff]  ;;  %v8351_v48 = vld [vmem:[%s12843_s5 + $0x278] sm:$0xff] }
0x127a   : > { %9667 = vmatpush3.bf16.msra.mxu1 %v12445_v27  ;;  %9389 = vmatprep.mubr.msk.f32.mxu1 %vm2355_vm4, %v8262_v13  ;;  %v6274_v27 = vld [vmem:[%s12843_s5 + $0x20] sm:$0xff] }
0x127b   : > { %9669 = vmatprep.subr.bf16.mxu1 %v12449_v58  ;;  %9374 = vmatprep.mubr.msk.f32.mxu0 %vm2355_vm4, %v8252_v50  ;;  %v8352_v13 = vld [vmem:[%s12843_s5 + $0x280] sm:$0xff]  ;;  %v8353_v50 = vld [vmem:[%s12843_s5 + $0x288] sm:$0xff] }
0x127d   : > { %9390 = vmatmul.mubr.msk.f32.gmra.mrb[230].mxu1 %vm2355_vm4, %v8263_v35  ;;  %9375 = vmatmul.mubr.msk.f32.gmra.mrb[24].mxu0 %vm2355_vm4, %v8253_v59  ;;  %v8354_v35 = vld [vmem:[%s12843_s5 + $0x290] sm:$0xff]  ;;  %v8355_v59 = vld [vmem:[%s12843_s5 + $0x298] sm:$0xff] }
0x127e   : > { %9671 = vmatpush3.bf16.msra.mxu1 %v12449_v58  ;;  %9392 = vmatprep.mubr.msk.f32.mxu1 %vm2355_vm4, %v8264_v3  ;;  %v6287_v58 = vld [vmem:[%s12843_s5 + $0x88] sm:$0xff] }
0x127f   : > { %9673 = vmatprep.subr.bf16.mxu1 %v12453_v40 }
0x1281   : > { %9393 = vmatmul.mubr.msk.f32.gmra.mrb[232].mxu1 %vm2355_vm4, %v8265_v42 }
0x1282   : > { %9675 = vmatpush3.bf16.msra.mxu1 %v12453_v40  ;;  %9395 = vmatprep.mubr.msk.f32.mxu1 %vm2355_vm4, %v8266_v29  ;;  %v6296_v40 = vld [vmem:[%s12843_s5 + $0xd0] sm:$0xff] }
0x1283   : > { %9677 = vmatprep.subr.bf16.mxu1 %v12457_v18 }
0x1285   : > { %9396 = vmatmul.mubr.msk.f32.gmra.mrb[234].mxu1 %vm2355_vm4, %v8267_v60 }
0x1286   : > { %9679 = vmatpush3.bf16.msra.mxu1 %v12457_v18  ;;  %9398 = vmatprep.mubr.msk.f32.mxu1 %vm2355_vm4, %v8268_v52  ;;  %v8335_v18 = vld [vmem:[%s12843_s5 + $0x1f8] sm:$0xff] }
0x1287   : > { %9681 = vmatprep.subr.bf16.mxu1 %v12429_v28 }
0x1289   : > { %9399 = vmatmul.mubr.msk.f32.gmra.mrb[236].mxu1 %vm2355_vm4, %v8269_v23 }
0x128a   : > { %9401 = vmatprep.mubr.msk.f32.mxu1 %vm2355_vm4, %v8270_v61 }
0x128d   : > { %9402 = vmatmul.mubr.msk.f32.gmra.mrb[238].mxu1 %vm2355_vm4, %v8271_v10 }
0x128e   : > { %9432 = vmatprep.mubr.msk.f32.mxu1 %vm2355_vm4, %v6270_v25 }
0x1291   : > { %9433 = vmatmul.mubr.msk.f32.vlgmr.msra.gmra.mrb[240].mxu1 %vm2355_vm4, %v6271_v56 }
0x1292   : > { %9683 = vmatpush3.bf16.msra.mxu1 %v12429_v28  ;;  %9435 = vmatprep.mubr.msk.f32.mxu1 %vm2355_vm4, %v6272_v19  ;;  %v6277_v28 = vld [vmem:[%s12843_s5 + $0x38] sm:$0xff] }
0x1293   : > { %9685 = vmatprep.subr.bf16.mxu1 %v12433_v57 }
0x1295   : > { %9436 = vmatmul.mubr.msk.f32.gmra.mrb[242].mxu1 %vm2355_vm4, %v6273_v41  ;;  %v12652_v41 = vld [vmem:[%s12891_s9] ss:$0 sm:$0xff]  ;;  %s10874_s9 = scalar_lea.vmem %s10873_s8, 7168 }
0x1296   : > { %9687 = vmatpush3.bf16.msra.mxu1 %v12433_v57  ;;  %9438 = vmatprep.mubr.msk.f32.mxu1 %vm2355_vm4, %v6274_v27  ;;  %v6279_v57 = vld [vmem:[%s12843_s5 + $0x48] sm:$0xff] }
0x1297   : > { %9689 = vmatprep.subr.bf16.mxu1 %v12437_v54 }
0x1299   : > { %9439 = vmatmul.mubr.msk.f32.gmra.mrb[244].mxu1 %vm2355_vm4, %v6275_v22 }
0x129a   : > { %9691 = vmatpush3.bf16.msra.mxu1 %v12437_v54  ;;  %9441 = vmatprep.mubr.msk.f32.mxu1 %vm2355_vm4, %v6276_v63  ;;  %v6281_v54 = vld [vmem:[%s12843_s5 + $0x58] sm:$0xff] }
0x129b   : > { %9693 = vmatprep.subr.bf16.mxu1 %v12443_v55 }
0x129d   : > { %9442 = vmatmul.mubr.msk.f32.gmra.mrb[246].mxu1 %vm2355_vm4, %v6277_v28 }
0x129e   : > { %9695 = vmatpush3.bf16.msra.mxu1 %v12443_v55  ;;  %9444 = vmatprep.mubr.msk.f32.mxu1 %vm2355_vm4, %v6278_v31  ;;  %v6282_v55 = vld [vmem:[%s12843_s5 + $0x60] sm:$0xff] }
0x129f   : > { %9697 = vmatprep.subr.bf16.mxu1 %v12447_v46 }
0x12a1   : > { %9445 = vmatmul.mubr.msk.f32.gmra.mrb[248].mxu1 %vm2355_vm4, %v6279_v57 }
0x12a2   : > { %9699 = vmatpush3.bf16.msra.mxu1 %v12447_v46  ;;  %9447 = vmatprep.mubr.msk.f32.mxu1 %vm2355_vm4, %v6280_v30  ;;  %v6285_v46 = vld [vmem:[%s12843_s5 + $0x78] sm:$0xff] }
0x12a3   : > { %9701 = vmatprep.subr.bf16.mxu1 %v12451_v17 }
0x12a5   : > { %9448 = vmatmul.mubr.msk.f32.gmra.mrb[222].mxu1 %vm2355_vm4, %v6281_v54 }
0x12a6   : > { %9703 = vmatpush3.bf16.msra.mxu1 %v12451_v17  ;;  %9450 = vmatprep.mubr.msk.f32.mxu1 %vm2355_vm4, %v6282_v55  ;;  %v6294_v17 = vld [vmem:[%s12843_s5 + $0xc0] sm:$0xff] }
0x12a7   : > { %9705 = vmatprep.subr.bf16.mxu1 %v12455_v12 }
0x12a9   : > { %9451 = vmatmul.mubr.msk.f32.gmra.mrb[224].mxu1 %vm2355_vm4, %v6283_v7 }
0x12aa   : > { %9707 = vmatpush3.bf16.msra.mxu1 %v12455_v12  ;;  %9453 = vmatprep.mubr.msk.f32.mxu1 %vm2355_vm4, %v6284_v44  ;;  %v8333_v12 = vld [vmem:[%s12843_s5 + $0x1e8] sm:$0xff]  ;;  %s10868_s5 = scalar_lea.vmem %s12741_s1, 3584 }
0x12ab   : > { %p10869_p3 = scmp.ne.s32.totalorder %s12741_s1, %s10868_s5  ;;  %p10876_p9 = scmp.lt.s32.totalorder %s10874_s9, %s10868_s5 }
0x12ad   : > { %9454 = vmatmul.mubr.msk.f32.gmra.mrb[226].mxu1 %vm2355_vm4, %v6285_v46  ;;  %p10870_p12 = pnand %p10869_p3, %p12893_p4  ;;  %p10877_p10 = por %p10876_p9, %p10875_p6 }
0x12ae   : > { %9456 = vmatprep.mubr.msk.f32.mxu1 %vm2355_vm4, %v6286_v47 }
0x12af   : > { %p10871_p5 = pneg %p10870_p12 }
0x12b1   : > { %9457 = vmatmul.mubr.msk.f32.gmra.mrb[228].mxu1 %vm2355_vm4, %v6287_v58  ;;  %p10878_p7 = pnand %p10877_p10, %p10871_p5 }
0x12b2   : > { %9459 = vmatprep.mubr.msk.f32.mxu1 %vm2355_vm4, %v6288_v21 }
0x12b5   : > { %9460 = vmatmul.mubr.msk.f32.gmra.mrb[230].mxu1 %vm2355_vm4, %v6289_v11 }
0x12b6   : > { %9462 = vmatprep.mubr.msk.f32.mxu1 %vm2355_vm4, %v6290_v9 }
0x12b9   : > { %9463 = vmatmul.mubr.msk.f32.gmra.mrb[232].mxu1 %vm2355_vm4, %v6291_v37 }
0x12ba   : > { %9465 = vmatprep.mubr.msk.f32.mxu1 %vm2355_vm4, %v6292_v34 }
0x12bd   : > { %9466 = vmatmul.mubr.msk.f32.gmra.mrb[234].mxu1 %vm2355_vm4, %v6293_v1 }
0x12be   : > { %9468 = vmatprep.mubr.msk.f32.mxu1 %vm2355_vm4, %v6294_v17 }
0x12c1   : > { %9469 = vmatmul.mubr.msk.f32.gmra.mrb[236].mxu1 %vm2355_vm4, %v6295_v62 }
0x12c2   : > { %9471 = vmatprep.mubr.msk.f32.mxu1 %vm2355_vm4, %v6296_v40 }
0x12c5   : > { %9472 = vmatmul.mubr.msk.f32.gmra.mrb[238].mxu1 %vm2355_vm4, %v6297_v4 }
0x12c6   : > { %9502 = vmatprep.mubr.msk.f32.mxu1 %vm2355_vm4, %v8328_v43 }
0x12c9   : > { %9503 = vmatmul.mubr.msk.f32.vlgmr.msra.gmra.mrb[240].mxu1 %vm2355_vm4, %v8329_v5 }
0x12ca   : > { %9505 = vmatprep.mubr.msk.f32.mxu1 %vm2355_vm4, %v8330_v33 }
0x12cd   : > { %9506 = vmatmul.mubr.msk.f32.gmra.mrb[242].mxu1 %vm2355_vm4, %v8331_v8 }
0x12ce   : > { %9508 = vmatprep.mubr.msk.f32.mxu1 %vm2355_vm4, %v8332_v45 }
0x12d1   : > { %9509 = vmatmul.mubr.msk.f32.gmra.mrb[244].mxu1 %vm2355_vm4, %v8333_v12 }
0x12d2   : > { %9511 = vmatprep.mubr.msk.f32.mxu1 %vm2355_vm4, %v8334_v15 }
0x12d5   : > { %9512 = vmatmul.mubr.msk.f32.gmra.mrb[246].mxu1 %vm2355_vm4, %v8335_v18 }
0x12d6   : > { %9514 = vmatprep.mubr.msk.f32.mxu1 %vm2355_vm4, %v8336_v16 }
0x12d9   : > { %9515 = vmatmul.mubr.msk.f32.gmra.mrb[248].mxu1 %vm2355_vm4, %v8337_v6 }
0x12da   : > { %9517 = vmatprep.mubr.msk.f32.mxu1 %vm2355_vm4, %v8338_v14 }
0x12dd   : > { %9518 = vmatmul.mubr.msk.f32.gmra.mrb[222].mxu1 %vm2355_vm4, %v8339_v24 }
0x12de   : > { %9520 = vmatprep.mubr.msk.f32.mxu1 %vm2355_vm4, %v8340_v0 }
0x12e1   : > { %9521 = vmatmul.mubr.msk.f32.gmra.mrb[224].mxu1 %vm2355_vm4, %v8341_v26 }
0x12e2   : > { %9523 = vmatprep.mubr.msk.f32.mxu1 %vm2355_vm4, %v8342_v20 }
0x12e5   : > { %9524 = vmatmul.mubr.msk.f32.gmra.mrb[226].mxu1 %vm2355_vm4, %v8343_v39 }
0x12e6   : > { %9526 = vmatprep.mubr.msk.f32.mxu1 %vm2355_vm4, %v8344_v36 }
0x12e9   : > { %9527 = vmatmul.mubr.msk.f32.gmra.mrb[228].mxu1 %vm2355_vm4, %v8345_v53 }
0x12ea   : > { %9529 = vmatprep.mubr.msk.f32.mxu1 %vm2355_vm4, %v8346_v32 }
0x12ed   : > { %9530 = vmatmul.mubr.msk.f32.gmra.mrb[230].mxu1 %vm2355_vm4, %v8347_v51 }
0x12ee   : > { %9532 = vmatprep.mubr.msk.f32.mxu1 %vm2355_vm4, %v8348_v2 }
0x12f1   : > { %9533 = vmatmul.mubr.msk.f32.gmra.mrb[232].mxu1 %vm2355_vm4, %v8349_v49 }
0x12f2   : > { %9535 = vmatprep.mubr.msk.f32.mxu1 %vm2355_vm4, %v8350_v38 }
0x12f5   : > { %9536 = vmatmul.mubr.msk.f32.gmra.mrb[234].mxu1 %vm2355_vm4, %v8351_v48 }
0x12f6   : > { %9538 = vmatprep.mubr.msk.f32.mxu1 %vm2355_vm4, %v8352_v13 }
0x12f9   : > { %9539 = vmatmul.mubr.msk.f32.gmra.mrb[236].mxu1 %vm2355_vm4, %v8353_v50 }
0x12fa   : > { %9541 = vmatprep.mubr.msk.f32.mxu1 %vm2355_vm4, %v8354_v35 }
0x12fd   : > { %9542 = vmatmul.mubr.msk.f32.gmra.mrb[238].mxu1 %vm2355_vm4, %v8355_v59 }
0x1340   : > { %v9364_v3 = vpop.f32.mrb[16].mxu0 }
0x1341   : > { %v6477_v42 = vpop.f32.mrb[17].mxu0 }
0x1344   : > { %v9367_v29 = vpop.f32.mrb[18].mxu0 }
0x1345   : > { %v6487_v60 = vpop.f32.mrb[19].mxu0 }
0x1348   : > { %v9370_v52 = vpop.f32.mrb[20].mxu0 }
0x1349   : > { %v6497_v23 = vpop.f32.mrb[21].mxu0 }
0x134c   : > { %v9373_v61 = vpop.f32.mrb[22].mxu0 }
0x134d   : > { %v6507_v10 = vpop.f32.mrb[23].mxu0 }
0x1350   : > { %v9376_v25 = vpop.f32.mrb[24].mxu0 }
0x1351   : > { %v6517_v56 = vpop.f32.mrb[25].mxu0 }
0x139c   : > { %v9504_v19 = vpop.f32.mrb[240].mxu1 }
0x139d   : > { %v9722_v27 = vadd.f32 %v9504_v19, %v9364_v3  ;;  %v7084_v22 = vpop.f32.mrb[241].mxu1 }
0x139e   : > { %v9723_v63 = vadd.f32 %v7084_v22, %v6477_v42 }
0x139f   : > { %v7259_v28 = vadd.f32 %v9722_v27, %v12652_v41 }
0x13a0   : > { %v7258_v31 = vadd.f32 %v9723_v63, %v12652_v41  ;;  %v9507_v57 = vpop.f32.mrb[242].mxu1 }
0x13a1   : > { %v8386_v30 = vmul.f32 -1.442695, %v7259_v28  ;;  %v9724_v54 = vadd.f32 %v9507_v57, %v9367_v29  ;;  %v7094_v55 = vpop.f32.mrb[243].mxu1 }
0x13a2   : > { %v8385_v7 = vmul.f32 -1.442695, %v7258_v31  ;;  %v9725_v44 = vadd.f32 %v7094_v55, %v6487_v60 }
0x13a3   : > { %10336 = vpow2.f32 %v8386_v30  ;;  %v7261_v46 = vadd.f32 %v9724_v54, %v12652_v41 }
0x13a4   : > { %10338 = vpow2.f32 %v8385_v7  ;;  %v7260_v47 = vadd.f32 %v9725_v44, %v12652_v41  ;;  %v9510_v58 = vpop.f32.mrb[244].mxu1 }
0x13a5   : > { %v8388_v21 = vmul.f32 -1.442695, %v7261_v46  ;;  %v9726_v11 = vadd.f32 %v9510_v58, %v9370_v52  ;;  %v7104_v9 = vpop.f32.mrb[245].mxu1 }
0x13a6   : > { %v8387_v37 = vmul.f32 -1.442695, %v7260_v47  ;;  %v9727_v34 = vadd.f32 %v7104_v9, %v6497_v23 }
0x13a7   : > { %10340 = vpow2.f32 %v8388_v21  ;;  %v7263_v1 = vadd.f32 %v9726_v11, %v12652_v41 }
0x13a8   : > { %10342 = vpow2.f32 %v8387_v37  ;;  %v7262_v17 = vadd.f32 %v9727_v34, %v12652_v41  ;;  %v9513_v62 = vpop.f32.mrb[246].mxu1 }
0x13a9   : > { %v8390_v40 = vmul.f32 -1.442695, %v7263_v1  ;;  %v9728_v4 = vadd.f32 %v9513_v62, %v9373_v61  ;;  %v7114_v43 = vpop.f32.mrb[247].mxu1 }
0x13aa   : > { %v8389_v5 = vmul.f32 -1.442695, %v7262_v17  ;;  %v9729_v33 = vadd.f32 %v7114_v43, %v6507_v10 }
0x13ab   : > { %10344 = vpow2.f32 %v8390_v40  ;;  %v7265_v8 = vadd.f32 %v9728_v4, %v12652_v41 }
0x13ac   : > { %10346 = vpow2.f32 %v8389_v5  ;;  %v7264_v45 = vadd.f32 %v9729_v33, %v12652_v41  ;;  %v9516_v12 = vpop.f32.mrb[248].mxu1 }
0x13ad   : > { %v10337_v15 = vpop.eup %10336  ;;  %v8392_v18 = vmul.f32 -1.442695, %v7265_v8  ;;  %v9730_v16 = vadd.f32 %v9516_v12, %v9376_v25  ;;  %v7124_v6 = vpop.f32.mrb[249].mxu1 }
0x13ae   : > { %v10339_v14 = vpop.eup %10338  ;;  %v7371_v24 = vadd.f32 1.0, %v10337_v15  ;;  %v8391_v0 = vmul.f32 -1.442695, %v7264_v45  ;;  %v9731_v26 = vadd.f32 %v7124_v6, %v6517_v56 }
0x13af   : > { %v7370_v20 = vadd.f32 1.0, %v10339_v14  ;;  %10348 = vpow2.f32 %v8392_v18  ;;  %v7267_v39 = vadd.f32 %v9730_v16, %v12652_v41 }
0x13b0   : > { %10350 = vrcp.f32 %v7371_v24  ;;  %v7266_v36 = vadd.f32 %v9731_v26, %v12652_v41  ;;  %v9519_v53 = vpop.f32.mrb[222].mxu1 }
0x13b1   : > { %v10341_v32 = vpop.eup %10340  ;;  %10352 = vrcp.f32 %v7370_v20  ;;  %v8394_v51 = vmul.f32 -1.442695, %v7267_v39  ;;  %v7269_v2 = vadd.f32 %v9519_v53, %v12652_v41  ;;  %v7134_v49 = vpop.f32.mrb[223].mxu1 }
0x13b2   : > { %v10343_v38 = vpop.eup %10342  ;;  %v7373_v48 = vadd.f32 1.0, %v10341_v32  ;;  %10354 = vpow2.f32 %v8391_v0  ;;  %v8393_v13 = vmul.f32 -1.442695, %v7266_v36  ;;  %v7268_v50 = vadd.f32 %v12652_v41, %v7134_v49 }
0x13b3   : > { %v7372_v35 = vadd.f32 1.0, %v10343_v38  ;;  %10356 = vpow2.f32 %v8394_v51  ;;  %v8396_v59 = vmul.f32 -1.442695, %v7269_v2 }
0x13b4   : > { %10358 = vrcp.f32 %v7373_v48  ;;  %v9522_v3 = vpop.f32.mrb[224].mxu1  ;;  %v8395_v61 = vmul.f32 -1.442695, %v7268_v50 }
0x13b5   : > { %v10345_v42 = vpop.eup %10344  ;;  %10360 = vrcp.f32 %v7372_v35  ;;  %v7271_v29 = vadd.f32 %v9522_v3, %v12652_v41  ;;  %v7144_v60 = vpop.f32.mrb[225].mxu1 }
0x13b6   : > { %v10347_v52 = vpop.eup %10346  ;;  %v7375_v23 = vadd.f32 1.0, %v10345_v42  ;;  %10362 = vpow2.f32 %v8393_v13  ;;  %v7270_v10 = vadd.f32 %v12652_v41, %v7144_v60 }
0x13b7   : > { %v7374_v25 = vadd.f32 1.0, %v10347_v52  ;;  %10364 = vpow2.f32 %v8396_v59  ;;  %v8398_v56 = vmul.f32 -1.442695, %v7271_v29 }
0x13b8   : > { %10366 = vrcp.f32 %v7375_v23  ;;  %v9525_v19 = vpop.f32.mrb[226].mxu1  ;;  %v8397_v22 = vmul.f32 -1.442695, %v7270_v10 }
0x13b9   : > { %v10349_v27 = vpop.eup %10348  ;;  %10368 = vrcp.f32 %v7374_v25  ;;  %v7273_v63 = vadd.f32 %v9525_v19, %v12652_v41  ;;  %v7154_v28 = vpop.f32.mrb[227].mxu1 }
0x13ba   : > { %v10351_v31 = vpop.eup %10350  ;;  %v7377_v57 = vadd.f32 1.0, %v10349_v27  ;;  %10370 = vpow2.f32 %v8395_v61  ;;  %v7272_v30 = vadd.f32 %v12652_v41, %v7154_v28 }
0x13bb   : > { %v10353_v54 = vpop.eup %10352  ;;  %7455 = vst.msk [vmem:[%s12673_s11 + $0x8] sm:$0xff] %vm1182_vm1, %v10351_v31  ;;  %10372 = vpow2.f32 %v8398_v56  ;;  %v8400_v55 = vmul.f32 -1.442695, %v7273_v63 }
0x13bc   : > { %v10355_v7 = vpop.eup %10354  ;;  %7454 = vst.msk [vmem:[%s12673_s11] sm:$0xff] %vm1182_vm1, %v10353_v54  ;;  %10374 = vrcp.f32 %v7377_v57  ;;  %v9528_v44 = vpop.f32.mrb[228].mxu1  ;;  %v8399_v58 = vmul.f32 -1.442695, %v7272_v30 }
0x13bd   : > { %v10357_v46 = vpop.eup %10356  ;;  %v7376_v47 = vadd.f32 1.0, %v10355_v7  ;;  %10376 = vpow2.f32 %v8397_v22  ;;  %v7275_v21 = vadd.f32 %v9528_v44, %v12652_v41  ;;  %v7164_v11 = vpop.f32.mrb[229].mxu1 }
0x13be   : > { %v10359_v9 = vpop.eup %10358  ;;  %v7379_v37 = vadd.f32 1.0, %v10357_v46  ;;  %10378 = vpow2.f32 %v8400_v55  ;;  %v7274_v34 = vadd.f32 %v12652_v41, %v7164_v11 }
0x13bf   : > { %v10361_v1 = vpop.eup %10360  ;;  %7457 = vst.msk [vmem:[%s12673_s11 + $0x18] sm:$0xff] %vm1182_vm1, %v10359_v9  ;;  %10380 = vrcp.f32 %v7376_v47  ;;  %v8402_v17 = vmul.f32 -1.442695, %v7275_v21 }
0x13c0   : > { %v10363_v62 = vpop.eup %10362  ;;  %7456 = vst.msk [vmem:[%s12673_s11 + $0x10] sm:$0xff] %vm1182_vm1, %v10361_v1  ;;  %10382 = vrcp.f32 %v7379_v37  ;;  %v9531_v40 = vpop.f32.mrb[230].mxu1  ;;  %v8401_v5 = vmul.f32 -1.442695, %v7274_v34 }
0x13c1   : > { %v10365_v4 = vpop.eup %10364  ;;  %v7378_v43 = vadd.f32 1.0, %v10363_v62  ;;  %10384 = vpow2.f32 %v8399_v58  ;;  %v7277_v33 = vadd.f32 %v9531_v40, %v12652_v41  ;;  %v7174_v8 = vpop.f32.mrb[231].mxu1 }
0x13c2   : > { %v10367_v45 = vpop.eup %10366  ;;  %v7381_v12 = vadd.f32 1.0, %v10365_v4  ;;  %10386 = vpow2.f32 %v8402_v17  ;;  %v7276_v15 = vadd.f32 %v12652_v41, %v7174_v8 }
0x13c3   : > { %v10369_v18 = vpop.eup %10368  ;;  %7459 = vst.msk [vmem:[%s12673_s11 + $0x28] sm:$0xff] %vm1182_vm1, %v10367_v45  ;;  %10388 = vrcp.f32 %v7378_v43  ;;  %v8404_v16 = vmul.f32 -1.442695, %v7277_v33 }
0x13c4   : > { %v10371_v6 = vpop.eup %10370  ;;  %7458 = vst.msk [vmem:[%s12673_s11 + $0x20] sm:$0xff] %vm1182_vm1, %v10369_v18  ;;  %10390 = vrcp.f32 %v7381_v12  ;;  %v9534_v14 = vpop.f32.mrb[232].mxu1  ;;  %v8403_v26 = vmul.f32 -1.442695, %v7276_v15 }
0x13c5   : > { %v10373_v24 = vpop.eup %10372  ;;  %v7380_v0 = vadd.f32 1.0, %v10371_v6  ;;  %10392 = vpow2.f32 %v8401_v5  ;;  %v7279_v20 = vadd.f32 %v9534_v14, %v12652_v41  ;;  %v7184_v39 = vpop.f32.mrb[233].mxu1 }
0x13c6   : > { %v10375_v36 = vpop.eup %10374  ;;  %v7383_v53 = vadd.f32 1.0, %v10373_v24  ;;  %10394 = vpow2.f32 %v8404_v16  ;;  %v7278_v32 = vadd.f32 %v12652_v41, %v7184_v39 }
0x13c7   : > { %v10377_v51 = vpop.eup %10376  ;;  %7461 = vst.msk [vmem:[%s12673_s11 + $0x38] sm:$0xff] %vm1182_vm1, %v10375_v36  ;;  %10396 = vrcp.f32 %v7380_v0  ;;  %v8406_v38 = vmul.f32 -1.442695, %v7279_v20 }
0x13c8   : > { %v10379_v2 = vpop.eup %10378  ;;  %10398 = vrcp.f32 %v7383_v53  ;;  %v7382_v49 = vadd.f32 1.0, %v10377_v51  ;;  %v9537_v48 = vpop.f32.mrb[234].mxu1  ;;  %v8405_v35 = vmul.f32 -1.442695, %v7278_v32 }
0x13c9   : > { %v10381_v13 = vpop.eup %10380  ;;  %v7385_v50 = vadd.f32 1.0, %v10379_v2  ;;  %10400 = vpow2.f32 %v8403_v26  ;;  %v7281_v59 = vadd.f32 %v9537_v48, %v12652_v41  ;;  %v7194_v3 = vpop.f32.mrb[235].mxu1 }
0x13ca   : > { %v10383_v42 = vpop.eup %10382  ;;  %7460 = vst.msk [vmem:[%s12673_s11 + $0x30] sm:$0xff] %vm1182_vm1, %v10381_v13  ;;  %10402 = vrcp.f32 %v7382_v49  ;;  %v7280_v29 = vadd.f32 %v12652_v41, %v7194_v3 }
0x13cb   : > { %v10385_v60 = vpop.eup %10384  ;;  %7463 = vst.msk [vmem:[%s12673_s11 + $0x48] sm:$0xff] %vm1182_vm1, %v10383_v42  ;;  %10404 = vrcp.f32 %v7385_v50  ;;  %v8408_v61 = vmul.f32 -1.442695, %v7281_v59 }
0x13cc   : > { %v10387_v52 = vpop.eup %10386  ;;  %v7384_v23 = vadd.f32 1.0, %v10385_v60  ;;  %10406 = vpow2.f32 %v8406_v38  ;;  %v9540_v10 = vpop.f32.mrb[236].mxu1  ;;  %v8407_v19 = vmul.f32 -1.442695, %v7280_v29 }
0x13cd   : > { %v10389_v25 = vpop.eup %10388  ;;  %v7387_v56 = vadd.f32 1.0, %v10387_v52  ;;  %10408 = vpow2.f32 %v8405_v35  ;;  %v7283_v27 = vadd.f32 %v9540_v10, %v12652_v41  ;;  %v7204_v22 = vpop.f32.mrb[237].mxu1 }
0x13ce   : > { %v10391_v63 = vpop.eup %10390  ;;  %7462 = vst.msk [vmem:[%s12673_s11 + $0x40] sm:$0xff] %vm1182_vm1, %v10389_v25  ;;  %10410 = vrcp.f32 %v7384_v23  ;;  %v7282_v28 = vadd.f32 %v12652_v41, %v7204_v22 }
0x13cf   : > { %v10393_v31 = vpop.eup %10392  ;;  %7465 = vst.msk [vmem:[%s12673_s11 + $0x58] sm:$0xff] %vm1182_vm1, %v10391_v63  ;;  %10412 = vrcp.f32 %v7387_v56  ;;  %v8410_v54 = vmul.f32 -1.442695, %v7283_v27 }
0x13d0   : > { %v10395_v57 = vpop.eup %10394  ;;  %v7386_v30 = vadd.f32 1.0, %v10393_v31  ;;  %10414 = vpow2.f32 %v8408_v61  ;;  %v9543_v55 = vpop.f32.mrb[238].mxu1  ;;  %v8409_v46 = vmul.f32 -1.442695, %v7282_v28 }
0x13d1   : > { %v10397_v7 = vpop.eup %10396  ;;  %v7389_v44 = vadd.f32 1.0, %v10395_v57  ;;  %10416 = vpow2.f32 %v8407_v19  ;;  %v7285_v47 = vadd.f32 %v9543_v55, %v12652_v41  ;;  %v7214_v58 = vpop.f32.mrb[239].mxu1 }
0x13d2   : > { %v10399_v21 = vpop.eup %10398  ;;  %7464 = vst.msk [vmem:[%s12673_s11 + $0x50] sm:$0xff] %vm1182_vm1, %v10397_v7  ;;  %10418 = vrcp.f32 %v7386_v30  ;;  %v7284_v11 = vadd.f32 %v12652_v41, %v7214_v58 }
0x13d3   : > { %v10401_v9 = vpop.eup %10400  ;;  %7467 = vst.msk [vmem:[%s12673_s11 + $0x68] sm:$0xff] %vm1182_vm1, %v10399_v21  ;;  %10420 = vrcp.f32 %v7389_v44  ;;  %v8412_v37 = vmul.f32 -1.442695, %v7285_v47 }
0x13d4   : > { %v10403_v34 = vpop.eup %10402  ;;  %v7388_v1 = vadd.f32 1.0, %v10401_v9  ;;  %10422 = vpow2.f32 %v8410_v54  ;;  %v8411_v17 = vmul.f32 -1.442695, %v7284_v11 }
0x13d5   : > { %v10405_v62 = vpop.eup %10404  ;;  %7466 = vst.msk [vmem:[%s12673_s11 + $0x60] sm:$0xff] %vm1182_vm1, %v10403_v34  ;;  %10424 = vpow2.f32 %v8409_v46 }
0x13d6   : > { %v10407_v40 = vpop.eup %10406  ;;  %7469 = vst.msk [vmem:[%s12673_s11 + $0x78] sm:$0xff] %vm1182_vm1, %v10405_v62  ;;  %10426 = vrcp.f32 %v7388_v1 }
0x13d7   : > { %v10409_v41 = vpop.eup %10408  ;;  %v7391_v4 = vadd.f32 1.0, %v10407_v40  ;;  %10428 = vpow2.f32 %v8412_v37 }
0x13d8   : > { %v10411_v43 = vpop.eup %10410  ;;  %v7390_v5 = vadd.f32 1.0, %v10409_v41  ;;  %10430 = vpow2.f32 %v8411_v17 }
0x13d9   : > { %v10413_v33 = vpop.eup %10412  ;;  %7468 = vst.msk [vmem:[%s12673_s11 + $0x70] sm:$0xff] %vm1182_vm1, %v10411_v43  ;;  %10432 = vrcp.f32 %v7391_v4 }
0x13da   : > { %v10415_v8 = vpop.eup %10414  ;;  %7471 = vst.msk [vmem:[%s12673_s11 + $0x88] sm:$0xff] %vm1182_vm1, %v10413_v33  ;;  %10434 = vrcp.f32 %v7390_v5 }
0x13db   : > { %v10417_v45 = vpop.eup %10416  ;;  %v7393_v12 = vadd.f32 1.0, %v10415_v8 }
0x13dc   : > { %v10419_v15 = vpop.eup %10418  ;;  %v7392_v18 = vadd.f32 1.0, %v10417_v45 }
0x13dd   : > { %v10421_v16 = vpop.eup %10420  ;;  %7470 = vst.msk [vmem:[%s12673_s11 + $0x80] sm:$0xff] %vm1182_vm1, %v10419_v15  ;;  %10436 = vrcp.f32 %v7393_v12 }
0x13de   : > { %v10423_v6 = vpop.eup %10422  ;;  %7473 = vst.msk [vmem:[%s12673_s11 + $0x98] sm:$0xff] %vm1182_vm1, %v10421_v16  ;;  %10438 = vrcp.f32 %v7392_v18 }
0x13df   : > { %v10425_v14 = vpop.eup %10424  ;;  %v7395_v24 = vadd.f32 1.0, %v10423_v6 }
0x13e0   : > { %v10427_v0 = vpop.eup %10426  ;;  %v7394_v26 = vadd.f32 1.0, %v10425_v14 }
0x13e1   : > { %v10429_v20 = vpop.eup %10428  ;;  %7472 = vst.msk [vmem:[%s12673_s11 + $0x90] sm:$0xff] %vm1182_vm1, %v10427_v0  ;;  %10440 = vrcp.f32 %v7395_v24 }
0x13e2   : > { %v10431_v39 = vpop.eup %10430  ;;  %10442 = vrcp.f32 %v7394_v26  ;;  %v7397_v36 = vadd.f32 1.0, %v10429_v20 }
0x13e3   : > { %v10433_v53 = vpop.eup %10432  ;;  %v7396_v32 = vadd.f32 1.0, %v10431_v39 }
0x13e4   : > { %v10435_v51 = vpop.eup %10434  ;;  %7475 = vst.msk [vmem:[%s12673_s11 + $0xa8] sm:$0xff] %vm1182_vm1, %v10433_v53  ;;  %10444 = vrcp.f32 %v7397_v36 }
0x13e5   : > { %7474 = vst.msk [vmem:[%s12673_s11 + $0xa0] sm:$0xff] %vm1182_vm1, %v10435_v51  ;;  %10446 = vrcp.f32 %v7396_v32 }
0x13e7   : > { %v10437_v2 = vpop.eup %10436 }
0x13e8   : > { %v10439_v49 = vpop.eup %10438  ;;  %7477 = vst.msk [vmem:[%s12673_s11 + $0xb8] sm:$0xff] %vm1182_vm1, %v10437_v2 }
0x13e9   : > { %7476 = vst.msk [vmem:[%s12673_s11 + $0xb0] sm:$0xff] %vm1182_vm1, %v10439_v49 }
0x13eb   : > { %v10441_v38 = vpop.eup %10440 }
0x13ec   : > { %v10443_v48 = vpop.eup %10442  ;;  %7479 = vst.msk [vmem:[%s12673_s11 + $0xc8] sm:$0xff] %vm1182_vm1, %v10441_v38 }
0x13ed   : > { %7478 = vst.msk [vmem:[%s12673_s11 + $0xc0] sm:$0xff] %vm1182_vm1, %v10443_v48 }
0x13ee   : > { %v10445_v13 = vpop.eup %10444 }
0x13ef   : > { %v10447_v50 = vpop.eup %10446  ;;  %7481 = vst.msk [vmem:[%s12673_s11 + $0xd8] sm:$0xff] %vm1182_vm1, %v10445_v13 }
0x13f0   : > { %7480 = vst.msk [vmem:[%s12673_s11 + $0xd0] sm:$0xff] %vm1182_vm1, %v10447_v50 }
0x13f1   : > { %10881 = shalt.err (!%p10878_p7)
}
0x13f2   : > { %s10882_s11 = scalar_lea.hbm %s12744_s2, 3584  ;;  %s10886_s6 = scalar_lea.hbm %s11174_s4, 7168 }
0x13f3   : > { %p10883_p8 = scmp.ne.s32.totalorder %s12744_s2, %s10882_s11  ;;  %p10887_p1 = scmp.lt.u32.totalorder %s12744_s2, %s11174_s4 }
0x13f4   : > { %p10888_p2 = scmp.lt.u32.totalorder %s10886_s6, %s10882_s11  ;;  %p10890_p3 = scmp.lt.u32.totalorder %s10882_s11, %s12744_s2 }
0x13f5   : > { %p10884_p11 = pnand %p10883_p8, %p12893_p4 }
0x13f6   : > { %p10889_p0 = por %p10888_p2, %p10887_p1 }
0x13f7   : > { %p10885_p13 = pneg %p10884_p11 }
0x13f8   : > { %p10891_p12 = por %p10890_p3, %p10889_p0 }
0x13fa   : > { %p10892_p5 = pnand %p10891_p12, %p10885_p13 }
0x13fc   : > { %10895 = shalt.err (!%p10892_p5)
}
0x13fd   : > { %s11019_s5 = smov 128   ;;  %s11020_s9 = smov 8  }
0x13fe   : > { %9873 = dma.vmem_to_hbm [thread:$0]  (%p12893_p4), %s12741_s1, 3584, %s12744_s2, %s12752_s3, %s11019_s5, %s11019_s5, %s11020_s9  }
0x13ff PF: > { %s12894_s8 = sld [smem:[#allocation56_spill]]  ;;  %s12895_s7 = sld [smem:[#allocation60_spill]] }
0x1400   : > { %p9955_p6 = scmp.ge.s32.totalorder %s10962_s15, 2 }
0x1405   : > { %s7511_s0 = sand.u32 1, %s12894_s8   ;;  %p12896_p9 = scmp.ne.s32.totalorder %s12895_s7, 0 }
0x1406   : > { %s7512_s11 = scalar_lea.sflag [#allocation4], %s7511_s0 }
0x1407   : > { %p9922_p10 = pnand %p9955_p6, %p12896_p9 }
0x1409   : > { %10945 = dma.done.wait (!%p9922_p10), %s7512_s11, 3584  }
0x140a   : > { %10947 = vsyncadd (!%p9922_p10), %s7512_s11, 4294963712  ;;  %s12897_s15 = sld [smem:[#allocation58_spill]]  ;;  %s12898_s6 = sld [smem:[#allocation57_spill]] }
0x140b   : > { %s12899_s11 = sld [smem:[#allocation59_spill]]  ;;  %s12900_s7 = smov %s10954_s10 }
0x1410   : > { %p77_p7 = scmp.ge.s32.totalorder %s12897_s15, 4   ;;  %s12901_s10 = smov %s12898_s6 }
0x1412   :  { %79 = sbr.rel (!%p77_p7) target bundleno = 65 (0x41), region = 277 }
0x1419   :  { %7517 = vsyncpa [#allocation3], 1 }
0x141a   :  { %7519 = vsyncpa [#allocation3 + $0x1], 1 }
0x141b   :  { %7520 = vsyncpa [#allocation6], 1 }
0x141c   :  { %7521 = vsyncpa [#allocation9], 1 }
0x141d   :  { %7522 = vsyncpa [#allocation12], 1 }
0x141e   :  { %7523 = vsyncpa [#allocation15], 1 }
0x141f   :  { %7524 = vsyncpa [#allocation18], 1 }
0x1420   :  { %7525 = vsyncpa [#allocation21], 1 }
0x1421   :  { %7526 = vsyncpa [#allocation24], 1 }
0x1422   :  { %7527 = vsyncpa [#allocation4], 1 }
0x1423   :  { %7529 = vsyncpa [#allocation4 + $0x1], 1 }

</bundles_post_ra>
